<compile_context>
chip_gen: v5e
topology: v5e:2x2
jax: 0.10.0
libtpu: 0.0.40
codegen_flags: <defaults>
</compile_context>

<pallas_src>
import numpy as np
import jax
import jax.numpy as jnp
from jax.experimental import pallas as pl
from jax.experimental.pallas import tpu as pltpu


# --------------------------------------------------------------------------- #
# One-time weight pre-lowering (host-side numpy; NOT in the jitted path).
# --------------------------------------------------------------------------- #

def _conv_slab(w, b, wp_in, w_out, stride, col_off=0):
    """Lower a conv weight (kh, kw, cin, cout) into one fused-K slab.

    Activations live in a zero-halo padded VMEM buffer whose rows have lane
    layout (padded column)*cin + ch and width wp_in*cin.  Output row r /
    column c / channel o is

        sum_{i,j,ch} buf[row_off + stride*r + i,
                         (stride*c + col_off + j)*cin + ch] * w[i, j, ch, o] + b[o]

    The kernel builds the matmul LHS by concatenating the kh row views
    buf[row_off + stride*r + i, :] along the lane axis (i = 0..kh-1), so the
    slab stacks the kh banded matrices along K.  A tiled-bias row is appended
    as the last row of the slab.
    """
    w = np.asarray(w, np.float32)
    b = np.asarray(b, np.float32)
    kh, kw, cin, cout = w.shape
    m = np.zeros((kh, wp_in, cin, w_out, cout), np.float32)
    for c in range(w_out):
        for j in range(kw):
            cj = stride * c + col_off + j
            if 0 <= cj < wp_in:
                m[:, cj, :, c, :] = w[:, j, :, :]
    m = m.reshape(kh * wp_in * cin, w_out * cout)
    bias = np.tile(b, w_out).reshape(1, w_out * cout)
    return np.concatenate([m, bias], axis=0)        # (kh*wp_in*cin + 1, w_out*cout)


# --------------------------------------------------------------------------- #
# Build the fused forward pass (single grid-less pallas_call).
# --------------------------------------------------------------------------- #

def make_resnet_forward(params, *, in_channels, nblocks, fmaps, height, width):
    """Pre-lower the weights once and return a jitted forward(X0, X1, X2)."""
    f0, f1 = fmaps
    cin, h, w = in_channels, height, width
    assert h == w, "square inputs assumed"
    ds = f1 // f0
    assert ds > 1, "layer2 must downsample (fmaps[1] > fmaps[0])"

    hp0 = h + 2                           # conv0 padded size (pad=1)
    h0 = hp0 - 7 + 1                      # conv0 output size (k=7, s=1): 12
    assert h0 % 2 == 0
    h1 = h0 // 2                          # after 2x2 max pool: 6
    hp1 = h1 + 2
    h2 = (h1 + 2 - 3) // ds + 1           # after the downsampling block: 3
    hp2 = h2 + 2

    K0 = 7 * hp0 * cin                    # conv0 fused contraction
    KA = 3 * hp1 * f0                     # stage-1 3x3 convs
    KB = 3 * hp2 * f1                     # stage-2 3x3 convs
    KS = hp1 * f0                         # 1x1 stride-ds shortcut

    def to_bf16(a):
        return jnp.asarray(a, jnp.bfloat16)

    # conv0 slab: (K0+1, h0*f0)
    w0 = to_bf16(_conv_slab(params["conv0_w"], params["conv0_b"], hp0, h0, 1))

    # layer1 slabs stacked: (2*nblocks, KA+1, h1*f0)
    slabs_a = []
    for p in params["layer1"]:
        slabs_a.append(_conv_slab(p["w1"], p["b1"], hp1, h1, 1))
        slabs_a.append(_conv_slab(p["w2"], p["b2"], hp1, h1, 1))
    wa = to_bf16(np.stack(slabs_a, axis=0))

    # layer2 (downsampling block): conv1, 1x1 shortcut (padded-buffer offset 1)
    p2 = params["layer2"][0]
    w2c1 = to_bf16(_conv_slab(p2["w1"], p2["b1"], hp1, h2, ds))            # (KA+1, h2*f1)
    w2sc = to_bf16(_conv_slab(p2["ws"], p2["bs"], hp1, h2, ds, col_off=1))  # (KS+1, h2*f1)

    # layer2 conv2 + layer3 slabs stacked: (1 + 2*nblocks, KB+1, h2*f1)
    slabs_b = [_conv_slab(p2["w2"], p2["b2"], hp2, h2, 1)]
    for p in params["layer3"]:
        slabs_b.append(_conv_slab(p["w1"], p["b1"], hp2, h2, 1))
        slabs_b.append(_conv_slab(p["w2"], p["b2"], hp2, h2, 1))
    wb = to_bf16(np.stack(slabs_b, axis=0))

    # fc slab (kept f32): [w_pooled(f1), w_X1, w_X2, bias]
    fc_w = np.asarray(params["fc_w"], np.float32)
    fc_b = np.asarray(params["fc_b"], np.float32)
    fc = jnp.asarray(np.concatenate([fc_w[:, 0], fc_b]).reshape(1, f1 + 3),
                     jnp.float32)

    def forward(X0_nchw, X1, X2):
        n = X0_nchw.shape[0]
        assert X0_nchw.shape == (n, cin, h, w)

        # NCHW -> lane-dense (N, H, W*Cin); tiny one-off XLA transform.
        x = jnp.transpose(X0_nchw, (0, 2, 3, 1)).reshape(n, h, w * cin)
        x = x.astype(jnp.float32)
        xs = jnp.concatenate([X1, X2], axis=1).astype(jnp.float32)   # (n, 2)

        def kernel(x_ref, xs_ref, w0_ref, wa_ref, w2c1_ref, w2sc_ref, wb_ref,
                   fc_ref, o_ref,
                   pad_in, s1_a, s1_b, s1_m, s2_a, s2_b, s2_m):
            f32 = jnp.float32
            bf = jnp.bfloat16

            # Zero the padded scratch buffers once: halos must read as zeros;
            # every interior region is fully overwritten before it is read.
            for buf in (pad_in, s1_a, s1_b, s1_m, s2_a, s2_b, s2_m):
                buf[...] = jnp.zeros_like(buf)

            # ------------------------- helpers ------------------------------
            def lhs_s1(buf, hp, hout, kh):
                """(n*hout, kh*lanes) im2row LHS for a stride-1 conv."""
                per_img = []
                for b in range(n):
                    taps = [buf[b * hp + i: b * hp + i + hout, :]
                            for i in range(kh)]
                    per_img.append(jnp.concatenate(taps, axis=1))
                return jnp.concatenate(per_img, axis=0)

            def conv(lhs, slab, kdim, relu):
                out = jnp.dot(lhs.astype(bf), slab[0:kdim, :],
                              preferred_element_type=f32)
                out = out + slab[kdim:kdim + 1, :].astype(f32)
                return jnp.maximum(out, 0.0) if relu else out

            # ---------------- conv0 + ReLU + 2x2 max pool --------------------
            for b in range(n):
                pad_in[b * hp0 + 1: b * hp0 + 1 + h, cin: cin + w * cin] = x_ref[b]
            y0 = conv(lhs_s1(pad_in, hp0, h0, 7), w0_ref[...], K0, relu=True)  # (n*h0, h0*f0)

            rows = []
            for b in range(n):
                for r in range(h1):
                    ra = y0[b * h0 + 2 * r: b * h0 + 2 * r + 1, :]
                    rb = y0[b * h0 + 2 * r + 1: b * h0 + 2 * r + 2, :]
                    rows.append(jnp.maximum(ra, rb))
            rmax = jnp.concatenate(rows, axis=0)                               # (n*h1, h0*f0)
            even = jnp.concatenate(
                [rmax[:, (2 * c) * f0: (2 * c + 1) * f0] for c in range(h1)], axis=1)
            odd = jnp.concatenate(
                [rmax[:, (2 * c + 1) * f0: (2 * c + 2) * f0] for c in range(h1)], axis=1)
            pooled0 = jnp.maximum(even, odd)                                   # (n*h1, h1*f0)
            for b in range(n):
                s1_a[b * hp1 + 1: b * hp1 + 1 + h1, f0: f0 + h1 * f0] = \
                    pooled0[b * h1: (b + 1) * h1, :]

            # ---------------- stride-1 residual block ------------------------
            def res_block(in_buf, mid_buf, out_buf, slab1, slab2, kdim, hp, hout, cout):
                lo, hi = cout, cout + hout * cout
                o1 = conv(lhs_s1(in_buf, hp, hout, 3), slab1, kdim, relu=True)
                for b in range(n):
                    mid_buf[b * hp + 1: b * hp + 1 + hout, lo:hi] = \
                        o1[b * hout: (b + 1) * hout, :]
                o2 = conv(lhs_s1(mid_buf, hp, hout, 3), slab2, kdim, relu=False)
                res = jnp.concatenate(
                    [in_buf[b * hp + 1: b * hp + 1 + hout, lo:hi] for b in range(n)],
                    axis=0)
                y = jnp.maximum(o2 + res, 0.0)
                for b in range(n):
                    out_buf[b * hp + 1: b * hp + 1 + hout, lo:hi] = \
                        y[b * hout: (b + 1) * hout, :]

            # layer1 (stride-1 blocks, f0 channels), ping-pong s1_a <-> s1_b
            cur, alt = s1_a, s1_b
            for i in range(nblocks):
                res_block(cur, s1_m, alt, wa_ref[2 * i], wa_ref[2 * i + 1],
                          KA, hp1, h1, f0)
                cur, alt = alt, cur
            l1_out = cur

            # layer2: 3x3/stride-ds + 3x3 + 1x1/stride-ds shortcut, one block.
            rows1, rows_sc = [], []
            for b in range(n):
                for r in range(h2):
                    base = b * hp1 + ds * r
                    rows1.append(jnp.concatenate(
                        [l1_out[base + i: base + i + 1, :] for i in range(3)], axis=1))
                    rows_sc.append(l1_out[base + 1: base + 2, :])
            o1 = conv(jnp.concatenate(rows1, axis=0), w2c1_ref[...], KA, relu=True)
            for b in range(n):
                s2_m[b * hp2 + 1: b * hp2 + 1 + h2, f1: f1 + h2 * f1] = \
                    o1[b * h2: (b + 1) * h2, :]
            o2 = conv(lhs_s1(s2_m, hp2, h2, 3), wb_ref[0], KB, relu=False)
            res = conv(jnp.concatenate(rows_sc, axis=0), w2sc_ref[...], KS, relu=False)
            y2 = jnp.maximum(o2 + res, 0.0)
            for b in range(n):
                s2_a[b * hp2 + 1: b * hp2 + 1 + h2, f1: f1 + h2 * f1] = \
                    y2[b * h2: (b + 1) * h2, :]

            # layer3 (stride-1 blocks, f1 channels), ping-pong s2_a <-> s2_b
            cur, alt = s2_a, s2_b
            for i in range(nblocks):
                res_block(cur, s2_m, alt, wb_ref[1 + 2 * i], wb_ref[2 + 2 * i],
                          KB, hp2, h2, f1)
                cur, alt = alt, cur
            final = cur

            # ---------------- head: global max pool + concat + Linear --------
            feats = []
            for b in range(n):
                blk = final[b * hp2 + 1: b * hp2 + 1 + h2, f1: f1 + h2 * f1]   # (h2, h2*f1)
                m = jnp.max(blk, axis=0, keepdims=True)                        # (1, h2*f1)
                p = m[:, 0:f1]
                for c in range(1, h2):
                    p = jnp.maximum(p, m[:, c * f1: (c + 1) * f1])
                feats.append(p)
            pooled = jnp.concatenate(feats, axis=0)                            # (n, f1)
            fcv = fc_ref[...]                                                  # (1, f1+3)
            val = jnp.sum(pooled * fcv[:, 0:f1], axis=1, keepdims=True)
            val = val + jnp.sum(xs_ref[...] * fcv[:, f1:f1 + 2], axis=1, keepdims=True)
            val = val + fcv[:, f1 + 2: f1 + 3]
            o_ref[...] = val.astype(o_ref.dtype)

        scratch_shapes = [
            pltpu.VMEM((n * hp0, hp0 * cin), jnp.float32),    # conv0 padded input
            pltpu.VMEM((n * hp1, hp1 * f0), jnp.float32),     # stage-1 ping
            pltpu.VMEM((n * hp1, hp1 * f0), jnp.float32),     # stage-1 pong
            pltpu.VMEM((n * hp1, hp1 * f0), jnp.float32),     # stage-1 mid
            pltpu.VMEM((n * hp2, hp2 * f1), jnp.float32),     # stage-2 ping
            pltpu.VMEM((n * hp2, hp2 * f1), jnp.float32),     # stage-2 pong
            pltpu.VMEM((n * hp2, hp2 * f1), jnp.float32),     # stage-2 mid
        ]

        # TODO(synk): on v7x a 2-way "parallel" batch grid could split images
        # across the two TensorCores; with batch=2 and ~us of work the single
        # stacked-M call is kept instead (better MXU fill on v5e/v6e).
        return pl.pallas_call(
            kernel,
            out_shape=jax.ShapeDtypeStruct((n, 1), jnp.float32),
            scratch_shapes=scratch_shapes,
        )(x, xs, w0, wa, w2c1, w2sc, wb, fc)

    return jax.jit(forward)


# --------------------------------------------------------------------------- #
# Pure-JAX reference (correctness check only; conv operands rounded to bf16 to
# match the kernel's MXU input dtype, accumulation kept in f32).
# --------------------------------------------------------------------------- #

def resnet_reference(params, X0_nchw, X1, X2):
    bf = jnp.bfloat16

    def conv(x, wgt, b, stride, padding):
        out = jax.lax.conv_general_dilated(
            x.astype(bf), wgt.astype(bf),
            window_strides=(stride, stride),
            padding=[(padding, padding), (padding, padding)],
            dimension_numbers=("NHWC", "HWIO", "NHWC"),
            preferred_element_type=jnp.float32)
        return out + b.astype(bf).astype(jnp.float32)

    f0 = params["conv0_b"].shape[0]
    f1 = params["fc_w"].shape[0] - 2
    ds = f1 // f0
    x = jnp.transpose(X0_nchw, (0, 2, 3, 1)).astype(jnp.float32)
    x = jax.nn.relu(conv(x, params["conv0_w"], params["conv0_b"], 1, 1))
    x = jax.lax.reduce_window(x, -jnp.inf, jax.lax.max,
                              (1, 2, 2, 1), (1, 2, 2, 1), "VALID")

    def block(x, p, stride):
        out = jax.nn.relu(conv(x, p["w1"], p["b1"], stride, 1))
        out = conv(out, p["w2"], p["b2"], 1, 1)
        res = x if stride == 1 else conv(x, p["ws"], p["bs"], stride, 0)
        return jax.nn.relu(out + res)

    for p in params["layer1"]:
        x = block(x, p, 1)
    for p in params["layer2"]:
        x = block(x, p, ds)
    for p in params["layer3"]:
        x = block(x, p, 1)
    pooled = jnp.max(x, axis=(1, 2))
    feat = jnp.concatenate([pooled, X1, X2], axis=1)
    return feat @ params["fc_w"] + params["fc_b"]


# --------------------------------------------------------------------------- #
# Parameter init (matches the PyTorch module's structure).
# --------------------------------------------------------------------------- #

def init_params(key, in_channels, nblocks, fmaps):
    def conv_init(k, kh, kw, ci, co):
        k1, k2 = jax.random.split(k)
        bound = 1.0 / np.sqrt(ci * kh * kw)
        wgt = jax.random.uniform(k1, (kh, kw, ci, co), jnp.float32, -bound, bound)
        b = jax.random.uniform(k2, (co,), jnp.float32, -bound, bound)
        return wgt, b

    def block_init(k, ci, co):
        k1, k2, k3 = jax.random.split(k, 3)
        w1, b1 = conv_init(k1, 3, 3, ci, co)
        w2, b2 = conv_init(k2, 3, 3, co, co)
        ws, bs = conv_init(k3, 1, 1, ci, co)   # shortcut (used only when downsampling)
        return {"w1": w1, "b1": b1, "w2": w2, "b2": b2, "ws": ws, "bs": bs}

    keys = jax.random.split(key, 2 * nblocks + 3)
    params = {}
    params["conv0_w"], params["conv0_b"] = conv_init(keys[0], 7, 7, in_channels, fmaps[0])
    params["layer1"] = [block_init(keys[1 + i], fmaps[0], fmaps[0]) for i in range(nblocks)]
    params["layer2"] = [block_init(keys[1 + nblocks], fmaps[0], fmaps[1])]
    params["layer3"] = [block_init(keys[2 + nblocks + i], fmaps[1], fmaps[1]) for i in range(nblocks)]
    kf1, kf2 = jax.random.split(keys[-1])
    fin = fmaps[1] + 2
    bound = 1.0 / np.sqrt(fin)
    params["fc_w"] = jax.random.uniform(kf1, (fin, 1), jnp.float32, -bound, bound)
    params["fc_b"] = jax.random.uniform(kf2, (1,), jnp.float32, -bound, bound)
    return params


# --------------------------------- main ------------------------------------ #

if __name__ == "__main__":
    in_channels, nblocks, fmaps = 4, 2, [8, 16]
    N, H, W = 2, 16, 16

    key = jax.random.PRNGKey(0)
    kp, k0, k1, k2 = jax.random.split(key, 4)

    params = init_params(kp, in_channels, nblocks, fmaps)
    X0 = jax.random.normal(k0, (N, in_channels, H, W), jnp.float32)   # NCHW, like PyTorch
    X1 = jax.random.normal(k1, (N, 1), jnp.float32)
    X2 = jax.random.normal(k2, (N, 1), jnp.float32)

    fwd = make_resnet_forward(params, in_channels=in_channels, nblocks=nblocks,
                              fmaps=fmaps, height=H, width=W)
    out = jax.block_until_ready(fwd(X0, X1, X2))

    assert out.shape == (N, 1), out.shape
    assert bool(jnp.all(jnp.isfinite(out)))

    ref = jax.block_until_ready(resnet_reference(params, X0, X1, X2))
    assert bool(jnp.allclose(out, ref, rtol=5e-3, atol=5e-3)), (out, ref)

    print("KERNEL_OK")
</pallas_src>

<mosaic_0001>
module attributes {stable_mosaic.version = 11 : i64} {
  func.func @kernel(%arg0: memref<2x16x64xf32, #tpu.memory_space<vmem>>, %arg1: memref<2x2xf32, #tpu.memory_space<vmem>>, %arg2: memref<505x96xbf16, #tpu.memory_space<vmem>>, %arg3: memref<4x193x48xbf16, #tpu.memory_space<vmem>>, %arg4: memref<193x48xbf16, #tpu.memory_space<vmem>>, %arg5: memref<65x48xbf16, #tpu.memory_space<vmem>>, %arg6: memref<5x241x48xbf16, #tpu.memory_space<vmem>>, %arg7: memref<1x19xf32, #tpu.memory_space<vmem>>, %arg8: memref<2x1xf32, #tpu.memory_space<vmem>>, %arg9: memref<36x72xf32, #tpu.memory_space<vmem>>, %arg10: memref<16x64xf32, #tpu.memory_space<vmem>>, %arg11: memref<16x64xf32, #tpu.memory_space<vmem>>, %arg12: memref<16x64xf32, #tpu.memory_space<vmem>>, %arg13: memref<10x80xf32, #tpu.memory_space<vmem>>, %arg14: memref<10x80xf32, #tpu.memory_space<vmem>>, %arg15: memref<10x80xf32, #tpu.memory_space<vmem>>) attributes {dimension_semantics = [], scalar_prefetch = 0 : i64, scratch_operands = 7 : i64, tpu.core_type = #tpu.core_type<tc>} {
    %cst = arith.constant 0.000000e+00 : f32
    %0 = vector.broadcast %cst : f32 to vector<36x72xf32>
    %c0 = arith.constant 0 : index
    %c0_0 = arith.constant 0 : index
    %1 = vector.load %arg9[%c0, %c0_0] : memref<36x72xf32, #tpu.memory_space<vmem>>, vector<36x72xf32>
    tpu.vector_store %arg9[%c0, %c0_0], %0 {strides = array<i32>} : memref<36x72xf32, #tpu.memory_space<vmem>>, vector<36x72xf32>,
    %cst_1 = arith.constant 0.000000e+00 : f32
    %2 = vector.broadcast %cst_1 : f32 to vector<16x64xf32>
    %c0_2 = arith.constant 0 : index
    %c0_3 = arith.constant 0 : index
    %3 = vector.load %arg10[%c0_2, %c0_3] : memref<16x64xf32, #tpu.memory_space<vmem>>, vector<16x64xf32>
    tpu.vector_store %arg10[%c0_2, %c0_3], %2 {strides = array<i32>} : memref<16x64xf32, #tpu.memory_space<vmem>>, vector<16x64xf32>,
    %cst_4 = arith.constant 0.000000e+00 : f32
    %4 = vector.broadcast %cst_4 : f32 to vector<16x64xf32>
    %c0_5 = arith.constant 0 : index
    %c0_6 = arith.constant 0 : index
    %5 = vector.load %arg11[%c0_5, %c0_6] : memref<16x64xf32, #tpu.memory_space<vmem>>, vector<16x64xf32>
    tpu.vector_store %arg11[%c0_5, %c0_6], %4 {strides = array<i32>} : memref<16x64xf32, #tpu.memory_space<vmem>>, vector<16x64xf32>,
    %cst_7 = arith.constant 0.000000e+00 : f32
    %6 = vector.broadcast %cst_7 : f32 to vector<16x64xf32>
    %c0_8 = arith.constant 0 : index
    %c0_9 = arith.constant 0 : index
    %7 = vector.load %arg12[%c0_8, %c0_9] : memref<16x64xf32, #tpu.memory_space<vmem>>, vector<16x64xf32>
    tpu.vector_store %arg12[%c0_8, %c0_9], %6 {strides = array<i32>} : memref<16x64xf32, #tpu.memory_space<vmem>>, vector<16x64xf32>,
    %cst_10 = arith.constant 0.000000e+00 : f32
    %8 = vector.broadcast %cst_10 : f32 to vector<10x80xf32>
    %c0_11 = arith.constant 0 : index
    %c0_12 = arith.constant 0 : index
    %9 = vector.load %arg13[%c0_11, %c0_12] : memref<10x80xf32, #tpu.memory_space<vmem>>, vector<10x80xf32>
    tpu.vector_store %arg13[%c0_11, %c0_12], %8 {strides = array<i32>} : memref<10x80xf32, #tpu.memory_space<vmem>>, vector<10x80xf32>,
    %cst_13 = arith.constant 0.000000e+00 : f32
    %10 = vector.broadcast %cst_13 : f32 to vector<10x80xf32>
    %c0_14 = arith.constant 0 : index
    %c0_15 = arith.constant 0 : index
    %11 = vector.load %arg14[%c0_14, %c0_15] : memref<10x80xf32, #tpu.memory_space<vmem>>, vector<10x80xf32>
    tpu.vector_store %arg14[%c0_14, %c0_15], %10 {strides = array<i32>} : memref<10x80xf32, #tpu.memory_space<vmem>>, vector<10x80xf32>,
    %cst_16 = arith.constant 0.000000e+00 : f32
    %12 = vector.broadcast %cst_16 : f32 to vector<10x80xf32>
    %c0_17 = arith.constant 0 : index
    %c0_18 = arith.constant 0 : index
    %13 = vector.load %arg15[%c0_17, %c0_18] : memref<10x80xf32, #tpu.memory_space<vmem>>, vector<10x80xf32>
    tpu.vector_store %arg15[%c0_17, %c0_18], %12 {strides = array<i32>} : memref<10x80xf32, #tpu.memory_space<vmem>>, vector<10x80xf32>,
    %c0_19 = arith.constant 0 : index
    %c0_20 = arith.constant 0 : index
    %c0_21 = arith.constant 0 : index
    %14 = vector.load %arg0[%c0_19, %c0_20, %c0_21] : memref<2x16x64xf32, #tpu.memory_space<vmem>>, vector<1x16x64xf32>
    %15 = vector.shape_cast %14 : vector<1x16x64xf32> to vector<16x64xf32>
    %c1 = arith.constant 1 : index
    %c4 = arith.constant 4 : index
    %16 = vector.load %arg9[%c1, %c4] : memref<36x72xf32, #tpu.memory_space<vmem>>, vector<16x64xf32>
    tpu.vector_store %arg9[%c1, %c4], %15 {strides = array<i32>} : memref<36x72xf32, #tpu.memory_space<vmem>>, vector<16x64xf32>,
    %c1_22 = arith.constant 1 : index
    %c0_23 = arith.constant 0 : index
    %c0_24 = arith.constant 0 : index
    %17 = vector.load %arg0[%c1_22, %c0_23, %c0_24] : memref<2x16x64xf32, #tpu.memory_space<vmem>>, vector<1x16x64xf32>
    %18 = vector.shape_cast %17 : vector<1x16x64xf32> to vector<16x64xf32>
    %c19 = arith.constant 19 : index
    %c4_25 = arith.constant 4 : index
    %19 = vector.load %arg9[%c19, %c4_25] : memref<36x72xf32, #tpu.memory_space<vmem>>, vector<16x64xf32>
    tpu.vector_store %arg9[%c19, %c4_25], %18 {strides = array<i32>} : memref<36x72xf32, #tpu.memory_space<vmem>>, vector<16x64xf32>,
    %c0_26 = arith.constant 0 : index
    %c0_27 = arith.constant 0 : index
    %20 = vector.load %arg9[%c0_26, %c0_27] : memref<36x72xf32, #tpu.memory_space<vmem>>, vector<12x72xf32>
    %c1_28 = arith.constant 1 : index
    %c0_29 = arith.constant 0 : index
    %21 = vector.load %arg9[%c1_28, %c0_29] : memref<36x72xf32, #tpu.memory_space<vmem>>, vector<12x72xf32>
    %c2 = arith.constant 2 : index
    %c0_30 = arith.constant 0 : index
    %22 = vector.load %arg9[%c2, %c0_30] : memref<36x72xf32, #tpu.memory_space<vmem>>, vector<12x72xf32>
    %c3 = arith.constant 3 : index
    %c0_31 = arith.constant 0 : index
    %23 = vector.load %arg9[%c3, %c0_31] : memref<36x72xf32, #tpu.memory_space<vmem>>, vector<12x72xf32>
    %c4_32 = arith.constant 4 : index
    %c0_33 = arith.constant 0 : index
    %24 = vector.load %arg9[%c4_32, %c0_33] : memref<36x72xf32, #tpu.memory_space<vmem>>, vector<12x72xf32>
    %c5 = arith.constant 5 : index
    %c0_34 = arith.constant 0 : index
    %25 = vector.load %arg9[%c5, %c0_34] : memref<36x72xf32, #tpu.memory_space<vmem>>, vector<12x72xf32>
    %c6 = arith.constant 6 : index
    %c0_35 = arith.constant 0 : index
    %26 = vector.load %arg9[%c6, %c0_35] : memref<36x72xf32, #tpu.memory_space<vmem>>, vector<12x72xf32>
    %27 = tpu.concatenate %20, %21, %22, %23, %24, %25, %26 in 1 : vector<12x72xf32>, vector<12x72xf32>, vector<12x72xf32>, vector<12x72xf32>, vector<12x72xf32>, vector<12x72xf32>, vector<12x72xf32> -> vector<12x504xf32>
    %c18 = arith.constant 18 : index
    %c0_36 = arith.constant 0 : index
    %28 = vector.load %arg9[%c18, %c0_36] : memref<36x72xf32, #tpu.memory_space<vmem>>, vector<12x72xf32>
    %c19_37 = arith.constant 19 : index
    %c0_38 = arith.constant 0 : index
    %29 = vector.load %arg9[%c19_37, %c0_38] : memref<36x72xf32, #tpu.memory_space<vmem>>, vector<12x72xf32>
    %c20 = arith.constant 20 : index
    %c0_39 = arith.constant 0 : index
    %30 = vector.load %arg9[%c20, %c0_39] : memref<36x72xf32, #tpu.memory_space<vmem>>, vector<12x72xf32>
    %c21 = arith.constant 21 : index
    %c0_40 = arith.constant 0 : index
    %31 = vector.load %arg9[%c21, %c0_40] : memref<36x72xf32, #tpu.memory_space<vmem>>, vector<12x72xf32>
    %c22 = arith.constant 22 : index
    %c0_41 = arith.constant 0 : index
    %32 = vector.load %arg9[%c22, %c0_41] : memref<36x72xf32, #tpu.memory_space<vmem>>, vector<12x72xf32>
    %c23 = arith.constant 23 : index
    %c0_42 = arith.constant 0 : index
    %33 = vector.load %arg9[%c23, %c0_42] : memref<36x72xf32, #tpu.memory_space<vmem>>, vector<12x72xf32>
    %c24 = arith.constant 24 : index
    %c0_43 = arith.constant 0 : index
    %34 = vector.load %arg9[%c24, %c0_43] : memref<36x72xf32, #tpu.memory_space<vmem>>, vector<12x72xf32>
    %35 = tpu.concatenate %28, %29, %30, %31, %32, %33, %34 in 1 : vector<12x72xf32>, vector<12x72xf32>, vector<12x72xf32>, vector<12x72xf32>, vector<12x72xf32>, vector<12x72xf32>, vector<12x72xf32> -> vector<12x504xf32>
    %36 = tpu.concatenate %27, %35 in 0 : vector<12x504xf32>, vector<12x504xf32> -> vector<24x504xf32>
    %c0_44 = arith.constant 0 : index
    %c0_45 = arith.constant 0 : index
    %37 = vector.load %arg2[%c0_44, %c0_45] : memref<505x96xbf16, #tpu.memory_space<vmem>>, vector<505x96xbf16>
    %38 = arith.truncf %36 : vector<24x504xf32> to vector<24x504xbf16>
    %39 = vector.extract_strided_slice %37 {offsets = [0, 0], sizes = [504, 96], strides = [1, 1]} : vector<505x96xbf16> to vector<504x96xbf16>
    %cst_46 = arith.constant dense<0.000000e+00> : vector<24x96xf32>
    %40 = tpu.matmul %38, %39, %cst_46 {dimension_numbers = #tpu.dot_dimension_numbers<[1], [0], [0], [1], [0, 0, 1, 1], [], []>} : vector<24x504xbf16>, vector<504x96xbf16>, vector<24x96xf32> -> vector<24x96xf32>
    %41 = vector.extract_strided_slice %37 {offsets = [504, 0], sizes = [1, 96], strides = [1, 1]} : vector<505x96xbf16> to vector<1x96xbf16>
    %42 = arith.extf %41 : vector<1x96xbf16> to vector<1x96xf32>
    %43 = vector.broadcast %42 : vector<1x96xf32> to vector<24x96xf32>
    %44 = arith.addf %40, %43 : vector<24x96xf32>
    %cst_47 = arith.constant 0.000000e+00 : f32
    %45 = vector.broadcast %cst_47 : f32 to vector<24x96xf32>
    %46 = arith.maximumf %44, %45 : vector<24x96xf32>
    %47 = vector.extract_strided_slice %46 {offsets = [0, 0], sizes = [1, 96], strides = [1, 1]} : vector<24x96xf32> to vector<1x96xf32>
    %48 = vector.extract_strided_slice %46 {offsets = [1, 0], sizes = [1, 96], strides = [1, 1]} : vector<24x96xf32> to vector<1x96xf32>
    %49 = arith.maximumf %47, %48 : vector<1x96xf32>
    %50 = vector.extract_strided_slice %46 {offsets = [2, 0], sizes = [1, 96], strides = [1, 1]} : vector<24x96xf32> to vector<1x96xf32>
    %51 = vector.extract_strided_slice %46 {offsets = [3, 0], sizes = [1, 96], strides = [1, 1]} : vector<24x96xf32> to vector<1x96xf32>
    %52 = arith.maximumf %50, %51 : vector<1x96xf32>
    %53 = vector.extract_strided_slice %46 {offsets = [4, 0], sizes = [1, 96], strides = [1, 1]} : vector<24x96xf32> to vector<1x96xf32>
    %54 = vector.extract_strided_slice %46 {offsets = [5, 0], sizes = [1, 96], strides = [1, 1]} : vector<24x96xf32> to vector<1x96xf32>
    %55 = arith.maximumf %53, %54 : vector<1x96xf32>
    %56 = vector.extract_strided_slice %46 {offsets = [6, 0], sizes = [1, 96], strides = [1, 1]} : vector<24x96xf32> to vector<1x96xf32>
    %57 = vector.extract_strided_slice %46 {offsets = [7, 0], sizes = [1, 96], strides = [1, 1]} : vector<24x96xf32> to vector<1x96xf32>
    %58 = arith.maximumf %56, %57 : vector<1x96xf32>
    %59 = vector.extract_strided_slice %46 {offsets = [8, 0], sizes = [1, 96], strides = [1, 1]} : vector<24x96xf32> to vector<1x96xf32>
    %60 = vector.extract_strided_slice %46 {offsets = [9, 0], sizes = [1, 96], strides = [1, 1]} : vector<24x96xf32> to vector<1x96xf32>
    %61 = arith.maximumf %59, %60 : vector<1x96xf32>
    %62 = vector.extract_strided_slice %46 {offsets = [10, 0], sizes = [1, 96], strides = [1, 1]} : vector<24x96xf32> to vector<1x96xf32>
    %63 = vector.extract_strided_slice %46 {offsets = [11, 0], sizes = [1, 96], strides = [1, 1]} : vector<24x96xf32> to vector<1x96xf32>
    %64 = arith.maximumf %62, %63 : vector<1x96xf32>
    %65 = vector.extract_strided_slice %46 {offsets = [12, 0], sizes = [1, 96], strides = [1, 1]} : vector<24x96xf32> to vector<1x96xf32>
    %66 = vector.extract_strided_slice %46 {offsets = [13, 0], sizes = [1, 96], strides = [1, 1]} : vector<24x96xf32> to vector<1x96xf32>
    %67 = arith.maximumf %65, %66 : vector<1x96xf32>
    %68 = vector.extract_strided_slice %46 {offsets = [14, 0], sizes = [1, 96], strides = [1, 1]} : vector<24x96xf32> to vector<1x96xf32>
    %69 = vector.extract_strided_slice %46 {offsets = [15, 0], sizes = [1, 96], strides = [1, 1]} : vector<24x96xf32> to vector<1x96xf32>
    %70 = arith.maximumf %68, %69 : vector<1x96xf32>
    %71 = vector.extract_strided_slice %46 {offsets = [16, 0], sizes = [1, 96], strides = [1, 1]} : vector<24x96xf32> to vector<1x96xf32>
    %72 = vector.extract_strided_slice %46 {offsets = [17, 0], sizes = [1, 96], strides = [1, 1]} : vector<24x96xf32> to vector<1x96xf32>
    %73 = arith.maximumf %71, %72 : vector<1x96xf32>
    %74 = vector.extract_strided_slice %46 {offsets = [18, 0], sizes = [1, 96], strides = [1, 1]} : vector<24x96xf32> to vector<1x96xf32>
    %75 = vector.extract_strided_slice %46 {offsets = [19, 0], sizes = [1, 96], strides = [1, 1]} : vector<24x96xf32> to vector<1x96xf32>
    %76 = arith.maximumf %74, %75 : vector<1x96xf32>
    %77 = vector.extract_strided_slice %46 {offsets = [20, 0], sizes = [1, 96], strides = [1, 1]} : vector<24x96xf32> to vector<1x96xf32>
    %78 = vector.extract_strided_slice %46 {offsets = [21, 0], sizes = [1, 96], strides = [1, 1]} : vector<24x96xf32> to vector<1x96xf32>
    %79 = arith.maximumf %77, %78 : vector<1x96xf32>
    %80 = vector.extract_strided_slice %46 {offsets = [22, 0], sizes = [1, 96], strides = [1, 1]} : vector<24x96xf32> to vector<1x96xf32>
    %81 = vector.extract_strided_slice %46 {offsets = [23, 0], sizes = [1, 96], strides = [1, 1]} : vector<24x96xf32> to vector<1x96xf32>
    %82 = arith.maximumf %80, %81 : vector<1x96xf32>
    %83 = tpu.concatenate %49, %52, %55, %58, %61, %64, %67, %70, %73, %76, %79, %82 in 0 : vector<1x96xf32>, vector<1x96xf32>, vector<1x96xf32>, vector<1x96xf32>, vector<1x96xf32>, vector<1x96xf32>, vector<1x96xf32>, vector<1x96xf32>, vector<1x96xf32>, vector<1x96xf32>, vector<1x96xf32>, vector<1x96xf32> -> vector<12x96xf32>
    %84 = vector.extract_strided_slice %83 {offsets = [0, 0], sizes = [12, 8], strides = [1, 1]} : vector<12x96xf32> to vector<12x8xf32>
    %85 = vector.extract_strided_slice %83 {offsets = [0, 16], sizes = [12, 8], strides = [1, 1]} : vector<12x96xf32> to vector<12x8xf32>
    %86 = vector.extract_strided_slice %83 {offsets = [0, 32], sizes = [12, 8], strides = [1, 1]} : vector<12x96xf32> to vector<12x8xf32>
    %87 = vector.extract_strided_slice %83 {offsets = [0, 48], sizes = [12, 8], strides = [1, 1]} : vector<12x96xf32> to vector<12x8xf32>
    %88 = vector.extract_strided_slice %83 {offsets = [0, 64], sizes = [12, 8], strides = [1, 1]} : vector<12x96xf32> to vector<12x8xf32>
    %89 = vector.extract_strided_slice %83 {offsets = [0, 80], sizes = [12, 8], strides = [1, 1]} : vector<12x96xf32> to vector<12x8xf32>
    %90 = tpu.concatenate %84, %85, %86, %87, %88, %89 in 1 : vector<12x8xf32>, vector<12x8xf32>, vector<12x8xf32>, vector<12x8xf32>, vector<12x8xf32>, vector<12x8xf32> -> vector<12x48xf32>
    %91 = vector.extract_strided_slice %83 {offsets = [0, 8], sizes = [12, 8], strides = [1, 1]} : vector<12x96xf32> to vector<12x8xf32>
    %92 = vector.extract_strided_slice %83 {offsets = [0, 24], sizes = [12, 8], strides = [1, 1]} : vector<12x96xf32> to vector<12x8xf32>
    %93 = vector.extract_strided_slice %83 {offsets = [0, 40], sizes = [12, 8], strides = [1, 1]} : vector<12x96xf32> to vector<12x8xf32>
    %94 = vector.extract_strided_slice %83 {offsets = [0, 56], sizes = [12, 8], strides = [1, 1]} : vector<12x96xf32> to vector<12x8xf32>
    %95 = vector.extract_strided_slice %83 {offsets = [0, 72], sizes = [12, 8], strides = [1, 1]} : vector<12x96xf32> to vector<12x8xf32>
    %96 = vector.extract_strided_slice %83 {offsets = [0, 88], sizes = [12, 8], strides = [1, 1]} : vector<12x96xf32> to vector<12x8xf32>
    %97 = tpu.concatenate %91, %92, %93, %94, %95, %96 in 1 : vector<12x8xf32>, vector<12x8xf32>, vector<12x8xf32>, vector<12x8xf32>, vector<12x8xf32>, vector<12x8xf32> -> vector<12x48xf32>
    %98 = arith.maximumf %90, %97 : vector<12x48xf32>
    %99 = vector.extract_strided_slice %98 {offsets = [0, 0], sizes = [6, 48], strides = [1, 1]} : vector<12x48xf32> to vector<6x48xf32>
    %c1_48 = arith.constant 1 : index
    %c8 = arith.constant 8 : index
    %100 = vector.load %arg10[%c1_48, %c8] : memref<16x64xf32, #tpu.memory_space<vmem>>, vector<6x48xf32>
    tpu.vector_store %arg10[%c1_48, %c8], %99 {strides = array<i32>} : memref<16x64xf32, #tpu.memory_space<vmem>>, vector<6x48xf32>,
    %101 = vector.extract_strided_slice %98 {offsets = [6, 0], sizes = [6, 48], strides = [1, 1]} : vector<12x48xf32> to vector<6x48xf32>
    %c9 = arith.constant 9 : index
    %c8_49 = arith.constant 8 : index
    %102 = vector.load %arg10[%c9, %c8_49] : memref<16x64xf32, #tpu.memory_space<vmem>>, vector<6x48xf32>
    tpu.vector_store %arg10[%c9, %c8_49], %101 {strides = array<i32>} : memref<16x64xf32, #tpu.memory_space<vmem>>, vector<6x48xf32>,
    %c0_50 = arith.constant 0 : index
    %c0_51 = arith.constant 0 : index
    %c0_52 = arith.constant 0 : index
    %103 = vector.load %arg3[%c0_50, %c0_51, %c0_52] : memref<4x193x48xbf16, #tpu.memory_space<vmem>>, vector<1x193x48xbf16>
    %104 = vector.shape_cast %103 : vector<1x193x48xbf16> to vector<193x48xbf16>
    %c1_53 = arith.constant 1 : index
    %c0_54 = arith.constant 0 : index
    %c0_55 = arith.constant 0 : index
    %105 = vector.load %arg3[%c1_53, %c0_54, %c0_55] : memref<4x193x48xbf16, #tpu.memory_space<vmem>>, vector<1x193x48xbf16>
    %106 = vector.shape_cast %105 : vector<1x193x48xbf16> to vector<193x48xbf16>
    %c0_56 = arith.constant 0 : index
    %c0_57 = arith.constant 0 : index
    %107 = vector.load %arg10[%c0_56, %c0_57] : memref<16x64xf32, #tpu.memory_space<vmem>>, vector<6x64xf32>
    %c1_58 = arith.constant 1 : index
    %c0_59 = arith.constant 0 : index
    %108 = vector.load %arg10[%c1_58, %c0_59] : memref<16x64xf32, #tpu.memory_space<vmem>>, vector<6x64xf32>
    %c2_60 = arith.constant 2 : index
    %c0_61 = arith.constant 0 : index
    %109 = vector.load %arg10[%c2_60, %c0_61] : memref<16x64xf32, #tpu.memory_space<vmem>>, vector<6x64xf32>
    %110 = tpu.concatenate %107, %108, %109 in 1 : vector<6x64xf32>, vector<6x64xf32>, vector<6x64xf32> -> vector<6x192xf32>
    %c8_62 = arith.constant 8 : index
    %c0_63 = arith.constant 0 : index
    %111 = vector.load %arg10[%c8_62, %c0_63] : memref<16x64xf32, #tpu.memory_space<vmem>>, vector<6x64xf32>
    %c9_64 = arith.constant 9 : index
    %c0_65 = arith.constant 0 : index
    %112 = vector.load %arg10[%c9_64, %c0_65] : memref<16x64xf32, #tpu.memory_space<vmem>>, vector<6x64xf32>
    %c10 = arith.constant 10 : index
    %c0_66 = arith.constant 0 : index
    %113 = vector.load %arg10[%c10, %c0_66] : memref<16x64xf32, #tpu.memory_space<vmem>>, vector<6x64xf32>
    %114 = tpu.concatenate %111, %112, %113 in 1 : vector<6x64xf32>, vector<6x64xf32>, vector<6x64xf32> -> vector<6x192xf32>
    %115 = tpu.concatenate %110, %114 in 0 : vector<6x192xf32>, vector<6x192xf32> -> vector<12x192xf32>
    %116 = arith.truncf %115 : vector<12x192xf32> to vector<12x192xbf16>
    %117 = vector.extract_strided_slice %104 {offsets = [0, 0], sizes = [192, 48], strides = [1, 1]} : vector<193x48xbf16> to vector<192x48xbf16>
    %cst_67 = arith.constant dense<0.000000e+00> : vector<12x48xf32>
    %118 = tpu.matmul %116, %117, %cst_67 {dimension_numbers = #tpu.dot_dimension_numbers<[1], [0], [0], [1], [0, 0, 1, 1], [], []>} : vector<12x192xbf16>, vector<192x48xbf16>, vector<12x48xf32> -> vector<12x48xf32>
    %119 = vector.extract_strided_slice %104 {offsets = [192, 0], sizes = [1, 48], strides = [1, 1]} : vector<193x48xbf16> to vector<1x48xbf16>
    %120 = arith.extf %119 : vector<1x48xbf16> to vector<1x48xf32>
    %121 = vector.broadcast %120 : vector<1x48xf32> to vector<12x48xf32>
    %122 = arith.addf %118, %121 : vector<12x48xf32>
    %cst_68 = arith.constant 0.000000e+00 : f32
    %123 = vector.broadcast %cst_68 : f32 to vector<12x48xf32>
    %124 = arith.maximumf %122, %123 : vector<12x48xf32>
    %125 = vector.extract_strided_slice %124 {offsets = [0, 0], sizes = [6, 48], strides = [1, 1]} : vector<12x48xf32> to vector<6x48xf32>
    %c1_69 = arith.constant 1 : index
    %c8_70 = arith.constant 8 : index
    %126 = vector.load %arg12[%c1_69, %c8_70] : memref<16x64xf32, #tpu.memory_space<vmem>>, vector<6x48xf32>
    tpu.vector_store %arg12[%c1_69, %c8_70], %125 {strides = array<i32>} : memref<16x64xf32, #tpu.memory_space<vmem>>, vector<6x48xf32>,
    %127 = vector.extract_strided_slice %124 {offsets = [6, 0], sizes = [6, 48], strides = [1, 1]} : vector<12x48xf32> to vector<6x48xf32>
    %c9_71 = arith.constant 9 : index
    %c8_72 = arith.constant 8 : index
    %128 = vector.load %arg12[%c9_71, %c8_72] : memref<16x64xf32, #tpu.memory_space<vmem>>, vector<6x48xf32>
    tpu.vector_store %arg12[%c9_71, %c8_72], %127 {strides = array<i32>} : memref<16x64xf32, #tpu.memory_space<vmem>>, vector<6x48xf32>,
    %c0_73 = arith.constant 0 : index
    %c0_74 = arith.constant 0 : index
    %129 = vector.load %arg12[%c0_73, %c0_74] : memref<16x64xf32, #tpu.memory_space<vmem>>, vector<6x64xf32>
    %c1_75 = arith.constant 1 : index
    %c0_76 = arith.constant 0 : index
    %130 = vector.load %arg12[%c1_75, %c0_76] : memref<16x64xf32, #tpu.memory_space<vmem>>, vector<6x64xf32>
    %c2_77 = arith.constant 2 : index
    %c0_78 = arith.constant 0 : index
    %131 = vector.load %arg12[%c2_77, %c0_78] : memref<16x64xf32, #tpu.memory_space<vmem>>, vector<6x64xf32>
    %132 = tpu.concatenate %129, %130, %131 in 1 : vector<6x64xf32>, vector<6x64xf32>, vector<6x64xf32> -> vector<6x192xf32>
    %c8_79 = arith.constant 8 : index
    %c0_80 = arith.constant 0 : index
    %133 = vector.load %arg12[%c8_79, %c0_80] : memref<16x64xf32, #tpu.memory_space<vmem>>, vector<6x64xf32>
    %c9_81 = arith.constant 9 : index
    %c0_82 = arith.constant 0 : index
    %134 = vector.load %arg12[%c9_81, %c0_82] : memref<16x64xf32, #tpu.memory_space<vmem>>, vector<6x64xf32>
    %c10_83 = arith.constant 10 : index
    %c0_84 = arith.constant 0 : index
    %135 = vector.load %arg12[%c10_83, %c0_84] : memref<16x64xf32, #tpu.memory_space<vmem>>, vector<6x64xf32>
    %136 = tpu.concatenate %133, %134, %135 in 1 : vector<6x64xf32>, vector<6x64xf32>, vector<6x64xf32> -> vector<6x192xf32>
    %137 = tpu.concatenate %132, %136 in 0 : vector<6x192xf32>, vector<6x192xf32> -> vector<12x192xf32>
    %138 = arith.truncf %137 : vector<12x192xf32> to vector<12x192xbf16>
    %139 = vector.extract_strided_slice %106 {offsets = [0, 0], sizes = [192, 48], strides = [1, 1]} : vector<193x48xbf16> to vector<192x48xbf16>
    %cst_85 = arith.constant dense<0.000000e+00> : vector<12x48xf32>
    %140 = tpu.matmul %138, %139, %cst_85 {dimension_numbers = #tpu.dot_dimension_numbers<[1], [0], [0], [1], [0, 0, 1, 1], [], []>} : vector<12x192xbf16>, vector<192x48xbf16>, vector<12x48xf32> -> vector<12x48xf32>
    %141 = vector.extract_strided_slice %106 {offsets = [192, 0], sizes = [1, 48], strides = [1, 1]} : vector<193x48xbf16> to vector<1x48xbf16>
    %142 = arith.extf %141 : vector<1x48xbf16> to vector<1x48xf32>
    %143 = vector.broadcast %142 : vector<1x48xf32> to vector<12x48xf32>
    %144 = arith.addf %140, %143 : vector<12x48xf32>
    %c1_86 = arith.constant 1 : index
    %c8_87 = arith.constant 8 : index
    %145 = vector.load %arg10[%c1_86, %c8_87] : memref<16x64xf32, #tpu.memory_space<vmem>>, vector<6x48xf32>
    %c9_88 = arith.constant 9 : index
    %c8_89 = arith.constant 8 : index
    %146 = vector.load %arg10[%c9_88, %c8_89] : memref<16x64xf32, #tpu.memory_space<vmem>>, vector<6x48xf32>
    %147 = tpu.concatenate %145, %146 in 0 : vector<6x48xf32>, vector<6x48xf32> -> vector<12x48xf32>
    %148 = arith.addf %144, %147 : vector<12x48xf32>
    %cst_90 = arith.constant 0.000000e+00 : f32
    %149 = vector.broadcast %cst_90 : f32 to vector<12x48xf32>
    %150 = arith.maximumf %148, %149 : vector<12x48xf32>
    %151 = vector.extract_strided_slice %150 {offsets = [0, 0], sizes = [6, 48], strides = [1, 1]} : vector<12x48xf32> to vector<6x48xf32>
    %c1_91 = arith.constant 1 : index
    %c8_92 = arith.constant 8 : index
    %152 = vector.load %arg11[%c1_91, %c8_92] : memref<16x64xf32, #tpu.memory_space<vmem>>, vector<6x48xf32>
    tpu.vector_store %arg11[%c1_91, %c8_92], %151 {strides = array<i32>} : memref<16x64xf32, #tpu.memory_space<vmem>>, vector<6x48xf32>,
    %153 = vector.extract_strided_slice %150 {offsets = [6, 0], sizes = [6, 48], strides = [1, 1]} : vector<12x48xf32> to vector<6x48xf32>
    %c9_93 = arith.constant 9 : index
    %c8_94 = arith.constant 8 : index
    %154 = vector.load %arg11[%c9_93, %c8_94] : memref<16x64xf32, #tpu.memory_space<vmem>>, vector<6x48xf32>
    tpu.vector_store %arg11[%c9_93, %c8_94], %153 {strides = array<i32>} : memref<16x64xf32, #tpu.memory_space<vmem>>, vector<6x48xf32>,
    %c2_95 = arith.constant 2 : index
    %c0_96 = arith.constant 0 : index
    %c0_97 = arith.constant 0 : index
    %155 = vector.load %arg3[%c2_95, %c0_96, %c0_97] : memref<4x193x48xbf16, #tpu.memory_space<vmem>>, vector<1x193x48xbf16>
    %156 = vector.shape_cast %155 : vector<1x193x48xbf16> to vector<193x48xbf16>
    %c3_98 = arith.constant 3 : index
    %c0_99 = arith.constant 0 : index
    %c0_100 = arith.constant 0 : index
    %157 = vector.load %arg3[%c3_98, %c0_99, %c0_100] : memref<4x193x48xbf16, #tpu.memory_space<vmem>>, vector<1x193x48xbf16>
    %158 = vector.shape_cast %157 : vector<1x193x48xbf16> to vector<193x48xbf16>
    %c0_101 = arith.constant 0 : index
    %c0_102 = arith.constant 0 : index
    %159 = vector.load %arg11[%c0_101, %c0_102] : memref<16x64xf32, #tpu.memory_space<vmem>>, vector<6x64xf32>
    %c1_103 = arith.constant 1 : index
    %c0_104 = arith.constant 0 : index
    %160 = vector.load %arg11[%c1_103, %c0_104] : memref<16x64xf32, #tpu.memory_space<vmem>>, vector<6x64xf32>
    %c2_105 = arith.constant 2 : index
    %c0_106 = arith.constant 0 : index
    %161 = vector.load %arg11[%c2_105, %c0_106] : memref<16x64xf32, #tpu.memory_space<vmem>>, vector<6x64xf32>
    %162 = tpu.concatenate %159, %160, %161 in 1 : vector<6x64xf32>, vector<6x64xf32>, vector<6x64xf32> -> vector<6x192xf32>
    %c8_107 = arith.constant 8 : index
    %c0_108 = arith.constant 0 : index
    %163 = vector.load %arg11[%c8_107, %c0_108] : memref<16x64xf32, #tpu.memory_space<vmem>>, vector<6x64xf32>
    %c9_109 = arith.constant 9 : index
    %c0_110 = arith.constant 0 : index
    %164 = vector.load %arg11[%c9_109, %c0_110] : memref<16x64xf32, #tpu.memory_space<vmem>>, vector<6x64xf32>
    %c10_111 = arith.constant 10 : index
    %c0_112 = arith.constant 0 : index
    %165 = vector.load %arg11[%c10_111, %c0_112] : memref<16x64xf32, #tpu.memory_space<vmem>>, vector<6x64xf32>
    %166 = tpu.concatenate %163, %164, %165 in 1 : vector<6x64xf32>, vector<6x64xf32>, vector<6x64xf32> -> vector<6x192xf32>
    %167 = tpu.concatenate %162, %166 in 0 : vector<6x192xf32>, vector<6x192xf32> -> vector<12x192xf32>
    %168 = arith.truncf %167 : vector<12x192xf32> to vector<12x192xbf16>
    %169 = vector.extract_strided_slice %156 {offsets = [0, 0], sizes = [192, 48], strides = [1, 1]} : vector<193x48xbf16> to vector<192x48xbf16>
    %cst_113 = arith.constant dense<0.000000e+00> : vector<12x48xf32>
    %170 = tpu.matmul %168, %169, %cst_113 {dimension_numbers = #tpu.dot_dimension_numbers<[1], [0], [0], [1], [0, 0, 1, 1], [], []>} : vector<12x192xbf16>, vector<192x48xbf16>, vector<12x48xf32> -> vector<12x48xf32>
    %171 = vector.extract_strided_slice %156 {offsets = [192, 0], sizes = [1, 48], strides = [1, 1]} : vector<193x48xbf16> to vector<1x48xbf16>
    %172 = arith.extf %171 : vector<1x48xbf16> to vector<1x48xf32>
    %173 = vector.broadcast %172 : vector<1x48xf32> to vector<12x48xf32>
    %174 = arith.addf %170, %173 : vector<12x48xf32>
    %cst_114 = arith.constant 0.000000e+00 : f32
    %175 = vector.broadcast %cst_114 : f32 to vector<12x48xf32>
    %176 = arith.maximumf %174, %175 : vector<12x48xf32>
    %177 = vector.extract_strided_slice %176 {offsets = [0, 0], sizes = [6, 48], strides = [1, 1]} : vector<12x48xf32> to vector<6x48xf32>
    %c1_115 = arith.constant 1 : index
    %c8_116 = arith.constant 8 : index
    %178 = vector.load %arg12[%c1_115, %c8_116] : memref<16x64xf32, #tpu.memory_space<vmem>>, vector<6x48xf32>
    tpu.vector_store %arg12[%c1_115, %c8_116], %177 {strides = array<i32>} : memref<16x64xf32, #tpu.memory_space<vmem>>, vector<6x48xf32>,
    %179 = vector.extract_strided_slice %176 {offsets = [6, 0], sizes = [6, 48], strides = [1, 1]} : vector<12x48xf32> to vector<6x48xf32>
    %c9_117 = arith.constant 9 : index
    %c8_118 = arith.constant 8 : index
    %180 = vector.load %arg12[%c9_117, %c8_118] : memref<16x64xf32, #tpu.memory_space<vmem>>, vector<6x48xf32>
    tpu.vector_store %arg12[%c9_117, %c8_118], %179 {strides = array<i32>} : memref<16x64xf32, #tpu.memory_space<vmem>>, vector<6x48xf32>,
    %c0_119 = arith.constant 0 : index
    %c0_120 = arith.constant 0 : index
    %181 = vector.load %arg12[%c0_119, %c0_120] : memref<16x64xf32, #tpu.memory_space<vmem>>, vector<6x64xf32>
    %c1_121 = arith.constant 1 : index
    %c0_122 = arith.constant 0 : index
    %182 = vector.load %arg12[%c1_121, %c0_122] : memref<16x64xf32, #tpu.memory_space<vmem>>, vector<6x64xf32>
    %c2_123 = arith.constant 2 : index
    %c0_124 = arith.constant 0 : index
    %183 = vector.load %arg12[%c2_123, %c0_124] : memref<16x64xf32, #tpu.memory_space<vmem>>, vector<6x64xf32>
    %184 = tpu.concatenate %181, %182, %183 in 1 : vector<6x64xf32>, vector<6x64xf32>, vector<6x64xf32> -> vector<6x192xf32>
    %c8_125 = arith.constant 8 : index
    %c0_126 = arith.constant 0 : index
    %185 = vector.load %arg12[%c8_125, %c0_126] : memref<16x64xf32, #tpu.memory_space<vmem>>, vector<6x64xf32>
    %c9_127 = arith.constant 9 : index
    %c0_128 = arith.constant 0 : index
    %186 = vector.load %arg12[%c9_127, %c0_128] : memref<16x64xf32, #tpu.memory_space<vmem>>, vector<6x64xf32>
    %c10_129 = arith.constant 10 : index
    %c0_130 = arith.constant 0 : index
    %187 = vector.load %arg12[%c10_129, %c0_130] : memref<16x64xf32, #tpu.memory_space<vmem>>, vector<6x64xf32>
    %188 = tpu.concatenate %185, %186, %187 in 1 : vector<6x64xf32>, vector<6x64xf32>, vector<6x64xf32> -> vector<6x192xf32>
    %189 = tpu.concatenate %184, %188 in 0 : vector<6x192xf32>, vector<6x192xf32> -> vector<12x192xf32>
    %190 = arith.truncf %189 : vector<12x192xf32> to vector<12x192xbf16>
    %191 = vector.extract_strided_slice %158 {offsets = [0, 0], sizes = [192, 48], strides = [1, 1]} : vector<193x48xbf16> to vector<192x48xbf16>
    %cst_131 = arith.constant dense<0.000000e+00> : vector<12x48xf32>
    %192 = tpu.matmul %190, %191, %cst_131 {dimension_numbers = #tpu.dot_dimension_numbers<[1], [0], [0], [1], [0, 0, 1, 1], [], []>} : vector<12x192xbf16>, vector<192x48xbf16>, vector<12x48xf32> -> vector<12x48xf32>
    %193 = vector.extract_strided_slice %158 {offsets = [192, 0], sizes = [1, 48], strides = [1, 1]} : vector<193x48xbf16> to vector<1x48xbf16>
    %194 = arith.extf %193 : vector<1x48xbf16> to vector<1x48xf32>
    %195 = vector.broadcast %194 : vector<1x48xf32> to vector<12x48xf32>
    %196 = arith.addf %192, %195 : vector<12x48xf32>
    %c1_132 = arith.constant 1 : index
    %c8_133 = arith.constant 8 : index
    %197 = vector.load %arg11[%c1_132, %c8_133] : memref<16x64xf32, #tpu.memory_space<vmem>>, vector<6x48xf32>
    %c9_134 = arith.constant 9 : index
    %c8_135 = arith.constant 8 : index
    %198 = vector.load %arg11[%c9_134, %c8_135] : memref<16x64xf32, #tpu.memory_space<vmem>>, vector<6x48xf32>
    %199 = tpu.concatenate %197, %198 in 0 : vector<6x48xf32>, vector<6x48xf32> -> vector<12x48xf32>
    %200 = arith.addf %196, %199 : vector<12x48xf32>
    %cst_136 = arith.constant 0.000000e+00 : f32
    %201 = vector.broadcast %cst_136 : f32 to vector<12x48xf32>
    %202 = arith.maximumf %200, %201 : vector<12x48xf32>
    %203 = vector.extract_strided_slice %202 {offsets = [0, 0], sizes = [6, 48], strides = [1, 1]} : vector<12x48xf32> to vector<6x48xf32>
    %c1_137 = arith.constant 1 : index
    %c8_138 = arith.constant 8 : index
    %204 = vector.load %arg10[%c1_137, %c8_138] : memref<16x64xf32, #tpu.memory_space<vmem>>, vector<6x48xf32>
    tpu.vector_store %arg10[%c1_137, %c8_138], %203 {strides = array<i32>} : memref<16x64xf32, #tpu.memory_space<vmem>>, vector<6x48xf32>,
    %205 = vector.extract_strided_slice %202 {offsets = [6, 0], sizes = [6, 48], strides = [1, 1]} : vector<12x48xf32> to vector<6x48xf32>
    %c9_139 = arith.constant 9 : index
    %c8_140 = arith.constant 8 : index
    %206 = vector.load %arg10[%c9_139, %c8_140] : memref<16x64xf32, #tpu.memory_space<vmem>>, vector<6x48xf32>
    tpu.vector_store %arg10[%c9_139, %c8_140], %205 {strides = array<i32>} : memref<16x64xf32, #tpu.memory_space<vmem>>, vector<6x48xf32>,
    %c0_141 = arith.constant 0 : index
    %c0_142 = arith.constant 0 : index
    %207 = vector.load %arg10[%c0_141, %c0_142] : memref<16x64xf32, #tpu.memory_space<vmem>>, vector<1x64xf32>
    %c1_143 = arith.constant 1 : index
    %c0_144 = arith.constant 0 : index
    %208 = vector.load %arg10[%c1_143, %c0_144] : memref<16x64xf32, #tpu.memory_space<vmem>>, vector<1x64xf32>
    %c2_145 = arith.constant 2 : index
    %c0_146 = arith.constant 0 : index
    %209 = vector.load %arg10[%c2_145, %c0_146] : memref<16x64xf32, #tpu.memory_space<vmem>>, vector<1x64xf32>
    %210 = tpu.concatenate %207, %208, %209 in 1 : vector<1x64xf32>, vector<1x64xf32>, vector<1x64xf32> -> vector<1x192xf32>
    %c1_147 = arith.constant 1 : index
    %c0_148 = arith.constant 0 : index
    %211 = vector.load %arg10[%c1_147, %c0_148] : memref<16x64xf32, #tpu.memory_space<vmem>>, vector<1x64xf32>
    %c2_149 = arith.constant 2 : index
    %c0_150 = arith.constant 0 : index
    %212 = vector.load %arg10[%c2_149, %c0_150] : memref<16x64xf32, #tpu.memory_space<vmem>>, vector<1x64xf32>
    %c3_151 = arith.constant 3 : index
    %c0_152 = arith.constant 0 : index
    %213 = vector.load %arg10[%c3_151, %c0_152] : memref<16x64xf32, #tpu.memory_space<vmem>>, vector<1x64xf32>
    %c4_153 = arith.constant 4 : index
    %c0_154 = arith.constant 0 : index
    %214 = vector.load %arg10[%c4_153, %c0_154] : memref<16x64xf32, #tpu.memory_space<vmem>>, vector<1x64xf32>
    %215 = tpu.concatenate %212, %213, %214 in 1 : vector<1x64xf32>, vector<1x64xf32>, vector<1x64xf32> -> vector<1x192xf32>
    %c3_155 = arith.constant 3 : index
    %c0_156 = arith.constant 0 : index
    %216 = vector.load %arg10[%c3_155, %c0_156] : memref<16x64xf32, #tpu.memory_space<vmem>>, vector<1x64xf32>
    %c4_157 = arith.constant 4 : index
    %c0_158 = arith.constant 0 : index
    %217 = vector.load %arg10[%c4_157, %c0_158] : memref<16x64xf32, #tpu.memory_space<vmem>>, vector<1x64xf32>
    %c5_159 = arith.constant 5 : index
    %c0_160 = arith.constant 0 : index
    %218 = vector.load %arg10[%c5_159, %c0_160] : memref<16x64xf32, #tpu.memory_space<vmem>>, vector<1x64xf32>
    %c6_161 = arith.constant 6 : index
    %c0_162 = arith.constant 0 : index
    %219 = vector.load %arg10[%c6_161, %c0_162] : memref<16x64xf32, #tpu.memory_space<vmem>>, vector<1x64xf32>
    %220 = tpu.concatenate %217, %218, %219 in 1 : vector<1x64xf32>, vector<1x64xf32>, vector<1x64xf32> -> vector<1x192xf32>
    %c5_163 = arith.constant 5 : index
    %c0_164 = arith.constant 0 : index
    %221 = vector.load %arg10[%c5_163, %c0_164] : memref<16x64xf32, #tpu.memory_space<vmem>>, vector<1x64xf32>
    %c8_165 = arith.constant 8 : index
    %c0_166 = arith.constant 0 : index
    %222 = vector.load %arg10[%c8_165, %c0_166] : memref<16x64xf32, #tpu.memory_space<vmem>>, vector<1x64xf32>
    %c9_167 = arith.constant 9 : index
    %c0_168 = arith.constant 0 : index
    %223 = vector.load %arg10[%c9_167, %c0_168] : memref<16x64xf32, #tpu.memory_space<vmem>>, vector<1x64xf32>
    %c10_169 = arith.constant 10 : index
    %c0_170 = arith.constant 0 : index
    %224 = vector.load %arg10[%c10_169, %c0_170] : memref<16x64xf32, #tpu.memory_space<vmem>>, vector<1x64xf32>
    %225 = tpu.concatenate %222, %223, %224 in 1 : vector<1x64xf32>, vector<1x64xf32>, vector<1x64xf32> -> vector<1x192xf32>
    %c9_171 = arith.constant 9 : index
    %c0_172 = arith.constant 0 : index
    %226 = vector.load %arg10[%c9_171, %c0_172] : memref<16x64xf32, #tpu.memory_space<vmem>>, vector<1x64xf32>
    %c10_173 = arith.constant 10 : index
    %c0_174 = arith.constant 0 : index
    %227 = vector.load %arg10[%c10_173, %c0_174] : memref<16x64xf32, #tpu.memory_space<vmem>>, vector<1x64xf32>
    %c11 = arith.constant 11 : index
    %c0_175 = arith.constant 0 : index
    %228 = vector.load %arg10[%c11, %c0_175] : memref<16x64xf32, #tpu.memory_space<vmem>>, vector<1x64xf32>
    %c12 = arith.constant 12 : index
    %c0_176 = arith.constant 0 : index
    %229 = vector.load %arg10[%c12, %c0_176] : memref<16x64xf32, #tpu.memory_space<vmem>>, vector<1x64xf32>
    %230 = tpu.concatenate %227, %228, %229 in 1 : vector<1x64xf32>, vector<1x64xf32>, vector<1x64xf32> -> vector<1x192xf32>
    %c11_177 = arith.constant 11 : index
    %c0_178 = arith.constant 0 : index
    %231 = vector.load %arg10[%c11_177, %c0_178] : memref<16x64xf32, #tpu.memory_space<vmem>>, vector<1x64xf32>
    %c12_179 = arith.constant 12 : index
    %c0_180 = arith.constant 0 : index
    %232 = vector.load %arg10[%c12_179, %c0_180] : memref<16x64xf32, #tpu.memory_space<vmem>>, vector<1x64xf32>
    %c13 = arith.constant 13 : index
    %c0_181 = arith.constant 0 : index
    %233 = vector.load %arg10[%c13, %c0_181] : memref<16x64xf32, #tpu.memory_space<vmem>>, vector<1x64xf32>
    %c14 = arith.constant 14 : index
    %c0_182 = arith.constant 0 : index
    %234 = vector.load %arg10[%c14, %c0_182] : memref<16x64xf32, #tpu.memory_space<vmem>>, vector<1x64xf32>
    %235 = tpu.concatenate %232, %233, %234 in 1 : vector<1x64xf32>, vector<1x64xf32>, vector<1x64xf32> -> vector<1x192xf32>
    %c13_183 = arith.constant 13 : index
    %c0_184 = arith.constant 0 : index
    %236 = vector.load %arg10[%c13_183, %c0_184] : memref<16x64xf32, #tpu.memory_space<vmem>>, vector<1x64xf32>
    %237 = tpu.concatenate %210, %215, %220, %225, %230, %235 in 0 : vector<1x192xf32>, vector<1x192xf32>, vector<1x192xf32>, vector<1x192xf32>, vector<1x192xf32>, vector<1x192xf32> -> vector<6x192xf32>
    %c0_185 = arith.constant 0 : index
    %c0_186 = arith.constant 0 : index
    %238 = vector.load %arg4[%c0_185, %c0_186] : memref<193x48xbf16, #tpu.memory_space<vmem>>, vector<193x48xbf16>
    %239 = arith.truncf %237 : vector<6x192xf32> to vector<6x192xbf16>
    %240 = vector.extract_strided_slice %238 {offsets = [0, 0], sizes = [192, 48], strides = [1, 1]} : vector<193x48xbf16> to vector<192x48xbf16>
    %cst_187 = arith.constant dense<0.000000e+00> : vector<6x48xf32>
    %241 = tpu.matmul %239, %240, %cst_187 {dimension_numbers = #tpu.dot_dimension_numbers<[1], [0], [0], [1], [0, 0, 1, 1], [], []>} : vector<6x192xbf16>, vector<192x48xbf16>, vector<6x48xf32> -> vector<6x48xf32>
    %242 = vector.extract_strided_slice %238 {offsets = [192, 0], sizes = [1, 48], strides = [1, 1]} : vector<193x48xbf16> to vector<1x48xbf16>
    %243 = arith.extf %242 : vector<1x48xbf16> to vector<1x48xf32>
    %244 = vector.broadcast %243 : vector<1x48xf32> to vector<6x48xf32>
    %245 = arith.addf %241, %244 : vector<6x48xf32>
    %cst_188 = arith.constant 0.000000e+00 : f32
    %246 = vector.broadcast %cst_188 : f32 to vector<6x48xf32>
    %247 = arith.maximumf %245, %246 : vector<6x48xf32>
    %248 = vector.extract_strided_slice %247 {offsets = [0, 0], sizes = [3, 48], strides = [1, 1]} : vector<6x48xf32> to vector<3x48xf32>
    %c1_189 = arith.constant 1 : index
    %c16 = arith.constant 16 : index
    %249 = vector.load %arg15[%c1_189, %c16] : memref<10x80xf32, #tpu.memory_space<vmem>>, vector<3x48xf32>
    tpu.vector_store %arg15[%c1_189, %c16], %248 {strides = array<i32>} : memref<10x80xf32, #tpu.memory_space<vmem>>, vector<3x48xf32>,
    %250 = vector.extract_strided_slice %247 {offsets = [3, 0], sizes = [3, 48], strides = [1, 1]} : vector<6x48xf32> to vector<3x48xf32>
    %c6_190 = arith.constant 6 : index
    %c16_191 = arith.constant 16 : index
    %251 = vector.load %arg15[%c6_190, %c16_191] : memref<10x80xf32, #tpu.memory_space<vmem>>, vector<3x48xf32>
    tpu.vector_store %arg15[%c6_190, %c16_191], %250 {strides = array<i32>} : memref<10x80xf32, #tpu.memory_space<vmem>>, vector<3x48xf32>,
    %c0_192 = arith.constant 0 : index
    %c0_193 = arith.constant 0 : index
    %252 = vector.load %arg15[%c0_192, %c0_193] : memref<10x80xf32, #tpu.memory_space<vmem>>, vector<3x80xf32>
    %c1_194 = arith.constant 1 : index
    %c0_195 = arith.constant 0 : index
    %253 = vector.load %arg15[%c1_194, %c0_195] : memref<10x80xf32, #tpu.memory_space<vmem>>, vector<3x80xf32>
    %c2_196 = arith.constant 2 : index
    %c0_197 = arith.constant 0 : index
    %254 = vector.load %arg15[%c2_196, %c0_197] : memref<10x80xf32, #tpu.memory_space<vmem>>, vector<3x80xf32>
    %255 = tpu.concatenate %252, %253, %254 in 1 : vector<3x80xf32>, vector<3x80xf32>, vector<3x80xf32> -> vector<3x240xf32>
    %c5_198 = arith.constant 5 : index
    %c0_199 = arith.constant 0 : index
    %256 = vector.load %arg15[%c5_198, %c0_199] : memref<10x80xf32, #tpu.memory_space<vmem>>, vector<3x80xf32>
    %c6_200 = arith.constant 6 : index
    %c0_201 = arith.constant 0 : index
    %257 = vector.load %arg15[%c6_200, %c0_201] : memref<10x80xf32, #tpu.memory_space<vmem>>, vector<3x80xf32>
    %c7 = arith.constant 7 : index
    %c0_202 = arith.constant 0 : index
    %258 = vector.load %arg15[%c7, %c0_202] : memref<10x80xf32, #tpu.memory_space<vmem>>, vector<3x80xf32>
    %259 = tpu.concatenate %256, %257, %258 in 1 : vector<3x80xf32>, vector<3x80xf32>, vector<3x80xf32> -> vector<3x240xf32>
    %260 = tpu.concatenate %255, %259 in 0 : vector<3x240xf32>, vector<3x240xf32> -> vector<6x240xf32>
    %c0_203 = arith.constant 0 : index
    %c0_204 = arith.constant 0 : index
    %c0_205 = arith.constant 0 : index
    %261 = vector.load %arg6[%c0_203, %c0_204, %c0_205] : memref<5x241x48xbf16, #tpu.memory_space<vmem>>, vector<1x241x48xbf16>
    %262 = vector.shape_cast %261 : vector<1x241x48xbf16> to vector<241x48xbf16>
    %263 = arith.truncf %260 : vector<6x240xf32> to vector<6x240xbf16>
    %264 = vector.extract_strided_slice %262 {offsets = [0, 0], sizes = [240, 48], strides = [1, 1]} : vector<241x48xbf16> to vector<240x48xbf16>
    %cst_206 = arith.constant dense<0.000000e+00> : vector<6x48xf32>
    %265 = tpu.matmul %263, %264, %cst_206 {dimension_numbers = #tpu.dot_dimension_numbers<[1], [0], [0], [1], [0, 0, 1, 1], [], []>} : vector<6x240xbf16>, vector<240x48xbf16>, vector<6x48xf32> -> vector<6x48xf32>
    %266 = vector.extract_strided_slice %262 {offsets = [240, 0], sizes = [1, 48], strides = [1, 1]} : vector<241x48xbf16> to vector<1x48xbf16>
    %267 = arith.extf %266 : vector<1x48xbf16> to vector<1x48xf32>
    %268 = vector.broadcast %267 : vector<1x48xf32> to vector<6x48xf32>
    %269 = arith.addf %265, %268 : vector<6x48xf32>
    %270 = tpu.concatenate %211, %216, %221, %226, %231, %236 in 0 : vector<1x64xf32>, vector<1x64xf32>, vector<1x64xf32>, vector<1x64xf32>, vector<1x64xf32>, vector<1x64xf32> -> vector<6x64xf32>
    %c0_207 = arith.constant 0 : index
    %c0_208 = arith.constant 0 : index
    %271 = vector.load %arg5[%c0_207, %c0_208] : memref<65x48xbf16, #tpu.memory_space<vmem>>, vector<65x48xbf16>
    %272 = arith.truncf %270 : vector<6x64xf32> to vector<6x64xbf16>
    %273 = vector.extract_strided_slice %271 {offsets = [0, 0], sizes = [64, 48], strides = [1, 1]} : vector<65x48xbf16> to vector<64x48xbf16>
    %cst_209 = arith.constant dense<0.000000e+00> : vector<6x48xf32>
    %274 = tpu.matmul %272, %273, %cst_209 {dimension_numbers = #tpu.dot_dimension_numbers<[1], [0], [0], [1], [0, 0, 1, 1], [], []>} : vector<6x64xbf16>, vector<64x48xbf16>, vector<6x48xf32> -> vector<6x48xf32>
    %275 = vector.extract_strided_slice %271 {offsets = [64, 0], sizes = [1, 48], strides = [1, 1]} : vector<65x48xbf16> to vector<1x48xbf16>
    %276 = arith.extf %275 : vector<1x48xbf16> to vector<1x48xf32>
    %277 = vector.broadcast %276 : vector<1x48xf32> to vector<6x48xf32>
    %278 = arith.addf %274, %277 : vector<6x48xf32>
    %279 = arith.addf %269, %278 : vector<6x48xf32>
    %cst_210 = arith.constant 0.000000e+00 : f32
    %280 = vector.broadcast %cst_210 : f32 to vector<6x48xf32>
    %281 = arith.maximumf %279, %280 : vector<6x48xf32>
    %282 = vector.extract_strided_slice %281 {offsets = [0, 0], sizes = [3, 48], strides = [1, 1]} : vector<6x48xf32> to vector<3x48xf32>
    %c1_211 = arith.constant 1 : index
    %c16_212 = arith.constant 16 : index
    %283 = vector.load %arg13[%c1_211, %c16_212] : memref<10x80xf32, #tpu.memory_space<vmem>>, vector<3x48xf32>
    tpu.vector_store %arg13[%c1_211, %c16_212], %282 {strides = array<i32>} : memref<10x80xf32, #tpu.memory_space<vmem>>, vector<3x48xf32>,
    %284 = vector.extract_strided_slice %281 {offsets = [3, 0], sizes = [3, 48], strides = [1, 1]} : vector<6x48xf32> to vector<3x48xf32>
    %c6_213 = arith.constant 6 : index
    %c16_214 = arith.constant 16 : index
    %285 = vector.load %arg13[%c6_213, %c16_214] : memref<10x80xf32, #tpu.memory_space<vmem>>, vector<3x48xf32>
    tpu.vector_store %arg13[%c6_213, %c16_214], %284 {strides = array<i32>} : memref<10x80xf32, #tpu.memory_space<vmem>>, vector<3x48xf32>,
    %c1_215 = arith.constant 1 : index
    %c0_216 = arith.constant 0 : index
    %c0_217 = arith.constant 0 : index
    %286 = vector.load %arg6[%c1_215, %c0_216, %c0_217] : memref<5x241x48xbf16, #tpu.memory_space<vmem>>, vector<1x241x48xbf16>
    %287 = vector.shape_cast %286 : vector<1x241x48xbf16> to vector<241x48xbf16>
    %c2_218 = arith.constant 2 : index
    %c0_219 = arith.constant 0 : index
    %c0_220 = arith.constant 0 : index
    %288 = vector.load %arg6[%c2_218, %c0_219, %c0_220] : memref<5x241x48xbf16, #tpu.memory_space<vmem>>, vector<1x241x48xbf16>
    %289 = vector.shape_cast %288 : vector<1x241x48xbf16> to vector<241x48xbf16>
    %c0_221 = arith.constant 0 : index
    %c0_222 = arith.constant 0 : index
    %290 = vector.load %arg13[%c0_221, %c0_222] : memref<10x80xf32, #tpu.memory_space<vmem>>, vector<3x80xf32>
    %c1_223 = arith.constant 1 : index
    %c0_224 = arith.constant 0 : index
    %291 = vector.load %arg13[%c1_223, %c0_224] : memref<10x80xf32, #tpu.memory_space<vmem>>, vector<3x80xf32>
    %c2_225 = arith.constant 2 : index
    %c0_226 = arith.constant 0 : index
    %292 = vector.load %arg13[%c2_225, %c0_226] : memref<10x80xf32, #tpu.memory_space<vmem>>, vector<3x80xf32>
    %293 = tpu.concatenate %290, %291, %292 in 1 : vector<3x80xf32>, vector<3x80xf32>, vector<3x80xf32> -> vector<3x240xf32>
    %c5_227 = arith.constant 5 : index
    %c0_228 = arith.constant 0 : index
    %294 = vector.load %arg13[%c5_227, %c0_228] : memref<10x80xf32, #tpu.memory_space<vmem>>, vector<3x80xf32>
    %c6_229 = arith.constant 6 : index
    %c0_230 = arith.constant 0 : index
    %295 = vector.load %arg13[%c6_229, %c0_230] : memref<10x80xf32, #tpu.memory_space<vmem>>, vector<3x80xf32>
    %c7_231 = arith.constant 7 : index
    %c0_232 = arith.constant 0 : index
    %296 = vector.load %arg13[%c7_231, %c0_232] : memref<10x80xf32, #tpu.memory_space<vmem>>, vector<3x80xf32>
    %297 = tpu.concatenate %294, %295, %296 in 1 : vector<3x80xf32>, vector<3x80xf32>, vector<3x80xf32> -> vector<3x240xf32>
    %298 = tpu.concatenate %293, %297 in 0 : vector<3x240xf32>, vector<3x240xf32> -> vector<6x240xf32>
    %299 = arith.truncf %298 : vector<6x240xf32> to vector<6x240xbf16>
    %300 = vector.extract_strided_slice %287 {offsets = [0, 0], sizes = [240, 48], strides = [1, 1]} : vector<241x48xbf16> to vector<240x48xbf16>
    %cst_233 = arith.constant dense<0.000000e+00> : vector<6x48xf32>
    %301 = tpu.matmul %299, %300, %cst_233 {dimension_numbers = #tpu.dot_dimension_numbers<[1], [0], [0], [1], [0, 0, 1, 1], [], []>} : vector<6x240xbf16>, vector<240x48xbf16>, vector<6x48xf32> -> vector<6x48xf32>
    %302 = vector.extract_strided_slice %287 {offsets = [240, 0], sizes = [1, 48], strides = [1, 1]} : vector<241x48xbf16> to vector<1x48xbf16>
    %303 = arith.extf %302 : vector<1x48xbf16> to vector<1x48xf32>
    %304 = vector.broadcast %303 : vector<1x48xf32> to vector<6x48xf32>
    %305 = arith.addf %301, %304 : vector<6x48xf32>
    %cst_234 = arith.constant 0.000000e+00 : f32
    %306 = vector.broadcast %cst_234 : f32 to vector<6x48xf32>
    %307 = arith.maximumf %305, %306 : vector<6x48xf32>
    %308 = vector.extract_strided_slice %307 {offsets = [0, 0], sizes = [3, 48], strides = [1, 1]} : vector<6x48xf32> to vector<3x48xf32>
    %c1_235 = arith.constant 1 : index
    %c16_236 = arith.constant 16 : index
    %309 = vector.load %arg15[%c1_235, %c16_236] : memref<10x80xf32, #tpu.memory_space<vmem>>, vector<3x48xf32>
    tpu.vector_store %arg15[%c1_235, %c16_236], %308 {strides = array<i32>} : memref<10x80xf32, #tpu.memory_space<vmem>>, vector<3x48xf32>,
    %310 = vector.extract_strided_slice %307 {offsets = [3, 0], sizes = [3, 48], strides = [1, 1]} : vector<6x48xf32> to vector<3x48xf32>
    %c6_237 = arith.constant 6 : index
    %c16_238 = arith.constant 16 : index
    %311 = vector.load %arg15[%c6_237, %c16_238] : memref<10x80xf32, #tpu.memory_space<vmem>>, vector<3x48xf32>
    tpu.vector_store %arg15[%c6_237, %c16_238], %310 {strides = array<i32>} : memref<10x80xf32, #tpu.memory_space<vmem>>, vector<3x48xf32>,
    %c0_239 = arith.constant 0 : index
    %c0_240 = arith.constant 0 : index
    %312 = vector.load %arg15[%c0_239, %c0_240] : memref<10x80xf32, #tpu.memory_space<vmem>>, vector<3x80xf32>
    %c1_241 = arith.constant 1 : index
    %c0_242 = arith.constant 0 : index
    %313 = vector.load %arg15[%c1_241, %c0_242] : memref<10x80xf32, #tpu.memory_space<vmem>>, vector<3x80xf32>
    %c2_243 = arith.constant 2 : index
    %c0_244 = arith.constant 0 : index
    %314 = vector.load %arg15[%c2_243, %c0_244] : memref<10x80xf32, #tpu.memory_space<vmem>>, vector<3x80xf32>
    %315 = tpu.concatenate %312, %313, %314 in 1 : vector<3x80xf32>, vector<3x80xf32>, vector<3x80xf32> -> vector<3x240xf32>
    %c5_245 = arith.constant 5 : index
    %c0_246 = arith.constant 0 : index
    %316 = vector.load %arg15[%c5_245, %c0_246] : memref<10x80xf32, #tpu.memory_space<vmem>>, vector<3x80xf32>
    %c6_247 = arith.constant 6 : index
    %c0_248 = arith.constant 0 : index
    %317 = vector.load %arg15[%c6_247, %c0_248] : memref<10x80xf32, #tpu.memory_space<vmem>>, vector<3x80xf32>
    %c7_249 = arith.constant 7 : index
    %c0_250 = arith.constant 0 : index
    %318 = vector.load %arg15[%c7_249, %c0_250] : memref<10x80xf32, #tpu.memory_space<vmem>>, vector<3x80xf32>
    %319 = tpu.concatenate %316, %317, %318 in 1 : vector<3x80xf32>, vector<3x80xf32>, vector<3x80xf32> -> vector<3x240xf32>
    %320 = tpu.concatenate %315, %319 in 0 : vector<3x240xf32>, vector<3x240xf32> -> vector<6x240xf32>
    %321 = arith.truncf %320 : vector<6x240xf32> to vector<6x240xbf16>
    %322 = vector.extract_strided_slice %289 {offsets = [0, 0], sizes = [240, 48], strides = [1, 1]} : vector<241x48xbf16> to vector<240x48xbf16>
    %cst_251 = arith.constant dense<0.000000e+00> : vector<6x48xf32>
    %323 = tpu.matmul %321, %322, %cst_251 {dimension_numbers = #tpu.dot_dimension_numbers<[1], [0], [0], [1], [0, 0, 1, 1], [], []>} : vector<6x240xbf16>, vector<240x48xbf16>, vector<6x48xf32> -> vector<6x48xf32>
    %324 = vector.extract_strided_slice %289 {offsets = [240, 0], sizes = [1, 48], strides = [1, 1]} : vector<241x48xbf16> to vector<1x48xbf16>
    %325 = arith.extf %324 : vector<1x48xbf16> to vector<1x48xf32>
    %326 = vector.broadcast %325 : vector<1x48xf32> to vector<6x48xf32>
    %327 = arith.addf %323, %326 : vector<6x48xf32>
    %c1_252 = arith.constant 1 : index
    %c16_253 = arith.constant 16 : index
    %328 = vector.load %arg13[%c1_252, %c16_253] : memref<10x80xf32, #tpu.memory_space<vmem>>, vector<3x48xf32>
    %c6_254 = arith.constant 6 : index
    %c16_255 = arith.constant 16 : index
    %329 = vector.load %arg13[%c6_254, %c16_255] : memref<10x80xf32, #tpu.memory_space<vmem>>, vector<3x48xf32>
    %330 = tpu.concatenate %328, %329 in 0 : vector<3x48xf32>, vector<3x48xf32> -> vector<6x48xf32>
    %331 = arith.addf %327, %330 : vector<6x48xf32>
    %cst_256 = arith.constant 0.000000e+00 : f32
    %332 = vector.broadcast %cst_256 : f32 to vector<6x48xf32>
    %333 = arith.maximumf %331, %332 : vector<6x48xf32>
    %334 = vector.extract_strided_slice %333 {offsets = [0, 0], sizes = [3, 48], strides = [1, 1]} : vector<6x48xf32> to vector<3x48xf32>
    %c1_257 = arith.constant 1 : index
    %c16_258 = arith.constant 16 : index
    %335 = vector.load %arg14[%c1_257, %c16_258] : memref<10x80xf32, #tpu.memory_space<vmem>>, vector<3x48xf32>
    tpu.vector_store %arg14[%c1_257, %c16_258], %334 {strides = array<i32>} : memref<10x80xf32, #tpu.memory_space<vmem>>, vector<3x48xf32>,
    %336 = vector.extract_strided_slice %333 {offsets = [3, 0], sizes = [3, 48], strides = [1, 1]} : vector<6x48xf32> to vector<3x48xf32>
    %c6_259 = arith.constant 6 : index
    %c16_260 = arith.constant 16 : index
    %337 = vector.load %arg14[%c6_259, %c16_260] : memref<10x80xf32, #tpu.memory_space<vmem>>, vector<3x48xf32>
    tpu.vector_store %arg14[%c6_259, %c16_260], %336 {strides = array<i32>} : memref<10x80xf32, #tpu.memory_space<vmem>>, vector<3x48xf32>,
    %c3_261 = arith.constant 3 : index
    %c0_262 = arith.constant 0 : index
    %c0_263 = arith.constant 0 : index
    %338 = vector.load %arg6[%c3_261, %c0_262, %c0_263] : memref<5x241x48xbf16, #tpu.memory_space<vmem>>, vector<1x241x48xbf16>
    %339 = vector.shape_cast %338 : vector<1x241x48xbf16> to vector<241x48xbf16>
    %c4_264 = arith.constant 4 : index
    %c0_265 = arith.constant 0 : index
    %c0_266 = arith.constant 0 : index
    %340 = vector.load %arg6[%c4_264, %c0_265, %c0_266] : memref<5x241x48xbf16, #tpu.memory_space<vmem>>, vector<1x241x48xbf16>
    %341 = vector.shape_cast %340 : vector<1x241x48xbf16> to vector<241x48xbf16>
    %c0_267 = arith.constant 0 : index
    %c0_268 = arith.constant 0 : index
    %342 = vector.load %arg14[%c0_267, %c0_268] : memref<10x80xf32, #tpu.memory_space<vmem>>, vector<3x80xf32>
    %c1_269 = arith.constant 1 : index
    %c0_270 = arith.constant 0 : index
    %343 = vector.load %arg14[%c1_269, %c0_270] : memref<10x80xf32, #tpu.memory_space<vmem>>, vector<3x80xf32>
    %c2_271 = arith.constant 2 : index
    %c0_272 = arith.constant 0 : index
    %344 = vector.load %arg14[%c2_271, %c0_272] : memref<10x80xf32, #tpu.memory_space<vmem>>, vector<3x80xf32>
    %345 = tpu.concatenate %342, %343, %344 in 1 : vector<3x80xf32>, vector<3x80xf32>, vector<3x80xf32> -> vector<3x240xf32>
    %c5_273 = arith.constant 5 : index
    %c0_274 = arith.constant 0 : index
    %346 = vector.load %arg14[%c5_273, %c0_274] : memref<10x80xf32, #tpu.memory_space<vmem>>, vector<3x80xf32>
    %c6_275 = arith.constant 6 : index
    %c0_276 = arith.constant 0 : index
    %347 = vector.load %arg14[%c6_275, %c0_276] : memref<10x80xf32, #tpu.memory_space<vmem>>, vector<3x80xf32>
    %c7_277 = arith.constant 7 : index
    %c0_278 = arith.constant 0 : index
    %348 = vector.load %arg14[%c7_277, %c0_278] : memref<10x80xf32, #tpu.memory_space<vmem>>, vector<3x80xf32>
    %349 = tpu.concatenate %346, %347, %348 in 1 : vector<3x80xf32>, vector<3x80xf32>, vector<3x80xf32> -> vector<3x240xf32>
    %350 = tpu.concatenate %345, %349 in 0 : vector<3x240xf32>, vector<3x240xf32> -> vector<6x240xf32>
    %351 = arith.truncf %350 : vector<6x240xf32> to vector<6x240xbf16>
    %352 = vector.extract_strided_slice %339 {offsets = [0, 0], sizes = [240, 48], strides = [1, 1]} : vector<241x48xbf16> to vector<240x48xbf16>
    %cst_279 = arith.constant dense<0.000000e+00> : vector<6x48xf32>
    %353 = tpu.matmul %351, %352, %cst_279 {dimension_numbers = #tpu.dot_dimension_numbers<[1], [0], [0], [1], [0, 0, 1, 1], [], []>} : vector<6x240xbf16>, vector<240x48xbf16>, vector<6x48xf32> -> vector<6x48xf32>
    %354 = vector.extract_strided_slice %339 {offsets = [240, 0], sizes = [1, 48], strides = [1, 1]} : vector<241x48xbf16> to vector<1x48xbf16>
    %355 = arith.extf %354 : vector<1x48xbf16> to vector<1x48xf32>
    %356 = vector.broadcast %355 : vector<1x48xf32> to vector<6x48xf32>
    %357 = arith.addf %353, %356 : vector<6x48xf32>
    %cst_280 = arith.constant 0.000000e+00 : f32
    %358 = vector.broadcast %cst_280 : f32 to vector<6x48xf32>
    %359 = arith.maximumf %357, %358 : vector<6x48xf32>
    %360 = vector.extract_strided_slice %359 {offsets = [0, 0], sizes = [3, 48], strides = [1, 1]} : vector<6x48xf32> to vector<3x48xf32>
    %c1_281 = arith.constant 1 : index
    %c16_282 = arith.constant 16 : index
    %361 = vector.load %arg15[%c1_281, %c16_282] : memref<10x80xf32, #tpu.memory_space<vmem>>, vector<3x48xf32>
    tpu.vector_store %arg15[%c1_281, %c16_282], %360 {strides = array<i32>} : memref<10x80xf32, #tpu.memory_space<vmem>>, vector<3x48xf32>,
    %362 = vector.extract_strided_slice %359 {offsets = [3, 0], sizes = [3, 48], strides = [1, 1]} : vector<6x48xf32> to vector<3x48xf32>
    %c6_283 = arith.constant 6 : index
    %c16_284 = arith.constant 16 : index
    %363 = vector.load %arg15[%c6_283, %c16_284] : memref<10x80xf32, #tpu.memory_space<vmem>>, vector<3x48xf32>
    tpu.vector_store %arg15[%c6_283, %c16_284], %362 {strides = array<i32>} : memref<10x80xf32, #tpu.memory_space<vmem>>, vector<3x48xf32>,
    %c0_285 = arith.constant 0 : index
    %c0_286 = arith.constant 0 : index
    %364 = vector.load %arg15[%c0_285, %c0_286] : memref<10x80xf32, #tpu.memory_space<vmem>>, vector<3x80xf32>
    %c1_287 = arith.constant 1 : index
    %c0_288 = arith.constant 0 : index
    %365 = vector.load %arg15[%c1_287, %c0_288] : memref<10x80xf32, #tpu.memory_space<vmem>>, vector<3x80xf32>
    %c2_289 = arith.constant 2 : index
    %c0_290 = arith.constant 0 : index
    %366 = vector.load %arg15[%c2_289, %c0_290] : memref<10x80xf32, #tpu.memory_space<vmem>>, vector<3x80xf32>
    %367 = tpu.concatenate %364, %365, %366 in 1 : vector<3x80xf32>, vector<3x80xf32>, vector<3x80xf32> -> vector<3x240xf32>
    %c5_291 = arith.constant 5 : index
    %c0_292 = arith.constant 0 : index
    %368 = vector.load %arg15[%c5_291, %c0_292] : memref<10x80xf32, #tpu.memory_space<vmem>>, vector<3x80xf32>
    %c6_293 = arith.constant 6 : index
    %c0_294 = arith.constant 0 : index
    %369 = vector.load %arg15[%c6_293, %c0_294] : memref<10x80xf32, #tpu.memory_space<vmem>>, vector<3x80xf32>
    %c7_295 = arith.constant 7 : index
    %c0_296 = arith.constant 0 : index
    %370 = vector.load %arg15[%c7_295, %c0_296] : memref<10x80xf32, #tpu.memory_space<vmem>>, vector<3x80xf32>
    %371 = tpu.concatenate %368, %369, %370 in 1 : vector<3x80xf32>, vector<3x80xf32>, vector<3x80xf32> -> vector<3x240xf32>
    %372 = tpu.concatenate %367, %371 in 0 : vector<3x240xf32>, vector<3x240xf32> -> vector<6x240xf32>
    %373 = arith.truncf %372 : vector<6x240xf32> to vector<6x240xbf16>
    %374 = vector.extract_strided_slice %341 {offsets = [0, 0], sizes = [240, 48], strides = [1, 1]} : vector<241x48xbf16> to vector<240x48xbf16>
    %cst_297 = arith.constant dense<0.000000e+00> : vector<6x48xf32>
    %375 = tpu.matmul %373, %374, %cst_297 {dimension_numbers = #tpu.dot_dimension_numbers<[1], [0], [0], [1], [0, 0, 1, 1], [], []>} : vector<6x240xbf16>, vector<240x48xbf16>, vector<6x48xf32> -> vector<6x48xf32>
    %376 = vector.extract_strided_slice %341 {offsets = [240, 0], sizes = [1, 48], strides = [1, 1]} : vector<241x48xbf16> to vector<1x48xbf16>
    %377 = arith.extf %376 : vector<1x48xbf16> to vector<1x48xf32>
    %378 = vector.broadcast %377 : vector<1x48xf32> to vector<6x48xf32>
    %379 = arith.addf %375, %378 : vector<6x48xf32>
    %c1_298 = arith.constant 1 : index
    %c16_299 = arith.constant 16 : index
    %380 = vector.load %arg14[%c1_298, %c16_299] : memref<10x80xf32, #tpu.memory_space<vmem>>, vector<3x48xf32>
    %c6_300 = arith.constant 6 : index
    %c16_301 = arith.constant 16 : index
    %381 = vector.load %arg14[%c6_300, %c16_301] : memref<10x80xf32, #tpu.memory_space<vmem>>, vector<3x48xf32>
    %382 = tpu.concatenate %380, %381 in 0 : vector<3x48xf32>, vector<3x48xf32> -> vector<6x48xf32>
    %383 = arith.addf %379, %382 : vector<6x48xf32>
    %cst_302 = arith.constant 0.000000e+00 : f32
    %384 = vector.broadcast %cst_302 : f32 to vector<6x48xf32>
    %385 = arith.maximumf %383, %384 : vector<6x48xf32>
    %386 = vector.extract_strided_slice %385 {offsets = [0, 0], sizes = [3, 48], strides = [1, 1]} : vector<6x48xf32> to vector<3x48xf32>
    %c1_303 = arith.constant 1 : index
    %c16_304 = arith.constant 16 : index
    %387 = vector.load %arg13[%c1_303, %c16_304] : memref<10x80xf32, #tpu.memory_space<vmem>>, vector<3x48xf32>
    tpu.vector_store %arg13[%c1_303, %c16_304], %386 {strides = array<i32>} : memref<10x80xf32, #tpu.memory_space<vmem>>, vector<3x48xf32>,
    %388 = vector.extract_strided_slice %385 {offsets = [3, 0], sizes = [3, 48], strides = [1, 1]} : vector<6x48xf32> to vector<3x48xf32>
    %c6_305 = arith.constant 6 : index
    %c16_306 = arith.constant 16 : index
    %389 = vector.load %arg13[%c6_305, %c16_306] : memref<10x80xf32, #tpu.memory_space<vmem>>, vector<3x48xf32>
    tpu.vector_store %arg13[%c6_305, %c16_306], %388 {strides = array<i32>} : memref<10x80xf32, #tpu.memory_space<vmem>>, vector<3x48xf32>,
    %c1_307 = arith.constant 1 : index
    %c16_308 = arith.constant 16 : index
    %390 = vector.load %arg13[%c1_307, %c16_308] : memref<10x80xf32, #tpu.memory_space<vmem>>, vector<3x48xf32>
    %cst_309 = arith.constant dense<0xFF800000> : vector<48xf32>
    %391 = vector.multi_reduction <maximumf>, %390, %cst_309 [0] : vector<3x48xf32> to vector<48xf32>
    %392 = vector.shape_cast %391 : vector<48xf32> to vector<1x48xf32>
    %393 = vector.extract_strided_slice %392 {offsets = [0, 0], sizes = [1, 16], strides = [1, 1]} : vector<1x48xf32> to vector<1x16xf32>
    %394 = vector.extract_strided_slice %392 {offsets = [0, 16], sizes = [1, 16], strides = [1, 1]} : vector<1x48xf32> to vector<1x16xf32>
    %395 = arith.maximumf %393, %394 : vector<1x16xf32>
    %396 = vector.extract_strided_slice %392 {offsets = [0, 32], sizes = [1, 16], strides = [1, 1]} : vector<1x48xf32> to vector<1x16xf32>
    %397 = arith.maximumf %395, %396 : vector<1x16xf32>
    %c6_310 = arith.constant 6 : index
    %c16_311 = arith.constant 16 : index
    %398 = vector.load %arg13[%c6_310, %c16_311] : memref<10x80xf32, #tpu.memory_space<vmem>>, vector<3x48xf32>
    %cst_312 = arith.constant dense<0xFF800000> : vector<48xf32>
    %399 = vector.multi_reduction <maximumf>, %398, %cst_312 [0] : vector<3x48xf32> to vector<48xf32>
    %400 = vector.shape_cast %399 : vector<48xf32> to vector<1x48xf32>
    %401 = vector.extract_strided_slice %400 {offsets = [0, 0], sizes = [1, 16], strides = [1, 1]} : vector<1x48xf32> to vector<1x16xf32>
    %402 = vector.extract_strided_slice %400 {offsets = [0, 16], sizes = [1, 16], strides = [1, 1]} : vector<1x48xf32> to vector<1x16xf32>
    %403 = arith.maximumf %401, %402 : vector<1x16xf32>
    %404 = vector.extract_strided_slice %400 {offsets = [0, 32], sizes = [1, 16], strides = [1, 1]} : vector<1x48xf32> to vector<1x16xf32>
    %405 = arith.maximumf %403, %404 : vector<1x16xf32>
    %406 = tpu.concatenate %397, %405 in 0 : vector<1x16xf32>, vector<1x16xf32> -> vector<2x16xf32>
    %c0_313 = arith.constant 0 : index
    %c0_314 = arith.constant 0 : index
    %407 = vector.load %arg7[%c0_313, %c0_314] : memref<1x19xf32, #tpu.memory_space<vmem>>, vector<1x19xf32>
    %408 = vector.extract_strided_slice %407 {offsets = [0, 0], sizes = [1, 16], strides = [1, 1]} : vector<1x19xf32> to vector<1x16xf32>
    %409 = vector.broadcast %408 : vector<1x16xf32> to vector<2x16xf32>
    %410 = arith.mulf %406, %409 : vector<2x16xf32>
    %cst_315 = arith.constant dense<0.000000e+00> : vector<2xf32>
    %411 = vector.multi_reduction <add>, %410, %cst_315 [1] : vector<2x16xf32> to vector<2xf32>
    %412 = vector.shape_cast %411 : vector<2xf32> to vector<2x1xf32>
    %c0_316 = arith.constant 0 : index
    %c0_317 = arith.constant 0 : index
    %413 = vector.load %arg1[%c0_316, %c0_317] : memref<2x2xf32, #tpu.memory_space<vmem>>, vector<2x2xf32>
    %414 = vector.extract_strided_slice %407 {offsets = [0, 16], sizes = [1, 2], strides = [1, 1]} : vector<1x19xf32> to vector<1x2xf32>
    %415 = vector.broadcast %414 : vector<1x2xf32> to vector<2x2xf32>
    %416 = arith.mulf %413, %415 : vector<2x2xf32>
    %cst_318 = arith.constant dense<0.000000e+00> : vector<2xf32>
    %417 = vector.multi_reduction <add>, %416, %cst_318 [1] : vector<2x2xf32> to vector<2xf32>
    %418 = vector.shape_cast %417 : vector<2xf32> to vector<2x1xf32>
    %419 = arith.addf %412, %418 : vector<2x1xf32>
    %420 = vector.extract_strided_slice %407 {offsets = [0, 18], sizes = [1, 1], strides = [1, 1]} : vector<1x19xf32> to vector<1x1xf32>
    %421 = vector.broadcast %420 : vector<1x1xf32> to vector<2x1xf32>
    %422 = arith.addf %419, %421 : vector<2x1xf32>
    %c0_319 = arith.constant 0 : index
    %c0_320 = arith.constant 0 : index
    %423 = vector.load %arg8[%c0_319, %c0_320] : memref<2x1xf32, #tpu.memory_space<vmem>>, vector<2x1xf32>
    tpu.vector_store %arg8[%c0_319, %c0_320], %422 {strides = array<i32>} : memref<2x1xf32, #tpu.memory_space<vmem>>, vector<2x1xf32>,
    return
  }
}

</mosaic_0001>

<bundles_post_ra>
// kernel: forward.1
= control target key start
LH: loop header
LB: loop body
LE: loop exit
PB: predicated region body
PF: predicated region fallthrough
CT: control target
= control target key end

     0   :  { %13 = vsyncpa [#allocation10], 0  ;;  %s4608_s0 = inlined_call_operand.vmem [shape: f32[2,16,64], index: 0, kind: input, shape index: {}]   ;;  %s4609_s1 = inlined_call_operand.vmem [shape: f32[2,2], index: 1, kind: input, shape index: {}]   ;;  %s4610_s2 = inlined_call_operand.hbm [shape: bf16[505,96], index: 2, kind: input, shape index: {}]   ;;  %s4611_s3 = inlined_call_operand.vmem [shape: bf16[4,193,48], index: 3, kind: input, shape index: {}]   ;;  %s4612_s4 = inlined_call_operand.hbm [shape: bf16[193,48], index: 4, kind: input, shape index: {}]   ;;  %s4613_s5 = inlined_call_operand.hbm [shape: bf16[65,48], index: 5, kind: input, shape index: {}]   ;;  %s4614_s6 = inlined_call_operand.hbm [shape: bf16[5,241,48], index: 6, kind: input, shape index: {}]   ;;  %s4615_s7 = inlined_call_operand.vmem [shape: f32[1,19], index: 7, kind: input, shape index: {}]   ;;  %s4616_s8 = inlined_call_operand.vmem [shape: f32[2,1], index: 8, kind: output, shape index: {}]  }
   0x1   :  { %14 = vsyncpa [#allocation12], 0 }
   0x2   :  { %15 = vsyncpa [#allocation15], 0  ;;  %s39_s29 = sshll.u32 %s4612_s4, 4  ;;  %s4065_s30 = smov [#allocation11]   ;;  %s40_s29 = int_to_ptr.hbm [resolvable:$true] %s39_s29 }
   0x3   :  { %s41_s9 = sshll.u32 %s4065_s30, 4  ;;  %s24_s12 = sshll.u32 %s4610_s2, 4  ;;  %s42_s9 = int_to_ptr.vmem [resolvable:$true] %s41_s9  ;;  %s25_s12 = int_to_ptr.hbm [resolvable:$true] %s24_s12 }
   0x4   :  { %s4066_s13 = smov 64   ;;  %s4067_s14 = smov 4  }
   0x5   :  { %47 = dma.hbm_to_vmem [thread:$0]  %s40_s29, 1600, %s42_s9, [#allocation12], %s4066_s13, %s4066_s13, %s4067_s14  }
   0x6   :  { %s4068_s15 = smov [#allocation9]   ;;  %s52_s4 = sshll.u32 %s4613_s5, 4  ;;  %s53_s4 = int_to_ptr.hbm [resolvable:$true] %s52_s4 }
   0x7   :  { %s26_s16 = sshll.u32 %s4068_s15, 4  ;;  %s65_s20 = sshll.u32 %s4614_s6, 4  ;;  %s27_s16 = int_to_ptr.vmem [resolvable:$true] %s26_s16  ;;  %s66_s20 = int_to_ptr.hbm [resolvable:$true] %s65_s20 }
   0x8   :  { %32 = dma.hbm_to_vmem [thread:$0]  %s25_s12, 4096, %s27_s16, [#allocation10], %s4066_s13, %s4066_s13, %s4067_s14  }
   0x9   :  { %s4069_s21 = smov [#allocation13]   ;;  %s4070_s23 = smov [#allocation14]  }
   0xa   :  { %s54_s22 = sshll.u32 %s4069_s21, 4  ;;  %s67_s5 = sshll.u32 %s4070_s23, 4  ;;  %s55_s22 = int_to_ptr.vmem [resolvable:$true] %s54_s22  ;;  %s68_s5 = int_to_ptr.vmem [resolvable:$true] %s67_s5 }
   0xb   :  { %60 = dma.hbm_to_vmem [thread:$0]  %s53_s4, 576, %s55_s22, [#allocation12], %s4066_s13, %s4066_s13, %s4067_s14  }
   0xc   :  { %73 = dma.hbm_to_vmem [thread:$0]  %s66_s20, 9920, %s68_s5, [#allocation15], %s4066_s13, %s4066_s13, %s4067_s14  }
   0xd   :  { %4059 = dma.done.wait [#allocation10], 4096  }
   0xe   :  { %4060 = vsyncadd [#allocation10], 4294963200 }
   0xf   :  { %4061 = dma.done.wait [#allocation12], 2176  }
  0x10   :  { %4062 = vsyncadd [#allocation12], 4294965120 }
  0x11   :  { %4063 = dma.done.wait [#allocation15], 9920  }
  0x12   :  { %4064 = vsyncadd [#allocation15], 4294957376  ;;  %vm93_vm0 = vcmask 588800   ;;  %v4071_v0 = vmov 0.0   ;;  %v2883_v1 = vld [vmem:[%s4608_s0 + $0x10] sm:$0xff]  ;;  %v116_v2 = vld [vmem:[%s4608_s0 + $0x8] sm:$0xff] }
  0x13   :  { %96 = vst.msk [vmem:[#allocation2 + $0x10] sm:$0xff] %vm93_vm0, %v4071_v0  ;;  %133 = vrot.lane.b32.xlu0 %v2883_v1, %s4067_s14  ;;  %121 = vrot.lane.b32.xlu1 %v116_v2, %s4067_s14  ;;  %v2884_v3 = vld [vmem:[%s4608_s0 + $0x18] sm:$0xff]  ;;  %v115_v4 = vld [vmem:[%s4608_s0] sm:$0xff]  ;;  %vm98_vm1 = vcmask 584704   ;;  %vm125_vm2 = vcmask 556064   ;;  %s4072_s0 = smov 104  }
  0x14   :  { %97 = vst.msk [vmem:[#allocation2 + $0x18] sm:$0xff] %vm93_vm0, %v4071_v0  ;;  %s4073_s9 = smov 88   ;;  %s4074_s10 = smov 32   ;;  %v3676_v40 = vld [vmem:[#allocation9 + $0xb8] sm:$0xff]  ;;  %v3675_v41 = vld [vmem:[#allocation9 + $0xb0] sm:$0xff]  ;;  %v3674_v44 = vld [vmem:[#allocation9 + $0xa8] sm:$0xff] }
  0x15   :  { %94 = vst.msk [vmem:[#allocation2] sm:$0xff] %vm93_vm0, %v4071_v0  ;;  %s4075_s11 = smov 72   ;;  %s4076_s12 = smov 48   ;;  %636 = vmatpush.bf16.msra.mxu2 %v3676_v40  ;;  %v389_v42 = vld [vmem:[#allocation9 + $0xf8] sm:$0xf]  ;;  %vm302_vm3 = vcmask 1043456  }
  0x16   :  { %95 = vst.msk [vmem:[#allocation2 + $0x8] sm:$0xff] %vm93_vm0, %v4071_v0  ;;  %v526_v43 = vunpack.c.l.b16 %v389_v42  ;;  %v3660_v45 = vld [vmem:[#allocation9 + $0x38] sm:$0xff]  ;;  %v3673_v47 = vld [vmem:[#allocation9 + $0xa0] sm:$0xff]  ;;  %v3683_v49 = vld [vmem:[#allocation9 + $0xf0] sm:$0xff]  ;;  %vm211_vm4 = vcmask 261120   ;;  %vm214_vm5 = vcmask 850944  }
  0x17   :  { %99 = vst.msk [vmem:[#allocation2 + $0x20] sm:$0xf] %vm98_vm1, %v4071_v0  ;;  %600 = vmatpush.bf16.msra.mxu0 %v3660_v45  ;;  %v3659_v50 = vld [vmem:[#allocation9 + $0x30] sm:$0xff]  ;;  %v3672_v51 = vld [vmem:[#allocation9 + $0x98] sm:$0xff]  ;;  %v3658_v53 = vld [vmem:[#allocation9 + $0x28] sm:$0xff]  ;;  %vm217_vm6 = vcmask 392192  }
  0x18   :  { %v558_v46 = vpack.c.b16 %v526_v43, %v526_v43  ;;  %v3668_v52 = vld [vmem:[#allocation9 + $0x78] sm:$0xff]  ;;  %v3682_v54 = vld [vmem:[#allocation9 + $0xe8] sm:$0xff]  ;;  %v3671_v55 = vld [vmem:[#allocation9 + $0x90] sm:$0xff]  ;;  %vm590_vm7 = vcmask 982016   ;;  %vm205_vm8 = vcmask 130048   ;;  %vm208_vm9 = vcmask 719872  }
  0x19   :  { %637 = vmatpush.bf16.msra.mxu2 %v3675_v41  ;;  %618 = vmatpush.bf16.msra.mxu1 %v3668_v52  ;;  %v3681_v56 = vld [vmem:[#allocation9 + $0xe0] sm:$0xff]  ;;  %v3667_v58 = vld [vmem:[#allocation9 + $0x70] sm:$0xff]  ;;  %v3670_v59 = vld [vmem:[#allocation9 + $0x88] sm:$0xff]  ;;  %vm710_vm10 = vcmask 1040384   ;;  %vm712_vm11 = vcmask 1041408   ;;  %vm714_vm12 = vcmask 1042432  }
  0x1a   :  { %v598_v48 = vsel %vm302_vm3, %v558_v46, 0  ;;  %v3657_v57 = vld [vmem:[#allocation9 + $0x20] sm:$0xff]  ;;  %v3680_v60 = vld [vmem:[#allocation9 + $0xd8] sm:$0xff]  ;;  %v3666_v62 = vld [vmem:[#allocation9 + $0x68] sm:$0xff]  ;;  %vm717_vm13 = vcmask 1044480   ;;  %vm719_vm14 = vcmask 1045504  }
  0x1b   :  { %135 = vrot.lane.b32.xlu0 %v2884_v3, %s4067_s14  ;;  %119 = vrot.lane.b32.xlu1 %v115_v4, %s4067_s14  ;;  %s4077_s14 = smov 16   ;;  %v3656_v61 = vld [vmem:[#allocation9 + $0x18] sm:$0xff]  ;;  %v3669_v63 = vld [vmem:[#allocation9 + $0x80] sm:$0xff]  ;;  %v3679_v1 = vld [vmem:[#allocation9 + $0xd0] sm:$0xff]  ;;  %vm721_vm15 = vcmask 1046528   ;;  %s4078_s15 = smov 112  }
  0x1c   :  { %654 = vmatpush.bf16.msra.mxu3 %v598_v48  ;;  %601 = vmatpush.bf16.msra.mxu0 %v3659_v50  ;;  %v3655_v3 = vld [vmem:[#allocation9 + $0x10] sm:$0xff]  ;;  %v3665_v4 = vld [vmem:[#allocation9 + $0x60] sm:$0xff]  ;;  %s4079_s16 = smov 120   ;;  %s4080_s17 = smov 96   ;;  %vm758_vm1 = vcmask 64512  }
  0x1d   :  { %638 = vmatpush.bf16.msra.mxu2 %v3674_v44  ;;  %619 = vmatpush.bf16.msra.mxu1 %v3667_v58  ;;  %s4081_s18 = smov 80   ;;  %s4082_s19 = smov 8  }
  0x20   :  { %655 = vmatpush.bf16.msra.mxu3 %v3683_v49  ;;  %602 = vmatpush.bf16.msra.mxu0 %v3658_v53 }
  0x21   :  { %639 = vmatpush.bf16.msra.mxu2 %v3673_v47  ;;  %620 = vmatpush.bf16.msra.mxu1 %v3666_v62 }
  0x24   :  { %656 = vmatpush.bf16.msra.mxu3 %v3682_v54  ;;  %603 = vmatpush.bf16.msra.mxu0 %v3657_v57 }
  0x25   :  { %640 = vmatpush.bf16.msra.mxu2 %v3672_v51  ;;  %621 = vmatpush.bf16.msra.mxu1 %v3665_v4 }
  0x28   :  { %657 = vmatpush.bf16.msra.mxu3 %v3681_v56  ;;  %604 = vmatpush.bf16.msra.mxu0 %v3656_v61 }
  0x29   :  { %641 = vmatpush.bf16.msra.mxu2 %v3671_v55 }
  0x2c   :  { %658 = vmatpush.bf16.msra.mxu3 %v3680_v60  ;;  %605 = vmatpush.bf16.msra.mxu0 %v3655_v3 }
  0x2d   :  { %642 = vmatpush.bf16.msra.mxu2 %v3670_v59 }
  0x30   :  { %659 = vmatpush.bf16.msra.mxu3 %v3679_v1 }
  0x31   :  { %643 = vmatpush.bf16.msra.mxu2 %v3669_v63 }
  0x85   :  { %v134_v5 = vpop.permute.xlu0 %133  ;;  %v122_v6 = vpop.permute.xlu1 %121 }
  0x86   :  { %139 = vst.msk [vmem:[#allocation2 + $0x13] sm:$0xff] %vm125_vm2, %v134_v5  ;;  %v3678_v5 = vld [vmem:[#allocation9 + $0xc8] sm:$0xff] }
  0x87   :  { %127 = vst.msk [vmem:[#allocation2 + $0x9] sm:$0xff] %vm125_vm2, %v122_v6  ;;  %v3654_v6 = vld [vmem:[#allocation9 + $0x8] sm:$0xff]  ;;  %660 = vmatpush.bf16.msra.mxu3 %v3678_v5 }
  0x88   :  { %606 = vmatpush.bf16.msra.mxu0 %v3654_v6 }
  0x8d   :  { %v136_v7 = vpop.permute.xlu0 %135  ;;  %v120_v8 = vpop.permute.xlu1 %119  ;;  %v222_v20 = vld [vmem:[#allocation2 + $0x13] sm:$0xff] }
  0x8e   :  { %140 = vst.msk [vmem:[#allocation2 + $0x1b] sm:$0xff] %vm125_vm2, %v136_v7  ;;  %v152_v9 = vld [vmem:[#allocation2 + $0xd] sm:$0xf]  ;;  %v144_v19 = vld [vmem:[#allocation2 + $0x9] sm:$0xf]  ;;  %v3664_v7 = vld [vmem:[#allocation9 + $0x58] sm:$0xff] }
  0x8f   :  { %126 = vst.msk [vmem:[#allocation2 + $0x1] sm:$0xff] %vm125_vm2, %v120_v8  ;;  %v148_v10 = vld [vmem:[#allocation2 + $0xb] sm:$0xf]  ;;  %v3862_v24 = vpack.i.bf16 %v144_v19, %v222_v20  ;;  %622 = vmatpush.bf16.msra.mxu1 %v3664_v7  ;;  %vm763_vm2 = vcmask 195584  }
  0x90   :  { %v150_v22 = vld [vmem:[#allocation2 + $0xc] sm:$0xf] }
  0x91   :  { %v154_v25 = vld [vmem:[#allocation2 + $0xe] sm:$0xf]  ;;  %v146_v28 = vld [vmem:[#allocation2 + $0xa] sm:$0xf] }
  0x92   :  { %v3677_v8 = vld [vmem:[#allocation9 + $0xc0] sm:$0xff] }
  0x93   :  { %661 = vmatpush.bf16.msra.mxu3 %v3677_v8 }
  0x95   :  { %v230_v11 = vld [vmem:[#allocation2 + $0x17] sm:$0xff]  ;;  %v233_v37 = vld [vmem:[#allocation2 + $0x20] sm:$0xf] }
  0x96   :  { %v226_v12 = vld [vmem:[#allocation2 + $0x15] sm:$0xff]  ;;  %v227_v13 = vld [vmem:[#allocation2 + $0x1d] sm:$0xf]  ;;  %v3852_v14 = vpack.i.bf16 %v152_v9, %v230_v11  ;;  %v147_v16 = vld [vmem:[#allocation2 + $0x3] sm:$0xff] }
  0x97   :  { %v3842_v15 = vpack.i.bf16 %v148_v10, %v226_v12  ;;  %v3857_v17 = vpack.i.bf16 %v227_v13, %v147_v16  ;;  %v228_v18 = vld [vmem:[#allocation2 + $0x16] sm:$0xff]  ;;  %v149_v30 = vld [vmem:[#allocation2 + $0x4] sm:$0xff]  ;;  %v229_v34 = vld [vmem:[#allocation2 + $0x1e] sm:$0xf] }
  0x98   :  { %3853 = vrot.lane.b32.xlu0 %v3852_v14, %s4072_s0  ;;  %v232_v21 = vld [vmem:[#allocation2 + $0x18] sm:$0xff]  ;;  %v3847_v23 = vpack.i.bf16 %v150_v22, %v228_v18  ;;  %v143_v31 = vld [vmem:[#allocation2 + $0x1] sm:$0xff]  ;;  %v3662_v12 = vld [vmem:[#allocation9 + $0x48] sm:$0xff] }
  0x99   :  { %3843 = vrot.lane.b32.xlu2 %v3842_v15, %s4073_s9  ;;  %3858 = vrot.lane.b32.xlu1 %v3857_v17, %s4073_s9  ;;  %v3867_v26 = vpack.i.bf16 %v154_v25, %v232_v21  ;;  %v224_v27 = vld [vmem:[#allocation2 + $0x14] sm:$0xff]  ;;  %v151_v32 = vld [vmem:[#allocation2 + $0x5] sm:$0xff]  ;;  %v231_v38 = vld [vmem:[#allocation2 + $0x1f] sm:$0xf] }
  0x9a   :  { %v3872_v29 = vpack.i.bf16 %v146_v28, %v224_v27  ;;  %v145_v33 = vld [vmem:[#allocation2 + $0x2] sm:$0xff]  ;;  %v223_v36 = vld [vmem:[#allocation2 + $0x1b] sm:$0xf] }
  0x9b   :  { %v153_v35 = vld [vmem:[#allocation2 + $0x6] sm:$0xff]  ;;  %v225_v39 = vld [vmem:[#allocation2 + $0x1c] sm:$0xf] }
  0x9c   :  { %v3653_v10 = vld [vmem:[#allocation9] sm:$0xff]  ;;  %v3663_v11 = vld [vmem:[#allocation9 + $0x50] sm:$0xff]  ;;  %v141_v54 = vld [vmem:[#allocation2] sm:$0xff] }
  0x9d   :  { %607 = vmatpush.bf16.msra.mxu0 %v3653_v10  ;;  %623 = vmatpush.bf16.msra.mxu1 %v3663_v11  ;;  %v3661_v14 = vld [vmem:[#allocation9 + $0x40] sm:$0xff] }
  0x9e   :  { %v142_v51 = vld [vmem:[#allocation2 + $0x8] sm:$0xf] }
  0xa0   :  { %3863 = vrot.lane.b32.xlu0 %v3862_v24, %s4075_s11 }
  0xa1   :  { %3848 = vrot.lane.b32.xlu2 %v3847_v23, %s4074_s10  ;;  %3868 = vrot.lane.b32.xlu1 %v3867_v26, %s4076_s12 }
  0xa2   :  { %624 = vmatpush.bf16.msra.mxu1 %v3662_v12 }
  0xa6   :  { %625 = vmatpush.bf16.msra.mxu1 %v3661_v14 }
  0xa8   :  { %3873 = vrot.lane.b32.xlu0 %v3872_v29, %s4077_s14 }
  0xa9   :  { %181 = vrot.lane.b32.xlu2 %v149_v30, %s4074_s10  ;;  %157 = vrot.lane.b32.xlu1 %v143_v31, %s4075_s11 }
  0xb0   :  { %165 = vrot.lane.b32.xlu0 %v145_v33, %s4077_s14 }
  0xb1   :  { %189 = vrot.lane.b32.xlu2 %v151_v32, %s4072_s0  ;;  %262 = vrot.lane.b32.xlu1 %v229_v34, %s4074_s10 }
  0xb8   :  { %238 = vrot.lane.b32.xlu0 %v223_v36, %s4075_s11 }
  0xb9   :  { %197 = vrot.lane.b32.xlu2 %v153_v35, %s4076_s12  ;;  %278 = vrot.lane.b32.xlu1 %v233_v37, %s4076_s12  ;;  %v220_v37 = vld [vmem:[#allocation2 + $0x12] sm:$0xff] }
  0xc1   :  { %270 = vrot.lane.b32.xlu2 %v231_v38, %s4072_s0 }
  0xc9   :  { %246 = vrot.lane.b32.xlu2 %v225_v39, %s4077_s14 }
  0xf3   :  { %v4190_v2 = vpop.permute.xlu2 %3843 }
  0xf4   :  { %v3845_v16 = vunpack.i.l.bf16 %v4190_v2  ;;  %v3846_v22 = vunpack.i.h.bf16 %v4190_v2 }
  0xfb   :  { %v3849_v9 = vpop.permute.xlu2 %3848 }
  0xfc   :  { %v3850_v15 = vunpack.i.l.bf16 %v3849_v9  ;;  %v3851_v17 = vunpack.i.h.bf16 %v3849_v9 }
  0xfe   :  { %v288_v23 = vsel %vm211_vm4, %v3845_v16, %v3850_v15  ;;  %v213_v27 = vsel %vm211_vm4, %v3846_v22, %v3851_v17 }
 0x103   :  { %v182_v13 = vpop.permute.xlu2 %181 }
 0x10a   :  { %v3854_v18 = vpop.permute.xlu0 %3853 }
 0x10b   :  { %v3856_v19 = vunpack.i.h.bf16 %v3854_v18  ;;  %v3855_v20 = vunpack.i.l.bf16 %v3854_v18  ;;  %v4193_v21 = vpop.permute.xlu1 %3858  ;;  %v190_v24 = vpop.permute.xlu2 %189 }
 0x10c   :  { %v3860_v25 = vunpack.i.l.bf16 %v4193_v21  ;;  %v3861_v2 = vunpack.i.h.bf16 %v4193_v21 }
 0x10d   :  { %v290_v26 = vsel %vm214_vm5, %v288_v23, %v3855_v20  ;;  %v216_v30 = vsel %vm214_vm5, %v213_v27, %v3856_v19 }
 0x10e   :  { %v305_v28 = vrot.slane %v290_v26, 4  ;;  %v212_v29 = vsel %vm211_vm4, %v3860_v25, %v182_v13 }
 0x10f   :  { %v215_v31 = vsel %vm214_vm5, %v212_v29, %v190_v24 }
 0x110   :  { %v325_v32 = vsel %vm302_vm3, %v216_v30, %v305_v28 }
 0x111   :  { %v393_v33 = vpack.c.bf16 %v325_v32, %v215_v31  ;;  %v390_v32 = vld [vmem:[#allocation9 + $0xfc] sm:$0x1] }
 0x112   :  { %v3864_v34 = vpop.permute.xlu0 %3863 }
 0x113   :  { %v3865_v35 = vunpack.i.l.bf16 %v3864_v34  ;;  %v3869_v36 = vpop.permute.xlu1 %3868  ;;  %644 = vmatmul.bf16.vlgmr.msra.gmra.mxu2 %v393_v33  ;;  %v198_v41 = vpop.permute.xlu2 %197  ;;  %v3866_v43 = vunpack.i.h.bf16 %v3864_v34  ;;  %v399_v33 = vunpack.c.l.bf16 %v390_v32 }
 0x114   :  { %v3871_v38 = vunpack.i.h.bf16 %v3869_v36  ;;  %v3870_v39 = vunpack.i.l.bf16 %v3869_v36  ;;  %v218_v47 = vsel %vm217_vm6, %v190_v24, %v198_v41 }
 0x115   :  { %v282_v40 = vsel %vm93_vm0, %v220_v37, %v3865_v35  ;;  %v204_v55 = vsel %vm93_vm0, %v142_v51, %v3866_v43  ;;  %v400_v36 = vperm.slane %v399_v33, 0 }
 0x116   :  { %v292_v42 = vsel %vm217_vm6, %v3855_v20, %v3870_v39  ;;  %v303_v45 = vrot.slane %v282_v40, 4  ;;  %v219_v46 = vsel %vm217_vm6, %v3856_v19, %v3871_v38 }
 0x117   :  { %v306_v44 = vrot.slane %v292_v42, 4 }
 0x118   :  { %v323_v58 = vsel %vm302_vm3, %v204_v55, %v303_v45 }
 0x119   :  { %v326_v48 = vsel %vm302_vm3, %v219_v46, %v306_v44 }
 0x11a   :  { %v3874_v49 = vpop.permute.xlu0 %3873  ;;  %v394_v50 = vpack.c.bf16 %v326_v48, %v218_v47 }
 0x11b   :  { %v3875_v52 = vunpack.i.l.bf16 %v3874_v49  ;;  %v158_v53 = vpop.permute.xlu1 %157  ;;  %v3876_v56 = vunpack.i.h.bf16 %v3874_v49  ;;  %v271_v63 = vpop.permute.xlu2 %270 }
 0x11c   :  { %v203_v57 = vsel %vm93_vm0, %v141_v54, %v158_v53  ;;  %3009 = vmatmul.msk.bf16.vlgmr.msra.gmra.mxu3 %vm590_vm7, %v394_v50 }
 0x11d   :  { %v284_v59 = vsel %vm205_vm8, %v3865_v35, %v3875_v52  ;;  %v391_v60 = vpack.c.bf16 %v323_v58, %v203_v57  ;;  %v207_v62 = vsel %vm205_vm8, %v3866_v43, %v3876_v56 }
 0x11e   :  { %v286_v61 = vsel %vm208_vm9, %v284_v59, %v3845_v16  ;;  %v210_v6 = vsel %vm208_vm9, %v207_v62, %v3846_v22  ;;  %v221_v16 = vld [vmem:[#allocation2 + $0x1a] sm:$0xf] }
 0x11f   :  { %608 = vmatmul.bf16.vlgmr.msra.gmra.mxu0 %v391_v60  ;;  %v304_v1 = vrot.slane %v286_v61, 4 }
 0x121   :  { %v324_v9 = vsel %vm302_vm3, %v210_v6, %v304_v1 }
 0x122   :  { %v166_v3 = vpop.permute.xlu0 %165 }
 0x123   :  { %v206_v4 = vsel %vm205_vm8, %v158_v53, %v166_v3  ;;  %v263_v5 = vpop.permute.xlu1 %262  ;;  %v247_v15 = vpop.permute.xlu2 %246 }
 0x124   :  { %v289_v7 = vsel %vm211_vm4, %v3861_v2, %v263_v5  ;;  %v209_v8 = vsel %vm208_vm9, %v206_v4, %v3860_v25 }
 0x125   :  { %v291_v10 = vsel %vm214_vm5, %v289_v7, %v271_v63  ;;  %v392_v11 = vpack.c.bf16 %v324_v9, %v209_v8  ;;  %vm768_vm5 = vcmask 326656  }
 0x126   :  { %v311_v12 = vrot.slane %v291_v10, 4 }
 0x127   :  { %626 = vmatmul.bf16.vlgmr.msra.gmra.mxu1 %v392_v11 }
 0x128   :  { %v312_v13 = vsel %vm302_vm3, %v305_v28, %v311_v12 }
 0x129   :  { %v397_v14 = vpack.c.bf16 %v312_v13, %v312_v13 }
 0x12a   :  { %v239_v17 = vpop.permute.xlu0 %238 }
 0x12b   :  { %v283_v18 = vsel %vm93_vm0, %v221_v16, %v239_v17  ;;  %v285_v19 = vsel %vm205_vm8, %v239_v17, %v247_v15  ;;  %649 = vmatmul.bf16.gmra.mxu2 %v397_v14  ;;  %v279_v20 = vpop.permute.xlu1 %278  ;;  %vm100_vm0 = vcmask 523264  }
 0x12c   :  { %v287_v21 = vsel %vm208_vm9, %v285_v19, %v3861_v2  ;;  %v307_v22 = vrot.slane %v283_v18, 4  ;;  %v293_v23 = vsel %vm217_vm6, %v271_v63, %v279_v20  ;;  %101 = vst.msk [vmem:[#allocation3] sm:$0xff] %vm100_vm0, %v4071_v0  ;;  %vm793_vm6 = vcmask 455744  }
 0x12d   :  { %v313_v24 = vrot.slane %v293_v23, 4  ;;  %v309_v25 = vrot.slane %v287_v21, 4  ;;  %102 = vst.msk [vmem:[#allocation3 + $0x8] sm:$0xff] %vm100_vm0, %v4071_v0  ;;  %vm107_vm9 = vcmask 654336  }
 0x12e   :  { %v308_v26 = vsel %vm302_vm3, %v303_v45, %v307_v22  ;;  %103 = vst.msk [vmem:[#allocation4] sm:$0xff] %vm100_vm0, %v4071_v0 }
 0x12f   :  { %v395_v27 = vpack.c.bf16 %v308_v26, %v308_v26  ;;  %v314_v28 = vsel %vm302_vm3, %v306_v44, %v313_v24  ;;  %v310_v30 = vsel %vm302_vm3, %v304_v1, %v309_v25  ;;  %104 = vst.msk [vmem:[#allocation4 + $0x8] sm:$0xff] %vm100_vm0, %v4071_v0 }
 0x130   :  { %v398_v29 = vpack.c.bf16 %v314_v28, %v314_v28  ;;  %v396_v31 = vpack.c.bf16 %v310_v30, %v310_v30  ;;  %v3695_v30 = vld [vmem:[%s4611_s3 + $0x58] sm:$0xff]  ;;  %105 = vst.msk [vmem:[#allocation5] sm:$0xff] %vm100_vm0, %v4071_v0 }
 0x131   :  { %613 = vmatmul.bf16.gmra.mxu0 %v395_v27  ;;  %975 = vmatpush.bf16.msrb.mxu1 %v3695_v30  ;;  %106 = vst.msk [vmem:[#allocation5 + $0x8] sm:$0xff] %vm100_vm0, %v4071_v0 }
 0x132   :  { %3010 = vmatmul.msk.bf16.gmra.mxu3 %vm590_vm7, %v398_v29  ;;  %vm799_vm7 = vcmask 457798   ;;  %113 = vst.msk [vmem:[#allocation8] sm:$0xff] %vm107_vm9, %v4071_v0 }
 0x133   :  { %108 = vst.msk [vmem:[#allocation6] sm:$0xff] %vm107_vm9, %v4071_v0 }
 0x134   :  { %111 = vst.msk [vmem:[#allocation7] sm:$0xff] %vm107_vm9, %v4071_v0 }
 0x137   :  { %631 = vmatmul.bf16.gmra.mxu1 %v396_v31 }
 0x196   :  { %v645_v34 = vpop.f32.mrf.mxu2 }
 0x19c   :  { %v609_v35 = vpop.f32.mrf.mxu0 }
 0x19d   :  { %v610_v37 = vadd.f32 %v609_v35, %v400_v36 }
 0x19e   :  { %v647_v41 = vpop.f32.mrf.mxu2 }
 0x19f   :  { %v663_v38 = vpop.f32.mrf.mxu3 }
 0x1a4   :  { %v627_v39 = vpop.f32.mrf.mxu1  ;;  %v611_v42 = vpop.f32.mrf.mxu0 }
 0x1a5   :  { %v628_v40 = vadd.f32 %v627_v39, %v610_v37  ;;  %v612_v45 = vadd.f32 %v611_v42, %v400_v36 }
 0x1a7   :  { %v646_v43 = vadd.f32 %v645_v34, %v628_v40  ;;  %v665_v49 = vpop.f32.mrf.mxu3 }
 0x1a9   :  { %v664_v44 = vadd.f32 %v663_v38, %v646_v43 }
 0x1ab   :  { %v672_v46 = vmax.f32 %v664_v44, 0.0 }
 0x1ac   :  { %v629_v47 = vpop.f32.mrf.mxu1 }
 0x1ad   :  { %v676_v48 = vrot.slane %v672_v46, 1  ;;  %v630_v50 = vadd.f32 %v629_v47, %v612_v45 }
 0x1ae   :  { %v650_v51 = vpop.f32.mrf.mxu2  ;;  %v614_v52 = vpop.f32.mrf.mxu0 }
 0x1af   :  { %v678_v53 = vmax.f32 %v672_v46, %v676_v48  ;;  %v648_v54 = vadd.f32 %v647_v41, %v630_v50  ;;  %v615_v59 = vadd.f32 %v614_v52, %v400_v36 }
 0x1b1   :  { %v688_v55 = vrot.slane %v678_v53, 1  ;;  %v666_v56 = vadd.f32 %v665_v49, %v648_v54  ;;  %v690_v57 = vrot.slane %v678_v53, 2  ;;  %v692_v7 = vrot.slane %v678_v53, 3 }
 0x1b3   :  { %v673_v58 = vmax.f32 %v666_v56, 0.0  ;;  %v711_v60 = vsel %vm710_vm10, %v678_v53, %v688_v55 }
 0x1b4   :  { %v632_v61 = vpop.f32.mrf.mxu1  ;;  %v713_v4 = vsel %vm712_vm11, %v711_v60, %v690_v57 }
 0x1b5   :  { %v680_v62 = vrot.slane %v673_v58, 1  ;;  %v633_v63 = vadd.f32 %v632_v61, %v615_v59  ;;  %v668_v1 = vpop.f32.mrf.mxu3  ;;  %v715_v10 = vsel %vm714_vm12, %v713_v4, %v692_v7  ;;  %v3691_v4 = vld [vmem:[%s4611_s3 + $0x38] sm:$0xff]  ;;  %v3688_v7 = vld [vmem:[%s4611_s3 + $0x20] sm:$0xff] }
 0x1b6   :  { %v652_v2 = vpop.f32.mrf.mxu2  ;;  %v616_v3 = vpop.f32.mrf.mxu0  ;;  %957 = vmatpush.bf16.msrb.mxu0 %v3691_v4 }
 0x1b7   :  { %v682_v5 = vmax.f32 %v673_v58, %v680_v62  ;;  %v651_v6 = vadd.f32 %v650_v51, %v633_v63  ;;  %v3693_v2 = vld [vmem:[%s4611_s3 + $0x48] sm:$0xff]  ;;  %v3692_v3 = vld [vmem:[%s4611_s3 + $0x40] sm:$0xff] }
 0x1b9   :  { %v695_v8 = vrot.slane %v682_v5, 4  ;;  %v697_v9 = vrot.slane %v682_v5, 5  ;;  %v669_v11 = vadd.f32 %v668_v1, %v651_v6  ;;  %v699_v12 = vrot.slane %v682_v5, 6  ;;  %v3694_v1 = vld [vmem:[%s4611_s3 + $0x50] sm:$0xff]  ;;  %v3689_v6 = vld [vmem:[%s4611_s3 + $0x28] sm:$0xff] }
 0x1ba   :  { %v701_v14 = vrot.slane %v682_v5, 7  ;;  %976 = vmatpush.bf16.msrb.mxu1 %v3694_v1  ;;  %v3690_v5 = vld [vmem:[%s4611_s3 + $0x30] sm:$0xff] }
 0x1bb   :  { %v716_v13 = vsel %vm302_vm3, %v715_v10, %v695_v8  ;;  %v674_v15 = vmax.f32 %v669_v11, 0.0  ;;  %958 = vmatpush.bf16.msrb.mxu0 %v3690_v5  ;;  %v3687_v8 = vld [vmem:[%s4611_s3 + $0x18] sm:$0xff]  ;;  %v3686_v11 = vld [vmem:[%s4611_s3 + $0x10] sm:$0xff] }
 0x1bc   :  { %v634_v16 = vpop.f32.mrf.mxu1  ;;  %v718_v17 = vsel %vm717_vm13, %v716_v13, %v697_v9 }
 0x1bd   :  { %v670_v18 = vpop.f32.mrf.mxu3  ;;  %v720_v19 = vsel %vm719_vm14, %v718_v17, %v699_v12  ;;  %v684_v20 = vrot.slane %v674_v15, 1 }
 0x1be   :  { %v722_v21 = vsel %vm721_vm15, %v720_v19, %v701_v14  ;;  %977 = vmatpush.bf16.msrb.mxu1 %v3693_v2 }
 0x1bf   :  { %740 = vrot.lane.b32.xlu1 %v722_v21, %s4072_s0  ;;  %734 = vrot.lane.b32.xlu2 %v722_v21, %s4078_s15  ;;  %v686_v22 = vmax.f32 %v674_v15, %v684_v20  ;;  %v3685_v20 = vld [vmem:[%s4611_s3 + $0x8] sm:$0xff] }
 0x1c0   :  { %728 = vrot.lane.b32.xlu0 %v722_v21, %s4079_s16  ;;  %959 = vmatpush.bf16.msrb.mxu0 %v3689_v6  ;;  %v3697_v6 = vld [vmem:[%s4611_s3 + $0x6c] sm:$0xff] }
 0x1c1   :  { %v704_v23 = vrot.slane %v686_v22, 1  ;;  %v706_v24 = vrot.slane %v686_v22, 2  ;;  %v708_v25 = vrot.slane %v686_v22, 3 }
 0x1c2   :  { %978 = vmatpush.bf16.msrb.mxu1 %v3692_v3 }
 0x1c3   :  { %v723_v26 = vsel %vm710_vm10, %v686_v22, %v704_v23 }
 0x1c4   :  { %v724_v27 = vsel %vm712_vm11, %v723_v26, %v706_v24  ;;  %960 = vmatpush.bf16.msrb.mxu0 %v3688_v7  ;;  %v3696_v7 = vld [vmem:[%s4611_s3 + $0x64] sm:$0xff] }
 0x1c5   :  { %v725_v28 = vsel %vm714_vm12, %v724_v27, %v708_v25 }
 0x1c7   :  { %730 = vrot.lane.b32.xlu1 %v725_v28, %s4079_s16  ;;  %752 = vrot.lane.b32.xlu2 %v722_v21, %s4073_s9 }
 0x1c8   :  { %746 = vrot.lane.b32.xlu0 %v722_v21, %s4080_s17  ;;  %961 = vmatpush.bf16.msrb.mxu0 %v3687_v8 }
 0x1cc   :  { %962 = vmatpush.bf16.msrb.mxu0 %v3686_v11 }
 0x1cf   :  { %748 = vrot.lane.b32.xlu1 %v725_v28, %s4080_s17  ;;  %742 = vrot.lane.b32.xlu2 %v725_v28, %s4072_s0 }
 0x1d0   :  { %736 = vrot.lane.b32.xlu0 %v725_v28, %s4078_s15  ;;  %963 = vmatpush.bf16.msrb.mxu0 %v3685_v20 }
 0x1d7   :  { %771 = vrot.lane.b32.xlu1 %v722_v21, %s4081_s18  ;;  %773 = vrot.lane.b32.xlu2 %v725_v28, %s4081_s18 }
 0x1d8   :  { %754 = vrot.lane.b32.xlu0 %v725_v28, %s4073_s9 }
 0x219   :  { %v735_v29 = vpop.permute.xlu2 %734 }
 0x221   :  { %v753_v33 = vpop.permute.xlu2 %752 }
 0x229   :  { %v743_v37 = vpop.permute.xlu2 %742 }
 0x231   :  { %v741_v31 = vpop.permute.xlu1 %740  ;;  %v774_v58 = vpop.permute.xlu2 %773 }
 0x232   :  { %v729_v32 = vpop.permute.xlu0 %728 }
 0x233   :  { %v759_v36 = vsel %vm758_vm1, %v722_v21, %v729_v32  ;;  %v777_v39 = vsel %vm758_vm1, %v729_v32, %v735_v29  ;;  %v3684_v21 = vld [vmem:[%s4611_s3] sm:$0xff] }
 0x234   :  { %v761_v41 = vsel %vm205_vm8, %v759_v36, %v735_v29  ;;  %v779_v45 = vsel %vm205_vm8, %v777_v39, %v741_v31  ;;  %964 = vmatpush.bf16.msrb.mxu0 %v3684_v21  ;;  %v827_v32 = vld [vmem:[%s4611_s3 + $0x60] sm:$0x1] }
 0x235   :  { %v764_v46 = vsel %vm763_vm2, %v761_v41, %v741_v31 }
 0x239   :  { %v731_v34 = vpop.permute.xlu1 %730 }
 0x23a   :  { %v747_v35 = vpop.permute.xlu0 %746  ;;  %v760_v42 = vsel %vm758_vm1, %v725_v28, %v731_v34 }
 0x23b   :  { %v781_v47 = vsel %vm763_vm2, %v779_v45, %v747_v35  ;;  %v766_v48 = vsel %vm211_vm4, %v764_v46, %v747_v35 }
 0x23c   :  { %v783_v52 = vsel %vm211_vm4, %v781_v47, %v753_v33  ;;  %v769_v53 = vsel %vm768_vm5, %v766_v48, %v753_v33  ;;  %v880_v33 = vunpack.c.l.bf16 %v827_v32 }
 0x241   :  { %v749_v38 = vpop.permute.xlu1 %748 }
 0x242   :  { %v737_v40 = vpop.permute.xlu0 %736 }
 0x243   :  { %v762_v43 = vsel %vm205_vm8, %v760_v42, %v737_v40  ;;  %v778_v44 = vsel %vm758_vm1, %v731_v34, %v737_v40  ;;  %v881_v34 = vperm.slane %v880_v33, 0 }
 0x244   :  { %v765_v49 = vsel %vm763_vm2, %v762_v43, %v743_v37  ;;  %v780_v50 = vsel %vm205_vm8, %v778_v44, %v743_v37  ;;  %vm801_vm8 = vcmask 453696  }
 0x245   :  { %v767_v55 = vsel %vm211_vm4, %v765_v49, %v749_v38  ;;  %v782_v56 = vsel %vm763_vm2, %v780_v50, %v749_v38  ;;  %v3707_v49 = vld [vmem:[%s4611_s3 + $0xbc] sm:$0xff]  ;;  %v3706_v50 = vld [vmem:[%s4611_s3 + $0xb4] sm:$0xff] }
 0x246   :  { %1119 = vmatpush.bf16.msrb.mxu3 %v3707_v49 }
 0x249   :  { %v772_v51 = vpop.permute.xlu1 %771 }
 0x24a   :  { %v785_v54 = vsel %vm768_vm5, %v783_v52, %v772_v51  ;;  %v755_v57 = vpop.permute.xlu0 %754  ;;  %1120 = vmatpush.bf16.msrb.mxu3 %v3706_v50  ;;  %v3705_v51 = vld [vmem:[%s4611_s3 + $0xac] sm:$0xff]  ;;  %v3704_v52 = vld [vmem:[%s4611_s3 + $0xa4] sm:$0xff] }
 0x24b   :  { %v787_v59 = vmax.f32 %v769_v53, %v785_v54  ;;  %v770_v60 = vsel %vm768_vm5, %v767_v55, %v755_v57  ;;  %v784_v61 = vsel %vm211_vm4, %v782_v56, %v755_v57  ;;  %v3703_v53 = vld [vmem:[%s4611_s3 + $0x9c] sm:$0xff]  ;;  %v3702_v54 = vld [vmem:[%s4611_s3 + $0x94] sm:$0xff]  ;;  %v3701_v55 = vld [vmem:[%s4611_s3 + $0x8c] sm:$0xff] }
 0x24c   :  { %v786_v62 = vsel %vm768_vm5, %v784_v61, %v774_v58  ;;  %1101 = vmatpush.bf16.msrb.mxu2 %v3703_v53  ;;  %v3700_v57 = vld [vmem:[%s4611_s3 + $0x84] sm:$0xff]  ;;  %v3699_v58 = vld [vmem:[%s4611_s3 + $0x7c] sm:$0xff] }
 0x24d   :  { %v788_v63 = vmax.f32 %v770_v60, %v786_v62  ;;  %790 = vrot.lane.b32.xlu0 %v787_v59, %s4082_s19  ;;  %v3698_v60 = vld [vmem:[%s4611_s3 + $0x74] sm:$0xff] }
 0x24e   :  { %1121 = vmatpush.bf16.msrb.mxu3 %v3705_v51 }
 0x24f   :  { %796 = vrot.lane.b32.xlu1 %v788_v63, %s4082_s19 }
 0x250   :  { %1102 = vmatpush.bf16.msrb.mxu2 %v3702_v54 }
 0x252   :  { %1122 = vmatpush.bf16.msrb.mxu3 %v3704_v52 }
 0x254   :  { %1103 = vmatpush.bf16.msrb.mxu2 %v3701_v55  ;;  %v3709_v55 = vld [vmem:[%s4611_s3 + $0xd0] sm:$0xff] }
 0x258   :  { %1104 = vmatpush.bf16.msrb.mxu2 %v3700_v57 }
 0x25c   :  { %1105 = vmatpush.bf16.msrb.mxu2 %v3699_v58 }
 0x260   :  { %1106 = vmatpush.bf16.msrb.mxu2 %v3698_v60 }
 0x264   :  { %1107 = vmatpush.bf16.msrb.mxu2 %v3697_v6 }
 0x268   :  { %1108 = vmatpush.bf16.msrb.mxu2 %v3696_v7 }
 0x2bf   :  { %v791_v9 = vpop.permute.xlu0 %790 }
 0x2c0   :  { %794 = vst.msk [vmem:[#allocation3 + $0x1] sm:$0x3f] %vm793_vm6, %v791_v9 }
 0x2c1   :  { %800 = vst.msk [vmem:[#allocation3 + $0x3] sm:$0xc0] %vm799_vm7, %v791_v9  ;;  %v797_v10 = vpop.permute.xlu1 %796 }
 0x2c2   :  { %802 = vst.msk [vmem:[#allocation3 + $0xb] sm:$0xf] %vm801_vm8, %v797_v10 }
 0x2c7   :  { %v855_v12 = vld [vmem:[#allocation3 + $0x1] sm:$0x3f] }
 0x2c8   :  { %v856_v17 = vld [vmem:[#allocation3 + $0x2] sm:$0x3f] }
 0x2c9   :  { %v863_v13 = vld [vmem:[#allocation3 + $0x9] sm:$0x3f]  ;;  %v854_v27 = vld [vmem:[#allocation3] sm:$0x3f] }
 0x2ca   :  { %v864_v14 = vld [vmem:[#allocation3 + $0xa] sm:$0x3f]  ;;  %v3877_v15 = vpack.i.bf16 %v855_v12, %v863_v13  ;;  %v1129_v47 = vld [vmem:[#allocation3 + $0x1] sm:$0x3f] }
 0x2cb   :  { %v873_v16 = vrot.slane %v864_v14, 2  ;;  %v862_v25 = vld [vmem:[#allocation3 + $0x8] sm:$0x3f] }
 0x2cc   :  { %3878 = vrot.lane.b32.xlu2 %v3877_v15, %s4066_s13  ;;  %v1130_v40 = vld [vmem:[#allocation3 + $0x9] sm:$0x3f] }
 0x2cd   :  { %v877_v18 = vsel %vm719_vm14, %v856_v17, %v873_v16  ;;  %v1132_v44 = vrot.slane %v1130_v40, 2  ;;  %v3715_v40 = vld [vmem:[%s4611_s3 + $0x100] sm:$0xff] }
 0x2ce   :  { %v879_v19 = vpack.c.bf16 %v873_v16, %v877_v18  ;;  %v3035_v18 = vld [vmem:[%s4611_s3 + $0xc4] sm:$0x1]  ;;  %1312 = vmatpush.bf16.msra.mxu0 %v3715_v40 }
 0x2cf   :  { %v1134_v48 = vsel %vm719_vm14, %v1129_v47, %v1132_v44 }
 0x2d0   :  { %3084 = vmatmul.msk.bf16.vlgmr.msrb.gmra.mxu1 %vm100_vm0, %v879_v19  ;;  %v1024_v19 = vunpack.c.l.bf16 %v3035_v18 }
 0x2d2   :  { %v1025_v20 = vperm.slane %v1024_v19, 0 }
 0x326   :  { %v3879_v22 = vpop.permute.xlu2 %3878 }
 0x327   :  { %v3881_v23 = vunpack.i.h.bf16 %v3879_v22  ;;  %v3880_v24 = vunpack.i.l.bf16 %v3879_v22 }
 0x329   :  { %v869_v26 = vsel %vm100_vm0, %v862_v25, %v3880_v24  ;;  %v861_v29 = vsel %vm100_vm0, %v854_v27, %v3881_v23 }
 0x32a   :  { %v872_v28 = vrot.slane %v869_v26, 2 }
 0x32c   :  { %v876_v30 = vsel %vm719_vm14, %v861_v29, %v872_v28 }
 0x32d   :  { %v878_v31 = vpack.c.bf16 %v872_v28, %v876_v30 }
 0x32f   :  { %965 = vmatmul.bf16.vlgmr.msrb.gmra.mxu0 %v878_v31 }
 0x34d   :  { %v980_v35 = vpop.f32.mrf.mxu1 }
 0x355   :  { %v982_v43 = vpop.f32.mrf.mxu1 }
 0x3ac   :  { %v966_v36 = vpop.f32.mrf.mxu0 }
 0x3ad   :  { %v967_v37 = vadd.f32 %v966_v36, %v881_v34 }
 0x3af   :  { %v981_v38 = vadd.f32 %v980_v35, %v967_v37  ;;  %v3719_v35 = vld [vmem:[%s4611_s3 + $0x120] sm:$0xff]  ;;  %v3718_v37 = vld [vmem:[%s4611_s3 + $0x118] sm:$0xff] }
 0x3b0   :  { %1330 = vmatpush.bf16.msra.mxu1 %v3719_v35 }
 0x3b1   :  { %v985_v39 = vmax.f32 %v981_v38, 0.0  ;;  %v3717_v38 = vld [vmem:[%s4611_s3 + $0x110] sm:$0xff] }
 0x3b3   :  { %988 = vrot.lane.b32.xlu0 %v985_v39, %s4082_s19  ;;  %v3716_v39 = vld [vmem:[%s4611_s3 + $0x108] sm:$0xff] }
 0x3b4   :  { %v968_v41 = vpop.f32.mrf.mxu0  ;;  %1331 = vmatpush.bf16.msra.mxu1 %v3718_v37 }
 0x3b5   :  { %v969_v42 = vadd.f32 %v968_v41, %v881_v34  ;;  %v3714_v41 = vld [vmem:[%s4611_s3 + $0xf8] sm:$0xff] }
 0x3b6   :  { %1313 = vmatpush.bf16.msra.mxu0 %v3714_v41  ;;  %v3721_v41 = vld [vmem:[%s4611_s3 + $0x134] sm:$0xff] }
 0x3b7   :  { %v983_v45 = vadd.f32 %v982_v43, %v969_v42  ;;  %v3713_v42 = vld [vmem:[%s4611_s3 + $0xf0] sm:$0xff]  ;;  %v3712_v43 = vld [vmem:[%s4611_s3 + $0xe8] sm:$0xff] }
 0x3b8   :  { %1332 = vmatpush.bf16.msra.mxu1 %v3717_v38 }
 0x3b9   :  { %v986_v46 = vmax.f32 %v983_v45, 0.0 }
 0x3ba   :  { %1314 = vmatpush.bf16.msra.mxu0 %v3713_v42  ;;  %v3720_v42 = vld [vmem:[%s4611_s3 + $0x12c] sm:$0xff] }
 0x3bb   :  { %993 = vrot.lane.b32.xlu1 %v986_v46, %s4082_s19  ;;  %1136 = vrot.lane.b32.xlu0 %v1134_v48, %s4079_s16  ;;  %v3710_v46 = vld [vmem:[%s4611_s3 + $0xd8] sm:$0xff] }
 0x3bc   :  { %1333 = vmatpush.bf16.msra.mxu1 %v3716_v39 }
 0x3be   :  { %1315 = vmatpush.bf16.msra.mxu0 %v3712_v43 }
 0x3c3   :  { %1138 = vrot.lane.b32.xlu1 %v1132_v44, %s4079_s16  ;;  %v3711_v44 = vld [vmem:[%s4611_s3 + $0xe0] sm:$0xff] }
 0x3c4   :  { %1316 = vmatpush.bf16.msra.mxu0 %v3711_v44 }
 0x3c8   :  { %1317 = vmatpush.bf16.msra.mxu0 %v3710_v46 }
 0x3cc   :  { %1318 = vmatpush.bf16.msra.mxu0 %v3709_v55 }
 0x425   :  { %v989_v56 = vpop.permute.xlu0 %988 }
 0x426   :  { %991 = vst.msk [vmem:[#allocation5 + $0x1] sm:$0x3f] %vm793_vm6, %v989_v56 }
 0x427   :  { %996 = vst.msk [vmem:[#allocation5 + $0x3] sm:$0xc0] %vm799_vm7, %v989_v56  ;;  %v3708_v56 = vld [vmem:[%s4611_s3 + $0xc8] sm:$0xff] }
 0x428   :  { %1319 = vmatpush.bf16.msra.mxu0 %v3708_v56 }
 0x42d   :  { %v994_v59 = vpop.permute.xlu1 %993  ;;  %v999_v61 = vld [vmem:[#allocation5 + $0x1] sm:$0x3f]  ;;  %v1137_v25 = vpop.permute.xlu0 %1136 }
 0x42e   :  { %997 = vst.msk [vmem:[#allocation5 + $0xb] sm:$0xf] %vm801_vm8, %v994_v59  ;;  %v1000_v3 = vld [vmem:[#allocation5 + $0x2] sm:$0x3f] }
 0x42f   :  { %v998_v13 = vld [vmem:[#allocation5] sm:$0x3f] }
 0x435   :  { %v1007_v62 = vld [vmem:[#allocation5 + $0x9] sm:$0x3f]  ;;  %v1139_v32 = vpop.permute.xlu1 %1138 }
 0x436   :  { %v1008_v63 = vld [vmem:[#allocation5 + $0xa] sm:$0x3f]  ;;  %v3882_v1 = vpack.i.bf16 %v999_v61, %v1007_v62 }
 0x437   :  { %v1017_v2 = vrot.slane %v1008_v63, 2  ;;  %v1006_v11 = vld [vmem:[#allocation5 + $0x8] sm:$0x3f] }
 0x438   :  { %3883 = vrot.lane.b32.xlu2 %v3882_v1, %s4066_s13 }
 0x439   :  { %v1021_v4 = vsel %vm719_vm14, %v1000_v3, %v1017_v2 }
 0x43a   :  { %v1023_v5 = vpack.c.bf16 %v1017_v2, %v1021_v4  ;;  %v3158_v4 = vld [vmem:[%s4611_s3 + $0x128] sm:$0x1] }
 0x43c   :  { %3133 = vmatmul.msk.bf16.vlgmr.msrb.gmra.mxu3 %vm100_vm0, %v1023_v5  ;;  %v1235_v5 = vunpack.c.l.bf16 %v3158_v4 }
 0x43e   :  { %v1236_v6 = vperm.slane %v1235_v5, 0 }
 0x492   :  { %v3884_v8 = vpop.permute.xlu2 %3883 }
 0x493   :  { %v3886_v9 = vunpack.i.h.bf16 %v3884_v8  ;;  %v3885_v10 = vunpack.i.l.bf16 %v3884_v8 }
 0x495   :  { %v1013_v12 = vsel %vm100_vm0, %v1006_v11, %v3885_v10  ;;  %v1005_v15 = vsel %vm100_vm0, %v998_v13, %v3886_v9 }
 0x496   :  { %v1016_v14 = vrot.slane %v1013_v12, 2 }
 0x498   :  { %v1020_v16 = vsel %vm719_vm14, %v1005_v15, %v1016_v14 }
 0x499   :  { %v1022_v17 = vpack.c.bf16 %v1016_v14, %v1020_v16 }
 0x49b   :  { %1109 = vmatmul.bf16.vlgmr.msrb.gmra.mxu2 %v1022_v17 }
 0x4bf   :  { %v1124_v21 = vpop.f32.mrf.mxu3 }
 0x4c7   :  { %v1126_v30 = vpop.f32.mrf.mxu3 }
 0x51e   :  { %v1110_v22 = vpop.f32.mrf.mxu2 }
 0x51f   :  { %v1111_v23 = vadd.f32 %v1110_v22, %v1025_v20 }
 0x521   :  { %v1125_v24 = vadd.f32 %v1124_v21, %v1111_v23  ;;  %v3731_v21 = vld [vmem:[%s4611_s3 + $0x184] sm:$0xff]  ;;  %v3730_v23 = vld [vmem:[%s4611_s3 + $0x17c] sm:$0xff] }
 0x522   :  { %1474 = vmatpush.bf16.msra.mxu3 %v3731_v21 }
 0x523   :  { %v1142_v26 = vadd.f32 %v1137_v25, %v1125_v24  ;;  %v3729_v24 = vld [vmem:[%s4611_s3 + $0x174] sm:$0xff]  ;;  %v3728_v25 = vld [vmem:[%s4611_s3 + $0x16c] sm:$0xff] }
 0x525   :  { %v1144_v27 = vmax.f32 %v1142_v26, 0.0  ;;  %v3727_v26 = vld [vmem:[%s4611_s3 + $0x164] sm:$0xff] }
 0x526   :  { %v1112_v28 = vpop.f32.mrf.mxu2  ;;  %1475 = vmatpush.bf16.msra.mxu3 %v3730_v23  ;;  %1456 = vmatpush.bf16.msra.mxu2 %v3727_v26 }
 0x527   :  { %v1113_v29 = vadd.f32 %v1112_v28, %v1025_v20  ;;  %1147 = vrot.lane.b32.xlu2 %v1144_v27, %s4082_s19  ;;  %v3726_v27 = vld [vmem:[%s4611_s3 + $0x15c] sm:$0xff]  ;;  %v3725_v28 = vld [vmem:[%s4611_s3 + $0x154] sm:$0xff] }
 0x529   :  { %v1127_v31 = vadd.f32 %v1126_v30, %v1113_v29  ;;  %v3724_v29 = vld [vmem:[%s4611_s3 + $0x14c] sm:$0xff]  ;;  %v3723_v30 = vld [vmem:[%s4611_s3 + $0x144] sm:$0xff] }
 0x52a   :  { %1476 = vmatpush.bf16.msra.mxu3 %v3729_v24  ;;  %1457 = vmatpush.bf16.msra.mxu2 %v3726_v27 }
 0x52b   :  { %v1143_v33 = vadd.f32 %v1139_v32, %v1127_v31  ;;  %v3722_v32 = vld [vmem:[%s4611_s3 + $0x13c] sm:$0xff] }
 0x52d   :  { %v1145_v34 = vmax.f32 %v1143_v33, 0.0 }
 0x52e   :  { %1477 = vmatpush.bf16.msra.mxu3 %v3728_v25  ;;  %1458 = vmatpush.bf16.msra.mxu2 %v3725_v28 }
 0x52f   :  { %1152 = vrot.lane.b32.xlu0 %v1145_v34, %s4082_s19 }
 0x532   :  { %1459 = vmatpush.bf16.msra.mxu2 %v3724_v29 }
 0x536   :  { %1460 = vmatpush.bf16.msra.mxu2 %v3723_v30 }
 0x53a   :  { %1461 = vmatpush.bf16.msra.mxu2 %v3722_v32 }
 0x53e   :  { %1462 = vmatpush.bf16.msra.mxu2 %v3721_v41 }
 0x542   :  { %1463 = vmatpush.bf16.msra.mxu2 %v3720_v42 }
 0x581   :  { %v1148_v36 = vpop.permute.xlu2 %1147 }
 0x582   :  { %1150 = vst.msk [vmem:[#allocation4 + $0x1] sm:$0x3f] %vm793_vm6, %v1148_v36 }
 0x583   :  { %1155 = vst.msk [vmem:[#allocation4 + $0x3] sm:$0xc0] %vm799_vm7, %v1148_v36 }
 0x589   :  { %v1210_v47 = vld [vmem:[#allocation4 + $0x1] sm:$0x3f] }
 0x58a   :  { %v1211_v52 = vld [vmem:[#allocation4 + $0x2] sm:$0x3f] }
 0x58b   :  { %v1209_v62 = vld [vmem:[#allocation4] sm:$0x3f] }
 0x58c   :  { %v1484_v19 = vld [vmem:[#allocation4 + $0x1] sm:$0x3f] }
 0x5a1   :  { %v1153_v45 = vpop.permute.xlu0 %1152 }
 0x5a2   :  { %1156 = vst.msk [vmem:[#allocation4 + $0xb] sm:$0xf] %vm801_vm8, %v1153_v45 }
 0x5a9   :  { %v1218_v48 = vld [vmem:[#allocation4 + $0x9] sm:$0x3f] }
 0x5aa   :  { %v1219_v49 = vld [vmem:[#allocation4 + $0xa] sm:$0x3f]  ;;  %v3887_v50 = vpack.i.bf16 %v1210_v47, %v1218_v48 }
 0x5ab   :  { %v1228_v51 = vrot.slane %v1219_v49, 2  ;;  %v1217_v60 = vld [vmem:[#allocation4 + $0x8] sm:$0x3f] }
 0x5ac   :  { %3888 = vrot.lane.b32.xlu1 %v3887_v50, %s4066_s13  ;;  %v1485_v12 = vld [vmem:[#allocation4 + $0x9] sm:$0x3f] }
 0x5ad   :  { %v1232_v53 = vsel %vm719_vm14, %v1211_v52, %v1228_v51  ;;  %v1487_v16 = vrot.slane %v1485_v12, 2  ;;  %v3762_v12 = vld [vmem:[#allocation13 + $0x18] sm:$0xff] }
 0x5ae   :  { %v1234_v54 = vpack.c.bf16 %v1228_v51, %v1232_v53  ;;  %v3183_v53 = vld [vmem:[%s4611_s3 + $0x18c] sm:$0x1] }
 0x5af   :  { %v1489_v20 = vsel %vm719_vm14, %v1484_v19, %v1487_v16 }
 0x5b0   :  { %3232 = vmatmul.msk.bf16.vlgmr.msra.gmra.mxu1 %vm100_vm0, %v1234_v54  ;;  %v1379_v54 = vunpack.c.l.bf16 %v3183_v53 }
 0x5b2   :  { %v1380_v55 = vperm.slane %v1379_v54, 0  ;;  %v3739_v54 = vld [vmem:[#allocation11 + $0x38] sm:$0xff] }
 0x5b3   :  { %1700 = vmatpush.bf16.msrb.mxu1 %v3739_v54  ;;  %v3754_v54 = vld [vmem:[#allocation14 + $0x50] sm:$0xff] }
 0x61e   :  { %v3889_v57 = vpop.permute.xlu1 %3888 }
 0x61f   :  { %v3891_v58 = vunpack.i.h.bf16 %v3889_v57  ;;  %v3890_v59 = vunpack.i.l.bf16 %v3889_v57 }
 0x621   :  { %v1224_v61 = vsel %vm100_vm0, %v1217_v60, %v3890_v59  ;;  %v1216_v1 = vsel %vm100_vm0, %v1209_v62, %v3891_v58 }
 0x622   :  { %v1227_v63 = vrot.slane %v1224_v61, 2 }
 0x624   :  { %v1231_v2 = vsel %vm719_vm14, %v1216_v1, %v1227_v63 }
 0x625   :  { %v1233_v3 = vpack.c.bf16 %v1227_v63, %v1231_v2 }
 0x627   :  { %1320 = vmatmul.bf16.vlgmr.msra.gmra.mxu0 %v1233_v3 }
 0x62d   :  { %v1335_v7 = vpop.f32.mrf.mxu1 }
 0x635   :  { %v1337_v15 = vpop.f32.mrf.mxu1 }
 0x6a4   :  { %v1321_v8 = vpop.f32.mrf.mxu0 }
 0x6a5   :  { %v1322_v9 = vadd.f32 %v1321_v8, %v1236_v6  ;;  %v3742_v8 = vld [vmem:[#allocation11 + $0x50] sm:$0xff] }
 0x6a7   :  { %v1336_v10 = vadd.f32 %v1335_v7, %v1322_v9  ;;  %v3743_v7 = vld [vmem:[#allocation11 + $0x58] sm:$0xff]  ;;  %v3741_v9 = vld [vmem:[#allocation11 + $0x48] sm:$0xff] }
 0x6a8   :  { %1717 = vmatpush.bf16.msrb.mxu3 %v3743_v7  ;;  %v1512_v7 = vld [vmem:[#allocation3] sm:$0x1] }
 0x6a9   :  { %v1340_v11 = vmax.f32 %v1336_v10, 0.0  ;;  %v3740_v10 = vld [vmem:[#allocation11 + $0x40] sm:$0xff] }
 0x6ab   :  { %1343 = vrot.lane.b32.xlu2 %v1340_v11, %s4082_s19 }
 0x6ac   :  { %v1323_v13 = vpop.f32.mrf.mxu0  ;;  %1718 = vmatpush.bf16.msrb.mxu3 %v3742_v8 }
 0x6ad   :  { %v1324_v14 = vadd.f32 %v1323_v13, %v1236_v6  ;;  %v3761_v13 = vld [vmem:[#allocation13 + $0x10] sm:$0xff] }
 0x6af   :  { %v1338_v17 = vadd.f32 %v1337_v15, %v1324_v14 }
 0x6b0   :  { %1719 = vmatpush.bf16.msrb.mxu3 %v3741_v9 }
 0x6b1   :  { %v1341_v18 = vmax.f32 %v1338_v17, 0.0  ;;  %v3760_v17 = vld [vmem:[#allocation13 + $0x8] sm:$0xff] }
 0x6b3   :  { %1348 = vrot.lane.b32.xlu0 %v1341_v18, %s4082_s19  ;;  %1491 = vrot.lane.b32.xlu2 %v1489_v20, %s4079_s16  ;;  %v3759_v18 = vld [vmem:[#allocation13] sm:$0xff] }
 0x6b4   :  { %1720 = vmatpush.bf16.msrb.mxu3 %v3740_v10 }
 0x6bb   :  { %1493 = vrot.lane.b32.xlu0 %v1487_v16, %s4079_s16 }
 0x705   :  { %v1344_v22 = vpop.permute.xlu2 %1343 }
 0x706   :  { %1346 = vst.msk [vmem:[#allocation5 + $0x1] sm:$0x3f] %vm793_vm6, %v1344_v22 }
 0x707   :  { %1351 = vst.msk [vmem:[#allocation5 + $0x3] sm:$0xc0] %vm799_vm7, %v1344_v22 }
 0x70d   :  { %v1354_v33 = vld [vmem:[#allocation5 + $0x1] sm:$0x3f]  ;;  %v1492_v60 = vpop.permute.xlu2 %1491 }
 0x70e   :  { %v1355_v38 = vld [vmem:[#allocation5 + $0x2] sm:$0x3f] }
 0x70f   :  { %v1353_v48 = vld [vmem:[#allocation5] sm:$0x3f] }
 0x725   :  { %v1349_v31 = vpop.permute.xlu0 %1348 }
 0x726   :  { %1352 = vst.msk [vmem:[#allocation5 + $0xb] sm:$0xf] %vm801_vm8, %v1349_v31 }
 0x72d   :  { %v1362_v34 = vld [vmem:[#allocation5 + $0x9] sm:$0x3f]  ;;  %v1494_v4 = vpop.permute.xlu0 %1493 }
 0x72e   :  { %v1363_v35 = vld [vmem:[#allocation5 + $0xa] sm:$0x3f]  ;;  %v3892_v36 = vpack.i.bf16 %v1354_v33, %v1362_v34 }
 0x72f   :  { %v1372_v37 = vrot.slane %v1363_v35, 2  ;;  %v1361_v46 = vld [vmem:[#allocation5 + $0x8] sm:$0x3f] }
 0x730   :  { %3893 = vrot.lane.b32.xlu1 %v3892_v36, %s4066_s13 }
 0x731   :  { %v1376_v39 = vsel %vm719_vm14, %v1355_v38, %v1372_v37 }
 0x732   :  { %v1378_v40 = vpack.c.bf16 %v1372_v37, %v1376_v39 }
 0x734   :  { %3281 = vmatmul.msk.bf16.vlgmr.msra.gmra.mxu3 %vm100_vm0, %v1378_v40 }
 0x735   :  { %1982 = vmatpush.bf16.msra.mxu3 %v3762_v12 }
 0x739   :  { %1983 = vmatpush.bf16.msra.mxu3 %v3761_v13 }
 0x73d   :  { %1984 = vmatpush.bf16.msra.mxu3 %v3760_v17 }
 0x741   :  { %1985 = vmatpush.bf16.msra.mxu3 %v3759_v18 }
 0x7a2   :  { %v3894_v43 = vpop.permute.xlu1 %3893 }
 0x7a3   :  { %v3896_v44 = vunpack.i.h.bf16 %v3894_v43  ;;  %v3895_v45 = vunpack.i.l.bf16 %v3894_v43 }
 0x7a5   :  { %v1368_v47 = vsel %vm100_vm0, %v1361_v46, %v3895_v45  ;;  %v1360_v50 = vsel %vm100_vm0, %v1353_v48, %v3896_v44 }
 0x7a6   :  { %v1371_v49 = vrot.slane %v1368_v47, 2 }
 0x7a8   :  { %v1375_v51 = vsel %vm719_vm14, %v1360_v50, %v1371_v49  ;;  %vm109_vm14 = vcmask 648192  }
 0x7a9   :  { %v1377_v52 = vpack.c.bf16 %v1371_v49, %v1375_v51  ;;  %114 = vst.msk [vmem:[#allocation8 + $0x8] sm:$0x3] %vm109_vm14, %v4071_v0 }
 0x7aa   :  { %110 = vst.msk [vmem:[#allocation6 + $0x8] sm:$0x3] %vm109_vm14, %v4071_v0 }
 0x7ab   :  { %1464 = vmatmul.bf16.vlgmr.msra.gmra.mxu2 %v1377_v52  ;;  %112 = vst.msk [vmem:[#allocation7 + $0x8] sm:$0x3] %vm109_vm14, %v4071_v0 }
 0x7b7   :  { %v1479_v56 = vpop.f32.mrf.mxu3 }
 0x7bf   :  { %v1481_v2 = vpop.f32.mrf.mxu3 }
 0x82e   :  { %v1465_v57 = vpop.f32.mrf.mxu2 }
 0x82f   :  { %v1466_v58 = vadd.f32 %v1465_v57, %v1380_v55  ;;  %v3736_v57 = vld [vmem:[#allocation11 + $0x20] sm:$0xff] }
 0x831   :  { %v1480_v59 = vadd.f32 %v1479_v56, %v1466_v58  ;;  %v3737_v56 = vld [vmem:[#allocation11 + $0x28] sm:$0xff]  ;;  %v3735_v58 = vld [vmem:[#allocation11 + $0x18] sm:$0xff] }
 0x833   :  { %v1497_v61 = vadd.f32 %v1492_v60, %v1480_v59  ;;  %v3734_v59 = vld [vmem:[#allocation11 + $0x10] sm:$0xff]  ;;  %v3733_v60 = vld [vmem:[#allocation11 + $0x8] sm:$0xff] }
 0x835   :  { %v1499_v62 = vmax.f32 %v1497_v61, 0.0  ;;  %v3732_v61 = vld [vmem:[#allocation11] sm:$0xff] }
 0x836   :  { %v1467_v63 = vpop.f32.mrf.mxu2 }
 0x837   :  { %v1468_v1 = vadd.f32 %v1467_v63, %v1380_v55  ;;  %1502 = vrot.lane.b32.xlu1 %v1499_v62, %s4082_s19  ;;  %v3738_v55 = vld [vmem:[#allocation11 + $0x30] sm:$0xff] }
 0x838   :  { %1701 = vmatpush.bf16.msrb.mxu1 %v3738_v55  ;;  %v3746_v55 = vld [vmem:[#allocation14 + $0x10] sm:$0xff] }
 0x839   :  { %v1482_v3 = vadd.f32 %v1481_v2, %v1468_v1 }
 0x83b   :  { %v1498_v5 = vadd.f32 %v1494_v4, %v1482_v3 }
 0x83c   :  { %1702 = vmatpush.bf16.msrb.mxu1 %v3737_v56  ;;  %v3745_v56 = vld [vmem:[#allocation14 + $0x8] sm:$0xff] }
 0x83d   :  { %v1500_v6 = vmax.f32 %v1498_v5, 0.0  ;;  %v1534_v5 = vld [vmem:[#allocation3 + $0x8] sm:$0x1] }
 0x83f   :  { %1507 = vrot.lane.b32.xlu2 %v1500_v6, %s4082_s19 }
 0x840   :  { %1703 = vmatpush.bf16.msrb.mxu1 %v3736_v57  ;;  %v3753_v57 = vld [vmem:[#allocation14 + $0x48] sm:$0xff] }
 0x844   :  { %1704 = vmatpush.bf16.msrb.mxu1 %v3735_v58  ;;  %v3744_v58 = vld [vmem:[#allocation14] sm:$0xff] }
 0x848   :  { %1705 = vmatpush.bf16.msrb.mxu1 %v3734_v59  ;;  %v3752_v59 = vld [vmem:[#allocation14 + $0x40] sm:$0xff] }
 0x84c   :  { %1706 = vmatpush.bf16.msrb.mxu1 %v3733_v60 }
 0x850   :  { %1707 = vmatpush.bf16.msrb.mxu1 %v3732_v61 }
 0x899   :  { %v1508_v11 = vpop.permute.xlu2 %1507 }
 0x89a   :  { %1511 = vst.msk [vmem:[#allocation3 + $0xb] sm:$0xf] %vm801_vm8, %v1508_v11 }
 0x8a1   :  { %v1542_v14 = vld [vmem:[#allocation3 + $0xb] sm:$0x1]  ;;  %v1549_v15 = vld [vmem:[#allocation3 + $0xd] sm:$0x1]  ;;  %v1543_v29 = vld [vmem:[#allocation3 + $0xc] sm:$0x1] }
 0x8a2   :  { %v3907_v16 = vpack.i.bf16 %v1549_v15, %v1542_v14  ;;  %v1550_v33 = vld [vmem:[#allocation3 + $0xe] sm:$0x1]  ;;  %v1577_v36 = vrot.slane %v1543_v29, 4  ;;  %v1930_v49 = vrot.slane %v1542_v14, 4  ;;  %v1932_v51 = vrot.slane %v1549_v15, 3 }
 0x8a3   :  { %v1583_v39 = vrot.slane %v1550_v33, 3 }
 0x8a4   :  { %3908 = vrot.lane.b32.xlu2 %v3907_v16, %s4066_s13 }
 0x8a9   :  { %v1503_v19 = vpop.permute.xlu1 %1502 }
 0x8aa   :  { %1505 = vst.msk [vmem:[#allocation3 + $0x1] sm:$0x3f] %vm793_vm6, %v1503_v19 }
 0x8ab   :  { %1510 = vst.msk [vmem:[#allocation3 + $0x3] sm:$0xc0] %vm799_vm7, %v1503_v19 }
 0x8b1   :  { %v1520_v20 = vld [vmem:[#allocation3 + $0x3] sm:$0x1]  ;;  %v1527_v21 = vld [vmem:[#allocation3 + $0x5] sm:$0x1]  ;;  %v1513_v22 = vld [vmem:[#allocation3 + $0x1] sm:$0x1] }
 0x8b2   :  { %v3897_v23 = vpack.i.bf16 %v1527_v21, %v1520_v20  ;;  %v1535_v24 = vld [vmem:[#allocation3 + $0x9] sm:$0x1]  ;;  %v1521_v26 = vld [vmem:[#allocation3 + $0x4] sm:$0x1]  ;;  %v1528_v27 = vld [vmem:[#allocation3 + $0x6] sm:$0x1] }
 0x8b3   :  { %v3902_v25 = vpack.i.bf16 %v1535_v24, %v1513_v22  ;;  %v1536_v28 = vld [vmem:[#allocation3 + $0xa] sm:$0x1]  ;;  %v1559_v30 = vrot.slane %v1521_v26, 7  ;;  %v1565_v31 = vrot.slane %v1528_v27, 6  ;;  %v1514_v32 = vld [vmem:[#allocation3 + $0x2] sm:$0x1] }
 0x8b4   :  { %3898 = vrot.lane.b32.xlu0 %v3897_v23, %s4066_s13  ;;  %v1571_v34 = vrot.slane %v1536_v28, 5  ;;  %v1924_v38 = vrot.slane %v1520_v20, 7  ;;  %v1926_v43 = vrot.slane %v1527_v21, 6  ;;  %v1928_v47 = vrot.slane %v1535_v24, 5 }
 0x8b5   :  { %3903 = vrot.lane.b32.xlu1 %v3902_v25, %s4066_s13  ;;  %v1587_v35 = vsel %vm710_vm10, %v1514_v32, %v1559_v30 }
 0x8b6   :  { %v1589_v37 = vsel %vm712_vm11, %v1587_v35, %v1565_v31  ;;  %v1934_v45 = vsel %vm710_vm10, %v1513_v22, %v1924_v38  ;;  %v1620_v31 = vld [vmem:[#allocation11 + $0x60] sm:$0x1] }
 0x8b7   :  { %v1591_v40 = vsel %vm714_vm12, %v1589_v37, %v1571_v34  ;;  %v1935_v46 = vsel %vm712_vm11, %v1934_v45, %v1926_v43  ;;  %v3751_v45 = vld [vmem:[#allocation14 + $0x38] sm:$0xff] }
 0x8b8   :  { %v1593_v41 = vsel %vm302_vm3, %v1591_v40, %v1577_v36  ;;  %v1936_v48 = vsel %vm714_vm12, %v1935_v46, %v1928_v47  ;;  %v3758_v46 = vld [vmem:[#allocation14 + $0x70] sm:$0xff]  ;;  %1898 = vmatpush.bf16.msrb.mxu0 %v3751_v45 }
 0x8b9   :  { %v1595_v42 = vsel %vm717_vm13, %v1593_v41, %v1583_v39  ;;  %v1937_v50 = vsel %vm302_vm3, %v1936_v48, %v1930_v49  ;;  %v3750_v47 = vld [vmem:[#allocation14 + $0x30] sm:$0xff]  ;;  %1912 = vmatpush.bf16.msrb.mxu2 %v3758_v46  ;;  %v3757_v48 = vld [vmem:[#allocation14 + $0x68] sm:$0xff] }
 0x8ba   :  { %v1622_v44 = vpack.c.bf16 %v1595_v42, %v1595_v42  ;;  %v1938_v52 = vsel %vm717_vm13, %v1937_v50, %v1932_v51  ;;  %v3749_v49 = vld [vmem:[#allocation14 + $0x28] sm:$0xff]  ;;  %v3756_v50 = vld [vmem:[#allocation14 + $0x60] sm:$0xff] }
 0x8bb   :  { %v1948_v53 = vpack.c.bf16 %v1938_v52, %v1938_v52  ;;  %v3748_v51 = vld [vmem:[#allocation14 + $0x20] sm:$0xff]  ;;  %v3755_v52 = vld [vmem:[#allocation14 + $0x58] sm:$0xff]  ;;  %v3773_v45 = vld [vmem:[#allocation14 + $0xcc] sm:$0xff] }
 0x8bc   :  { %3330 = vmatmul.msk.bf16.vlgmr.msrb.gmra.mxu3 %vm100_vm0, %v1622_v44  ;;  %1899 = vmatpush.bf16.msrb.mxu0 %v3750_v47  ;;  %v3765_v46 = vld [vmem:[#allocation14 + $0x8c] sm:$0xff]  ;;  %v3764_v47 = vld [vmem:[#allocation14 + $0x84] sm:$0xff] }
 0x8bd   :  { %1913 = vmatpush.bf16.msrb.mxu2 %v3757_v48  ;;  %v3772_v48 = vld [vmem:[#allocation14 + $0xc4] sm:$0xff] }
 0x8c0   :  { %1900 = vmatpush.bf16.msrb.mxu0 %v3749_v49  ;;  %v3763_v49 = vld [vmem:[#allocation14 + $0x7c] sm:$0xff] }
 0x8c1   :  { %1914 = vmatpush.bf16.msrb.mxu2 %v3756_v50  ;;  %v3771_v50 = vld [vmem:[#allocation14 + $0xbc] sm:$0xff] }
 0x8c4   :  { %1901 = vmatpush.bf16.msrb.mxu0 %v3748_v51 }
 0x8c5   :  { %1915 = vmatpush.bf16.msrb.mxu2 %v3755_v52 }
 0x8c9   :  { %1916 = vmatpush.bf16.msrb.mxu2 %v3754_v54 }
 0x8cc   :  { %3408 = vmatmul.msk.bf16.vlgmr.msra.gmra.mxu3 %vm100_vm0, %v1948_v53  ;;  %v3747_v53 = vld [vmem:[#allocation14 + $0x18] sm:$0xff] }
 0x8cd   :  { %1902 = vmatpush.bf16.msrb.mxu0 %v3747_v53  ;;  %1917 = vmatpush.bf16.msrb.mxu2 %v3753_v57 }
 0x8d1   :  { %1903 = vmatpush.bf16.msrb.mxu0 %v3746_v55  ;;  %1918 = vmatpush.bf16.msrb.mxu2 %v3752_v59 }
 0x8d5   :  { %1904 = vmatpush.bf16.msrb.mxu0 %v3745_v56 }
 0x8d9   :  { %1905 = vmatpush.bf16.msrb.mxu0 %v3744_v58 }
 0x8fe   :  { %v3909_v62 = vpop.permute.xlu2 %3908 }
 0x8ff   :  { %v3910_v63 = vunpack.i.l.bf16 %v3909_v62  ;;  %v3911_v2 = vunpack.i.h.bf16 %v3909_v62 }
 0x901   :  { %v1548_v12 = vsel %vm100_vm0, %v1536_v28, %v3910_v63  ;;  %v1555_v16 = vsel %vm100_vm0, %v1543_v29, %v3911_v2 }
 0x902   :  { %v1576_v20 = vrot.slane %v1548_v12, 4  ;;  %v1582_v22 = vrot.slane %v1555_v16, 3  ;;  %v1947_v16 = vld [vmem:[#allocation13 + $0x20] sm:$0x1] }
 0x926   :  { %v3899_v1 = vpop.permute.xlu0 %3898 }
 0x927   :  { %v3901_v3 = vunpack.i.h.bf16 %v3899_v1  ;;  %v3900_v4 = vunpack.i.l.bf16 %v3899_v1  ;;  %v3904_v6 = vpop.permute.xlu1 %3903 }
 0x928   :  { %v3906_v8 = vunpack.i.h.bf16 %v3904_v6  ;;  %v3905_v9 = vunpack.i.l.bf16 %v3904_v6 }
 0x929   :  { %v1533_v10 = vsel %vm100_vm0, %v1521_v26, %v3901_v3  ;;  %v1526_v11 = vsel %vm100_vm0, %v1514_v32, %v3900_v4  ;;  %v1623_v32 = vunpack.c.l.bf16 %v1620_v31 }
 0x92a   :  { %v1564_v13 = vrot.slane %v1533_v10, 6  ;;  %v1558_v14 = vrot.slane %v1526_v11, 7  ;;  %v1541_v15 = vsel %vm100_vm0, %v1534_v5, %v3906_v8  ;;  %v1519_v17 = vsel %vm100_vm0, %v1512_v7, %v3905_v9 }
 0x92b   :  { %v1570_v18 = vrot.slane %v1541_v15, 5  ;;  %v1624_v33 = vperm.slane %v1623_v32, 0  ;;  %v1799_v15 = vld [vmem:[#allocation14 + $0x78] sm:$0x1] }
 0x92c   :  { %v1586_v19 = vsel %vm710_vm10, %v1519_v17, %v1558_v14  ;;  %v1802_v17 = vunpack.c.l.bf16 %v1799_v15 }
 0x92d   :  { %v1588_v21 = vsel %vm712_vm11, %v1586_v19, %v1564_v13  ;;  %vm1733_vm11 = vcmask 521347  }
 0x92e   :  { %v1590_v23 = vsel %vm714_vm12, %v1588_v21, %v1570_v18  ;;  %v1949_v18 = vunpack.c.l.bf16 %v1947_v16 }
 0x92f   :  { %v1592_v24 = vsel %vm302_vm3, %v1590_v23, %v1576_v20  ;;  %vm1731_vm3 = vcmask 518272   ;;  %v1803_v20 = vperm.slane %v1802_v17, 0 }
 0x930   :  { %v1594_v25 = vsel %vm717_vm13, %v1592_v24, %v1582_v22  ;;  %vm1894_vm13 = vcmask 916480   ;;  %v1950_v21 = vperm.slane %v1949_v18, 0 }
 0x931   :  { %v1621_v26 = vpack.c.bf16 %v1594_v25, %v1594_v25 }
 0x933   :  { %1708 = vmatmul.bf16.vlgmr.msrb.gmra.mxu1 %v1621_v26 }
 0x93f   :  { %v1722_v27 = vpop.f32.mrf.mxu3 }
 0x947   :  { %v1724_v28 = vpop.f32.mrf.mxu3 }
 0x94f   :  { %v4510_v29 = vpop.f32.mrf.mxu3 }
 0x950   :  { %v1988_v24 = vadd.f32 %v4510_v29, %v1950_v21  ;;  %v3770_v29 = vld [vmem:[#allocation14 + $0xb4] sm:$0xff] }
 0x951   :  { %2194 = vmatpush.bf16.msra.mxu1 %v3770_v29  ;;  %v3780_v29 = vld [vmem:[#allocation14 + $0x108] sm:$0xff] }
 0x957   :  { %v1989_v30 = vpop.f32.mrf.mxu3 }
 0x9b0   :  { %v1709_v34 = vpop.f32.mrf.mxu1 }
 0x9b1   :  { %v1710_v35 = vadd.f32 %v1709_v34, %v1624_v33 }
 0x9b3   :  { %v1723_v36 = vadd.f32 %v1722_v27, %v1710_v35 }
 0x9b5   :  { %v1726_v37 = vmax.f32 %v1723_v36, 0.0 }
 0x9b7   :  { %1728 = vrot.lane.b32.xlu0 %v1726_v37, %s4077_s14 }
 0x9b8   :  { %v1711_v38 = vpop.f32.mrf.mxu1 }
 0x9b9   :  { %v3777_v38 = vld [vmem:[#allocation14 + $0xec] sm:$0xff] }
 0x9ba   :  { %2208 = vmatpush.bf16.msrb.mxu3 %v3777_v38  ;;  %v3779_v38 = vld [vmem:[#allocation14 + $0x100] sm:$0xff] }
 0xa29   :  { %v1729_v39 = vpop.permute.xlu0 %1728 }
 0xa2a   :  { %1732 = vst.msk [vmem:[#allocation8 + $0x1] sm:$0x7] %vm1731_vm3, %v1729_v39 }
 0xa2b   :  { %1734 = vst.msk [vmem:[#allocation8 + $0x3] sm:$0x38] %vm1733_vm11, %v1729_v39  ;;  %v3769_v39 = vld [vmem:[#allocation14 + $0xac] sm:$0xff] }
 0xa2c   :  { %2195 = vmatpush.bf16.msra.mxu1 %v3769_v39  ;;  %v3787_v39 = vld [vmem:[#allocation14 + $0x140] sm:$0xff] }
 0xa31   :  { %v1737_v40 = vld [vmem:[#allocation8 + $0x2] sm:$0x7] }
 0xa32   :  { %v1736_v41 = vld [vmem:[#allocation8 + $0x1] sm:$0x7]  ;;  %v1750_v0 = vld [vmem:[#allocation8 + $0x7] sm:$0x7] }
 0xa33   :  { %v1749_v42 = vld [vmem:[#allocation8 + $0x6] sm:$0x7]  ;;  %v3917_v43 = vpack.i.bf16 %v1737_v40, %v1750_v0  ;;  %v1735_v6 = vld [vmem:[#allocation8] sm:$0x7]  ;;  %v3775_v0 = vld [vmem:[#allocation14 + $0xdc] sm:$0xff] }
 0xa34   :  { %v3912_v44 = vpack.i.bf16 %v1736_v41, %v1749_v42  ;;  %v1748_v2 = vld [vmem:[#allocation8 + $0x5] sm:$0x7]  ;;  %v3776_v40 = vld [vmem:[#allocation14 + $0xe4] sm:$0xff]  ;;  %v3767_v42 = vld [vmem:[#allocation14 + $0x9c] sm:$0xff] }
 0xa35   :  { %3918 = vrot.lane.b32.xlu2 %v3917_v43, %s4074_s10  ;;  %v3768_v41 = vld [vmem:[#allocation14 + $0xa4] sm:$0xff]  ;;  %2209 = vmatpush.bf16.msrb.mxu3 %v3776_v40  ;;  %v3774_v43 = vld [vmem:[#allocation14 + $0xd4] sm:$0xff] }
 0xa36   :  { %3913 = vrot.lane.b32.xlu1 %v3912_v44, %s4081_s18  ;;  %2196 = vmatpush.bf16.msra.mxu1 %v3768_v41  ;;  %v3766_v44 = vld [vmem:[#allocation14 + $0x94] sm:$0xff] }
 0xa37   :  { %v3778_v40 = vld [vmem:[#allocation14 + $0xf8] sm:$0xff] }
 0xa38   :  { %v3786_v41 = vld [vmem:[#allocation14 + $0x138] sm:$0xff] }
 0xa39   :  { %2210 = vmatpush.bf16.msrb.mxu3 %v3775_v0 }
 0xa3a   :  { %2197 = vmatpush.bf16.msra.mxu1 %v3767_v42 }
 0xa3d   :  { %2211 = vmatpush.bf16.msrb.mxu3 %v3774_v43 }
 0xa3e   :  { %2198 = vmatpush.bf16.msra.mxu1 %v3766_v44 }
 0xa41   :  { %2212 = vmatpush.bf16.msrb.mxu3 %v3773_v45 }
 0xa42   :  { %2199 = vmatpush.bf16.msra.mxu1 %v3765_v46 }
 0xa45   :  { %2213 = vmatpush.bf16.msrb.mxu3 %v3772_v48 }
 0xa46   :  { %2200 = vmatpush.bf16.msra.mxu1 %v3764_v47 }
 0xa49   :  { %2214 = vmatpush.bf16.msrb.mxu3 %v3771_v50 }
 0xa4a   :  { %2201 = vmatpush.bf16.msra.mxu1 %v3763_v49 }
 0xa8f   :  { %v3919_v60 = vpop.permute.xlu2 %3918 }
 0xa90   :  { %v3920_v62 = vunpack.i.l.bf16 %v3919_v60  ;;  %v3921_v3 = vunpack.i.h.bf16 %v3919_v60 }
 0xaa8   :  { %v3914_v61 = vpop.permute.xlu1 %3913 }
 0xaa9   :  { %v3916_v63 = vunpack.i.h.bf16 %v3914_v61  ;;  %v3915_v1 = vunpack.i.l.bf16 %v3914_v61 }
 0xaab   :  { %v1759_v4 = vsel %vm107_vm9, %v1748_v2, %v3915_v1  ;;  %v1760_v5 = vsel %vm211_vm4, %v3915_v1, %v3920_v62  ;;  %v1747_v9 = vsel %vm211_vm4, %v3916_v63, %v3921_v3  ;;  %v1746_v10 = vsel %vm107_vm9, %v1735_v6, %v3916_v63  ;;  %v2030_v6 = vld [vmem:[#allocation14 + $0xf4] sm:$0x1] }
 0xaac   :  { %v1763_v7 = vrot.slane %v1759_v4, 5  ;;  %v1764_v8 = vrot.slane %v1760_v5, 5 }
 0xaae   :  { %v1768_v11 = vsel %vm714_vm12, %v1747_v9, %v1764_v8  ;;  %v1767_v12 = vsel %vm714_vm12, %v1746_v10, %v1763_v7  ;;  %v2099_v7 = vunpack.c.l.bf16 %v2030_v6 }
 0xaaf   :  { %v1801_v13 = vpack.c.bf16 %v1768_v11, %v1768_v11  ;;  %v1800_v14 = vpack.c.bf16 %v1767_v12, %v1767_v12 }
 0xab0   :  { %v2100_v9 = vperm.slane %v2099_v7, 0 }
 0xab1   :  { %1906 = vmatmul.bf16.vlgmr.msrb.gmra.mxu0 %v1800_v14  ;;  %3391 = vmatmul.msk.bf16.vlgmr.msrb.gmra.mxu2 %vm1894_vm13, %v1801_v13 }
 0xb2e   :  { %v1907_v19 = vpop.f32.mrf.mxu0 }
 0xb2f   :  { %v1908_v22 = vadd.f32 %v1907_v19, %v1803_v20 }
 0xb34   :  { %v1920_v23 = vpop.f32.mrf.mxu2 }
 0xb35   :  { %v1921_v25 = vadd.f32 %v1920_v23, %v1908_v22 }
 0xb36   :  { %v1909_v26 = vpop.f32.mrf.mxu0 }
 0xb37   :  { %v1991_v27 = vadd.f32 %v1988_v24, %v1921_v25 }
 0xb39   :  { %v1992_v28 = vmax.f32 %v1991_v27, 0.0  ;;  %v3785_v27 = vld [vmem:[#allocation14 + $0x130] sm:$0xff] }
 0xb3a   :  { %2358 = vmatpush.bf16.msra.mxu2 %v3785_v27  ;;  %v3803_v27 = vld [vmem:[#allocation14 + $0x1c4] sm:$0xff] }
 0xb3b   :  { %1994 = vrot.lane.b32.xlu0 %v1992_v28, %s4077_s14  ;;  %v3792_v28 = vld [vmem:[#allocation14 + $0x168] sm:$0xff] }
 0xb3c   :  { %v1922_v30 = vpop.f32.mrf.mxu2  ;;  %2372 = vmatpush.bf16.msra.mxu0 %v3792_v28  ;;  %v3802_v28 = vld [vmem:[#allocation14 + $0x1bc] sm:$0xff] }
 0xb3d   :  { %v3784_v30 = vld [vmem:[#allocation14 + $0x128] sm:$0xff] }
 0xb3e   :  { %2359 = vmatpush.bf16.msra.mxu2 %v3784_v30  ;;  %v3801_v30 = vld [vmem:[#allocation14 + $0x1b4] sm:$0xff] }
 0xbad   :  { %v1995_v31 = vpop.permute.xlu0 %1994 }
 0xbae   :  { %1997 = vst.msk [vmem:[#allocation6 + $0x1] sm:$0x7] %vm1731_vm3, %v1995_v31 }
 0xbaf   :  { %1998 = vst.msk [vmem:[#allocation6 + $0x3] sm:$0x38] %vm1733_vm11, %v1995_v31  ;;  %v3791_v31 = vld [vmem:[#allocation14 + $0x160] sm:$0xff] }
 0xbb0   :  { %2373 = vmatpush.bf16.msra.mxu0 %v3791_v31 }
 0xbb5   :  { %v2065_v32 = vld [vmem:[#allocation6 + $0x2] sm:$0x7] }
 0xbb6   :  { %v2064_v33 = vld [vmem:[#allocation6 + $0x1] sm:$0x7]  ;;  %v2078_v34 = vld [vmem:[#allocation6 + $0x7] sm:$0x7] }
 0xbb7   :  { %v2077_v35 = vld [vmem:[#allocation6 + $0x6] sm:$0x7]  ;;  %v3927_v36 = vpack.i.bf16 %v2065_v32, %v2078_v34  ;;  %v2063_v60 = vld [vmem:[#allocation6] sm:$0x7]  ;;  %v3783_v32 = vld [vmem:[#allocation14 + $0x120] sm:$0xff] }
 0xbb8   :  { %v3922_v37 = vpack.i.bf16 %v2064_v33, %v2077_v35  ;;  %v2076_v56 = vld [vmem:[#allocation6 + $0x5] sm:$0x7]  ;;  %v2384_v18 = vld [vmem:[#allocation6 + $0x1] sm:$0x7]  ;;  %v3790_v33 = vld [vmem:[#allocation14 + $0x158] sm:$0xff]  ;;  %2360 = vmatpush.bf16.msra.mxu2 %v3783_v32 }
 0xbb9   :  { %3928 = vrot.lane.b32.xlu2 %v3927_v36, %s4074_s10  ;;  %v2385_v15 = vld [vmem:[#allocation6 + $0x6] sm:$0x7]  ;;  %v3782_v34 = vld [vmem:[#allocation14 + $0x118] sm:$0xff]  ;;  %2374 = vmatpush.bf16.msra.mxu0 %v3790_v33 }
 0xbba   :  { %3923 = vrot.lane.b32.xlu1 %v3922_v37, %s4081_s18  ;;  %v2387_v17 = vrot.slane %v2385_v15, 5  ;;  %v3789_v35 = vld [vmem:[#allocation14 + $0x150] sm:$0xff]  ;;  %v3788_v37 = vld [vmem:[#allocation14 + $0x148] sm:$0xff] }
 0xbbb   :  { %v3781_v36 = vld [vmem:[#allocation14 + $0x110] sm:$0xff] }
 0xbbc   :  { %v2389_v19 = vsel %vm714_vm12, %v2384_v18, %v2387_v17  ;;  %2361 = vmatpush.bf16.msra.mxu2 %v3782_v34 }
 0xbbd   :  { %2375 = vmatpush.bf16.msra.mxu0 %v3789_v35 }
 0xbc0   :  { %2362 = vmatpush.bf16.msra.mxu2 %v3781_v36 }
 0xbc1   :  { %2376 = vmatpush.bf16.msra.mxu0 %v3788_v37 }
 0xbc4   :  { %2363 = vmatpush.bf16.msra.mxu2 %v3780_v29 }
 0xbc5   :  { %2377 = vmatpush.bf16.msra.mxu0 %v3787_v39 }
 0xbc8   :  { %2364 = vmatpush.bf16.msra.mxu2 %v3779_v38 }
 0xbc9   :  { %2378 = vmatpush.bf16.msra.mxu0 %v3786_v41 }
 0xbcc   :  { %2365 = vmatpush.bf16.msra.mxu2 %v3778_v40 }
 0xc13   :  { %v3929_v51 = vpop.permute.xlu2 %3928 }
 0xc14   :  { %v3930_v53 = vunpack.i.l.bf16 %v3929_v51  ;;  %v3931_v57 = vunpack.i.h.bf16 %v3929_v51 }
 0xc2c   :  { %v3924_v52 = vpop.permute.xlu1 %3923 }
 0xc2d   :  { %v3926_v54 = vunpack.i.h.bf16 %v3924_v52  ;;  %v3925_v55 = vunpack.i.l.bf16 %v3924_v52 }
 0xc2f   :  { %v2087_v58 = vsel %vm107_vm9, %v2076_v56, %v3925_v55  ;;  %v2088_v59 = vsel %vm211_vm4, %v3925_v55, %v3930_v53  ;;  %v2075_v63 = vsel %vm211_vm4, %v3926_v54, %v3931_v57  ;;  %v2074_v1 = vsel %vm107_vm9, %v2063_v60, %v3926_v54 }
 0xc30   :  { %v2091_v61 = vrot.slane %v2087_v58, 5  ;;  %v2092_v62 = vrot.slane %v2088_v59, 5  ;;  %v2062_v59 = vld [vmem:[#allocation14 + $0x170] sm:$0x1] }
 0xc31   :  { %v2263_v60 = vunpack.c.l.bf16 %v2062_v59 }
 0xc32   :  { %v2096_v2 = vsel %vm714_vm12, %v2075_v63, %v2092_v62  ;;  %v2095_v3 = vsel %vm714_vm12, %v2074_v1, %v2091_v61 }
 0xc33   :  { %v2098_v4 = vpack.c.bf16 %v2096_v2, %v2096_v2  ;;  %v2097_v5 = vpack.c.bf16 %v2095_v3, %v2095_v3  ;;  %v2264_v62 = vperm.slane %v2263_v60, 0 }
 0xc35   :  { %2202 = vmatmul.bf16.vlgmr.msra.gmra.mxu1 %v2097_v5  ;;  %3469 = vmatmul.msk.bf16.vlgmr.msrb.gmra.mxu3 %vm1894_vm13, %v2098_v4 }
 0xcb2   :  { %v2203_v8 = vpop.f32.mrf.mxu1 }
 0xcb3   :  { %v2204_v10 = vadd.f32 %v2203_v8, %v2100_v9  ;;  %v3800_v8 = vld [vmem:[#allocation14 + $0x1ac] sm:$0xff]  ;;  %v3799_v9 = vld [vmem:[#allocation14 + $0x1a4] sm:$0xff] }
 0xcb4   :  { %2597 = vmatpush.bf16.msra.mxu3 %v3800_v8 }
 0xcb8   :  { %v2216_v11 = vpop.f32.mrf.mxu3  ;;  %2598 = vmatpush.bf16.msra.mxu3 %v3799_v9 }
 0xcb9   :  { %v2217_v12 = vadd.f32 %v2216_v11, %v2204_v10  ;;  %v3798_v10 = vld [vmem:[#allocation14 + $0x19c] sm:$0xff]  ;;  %v3797_v11 = vld [vmem:[#allocation14 + $0x194] sm:$0xff] }
 0xcba   :  { %v2205_v13 = vpop.f32.mrf.mxu1 }
 0xcbb   :  { %v2220_v14 = vmax.f32 %v2217_v12, 0.0  ;;  %v3796_v12 = vld [vmem:[#allocation14 + $0x18c] sm:$0xff]  ;;  %v3795_v13 = vld [vmem:[#allocation14 + $0x184] sm:$0xff] }
 0xcbc   :  { %2599 = vmatpush.bf16.msra.mxu3 %v3798_v10 }
 0xcbd   :  { %2222 = vrot.lane.b32.xlu0 %v2220_v14, %s4077_s14 }
 0xcc0   :  { %v2218_v16 = vpop.f32.mrf.mxu3  ;;  %2600 = vmatpush.bf16.msra.mxu3 %v3797_v11  ;;  %v3809_v11 = vld [vmem:[#allocation14 + $0x1f8] sm:$0xff] }
 0xcc4   :  { %2601 = vmatpush.bf16.msra.mxu3 %v3796_v12  ;;  %v3808_v12 = vld [vmem:[#allocation14 + $0x1f0] sm:$0xff] }
 0xcc5   :  { %2391 = vrot.lane.b32.xlu0 %v2389_v19, %s4078_s15 }
 0xcc8   :  { %2602 = vmatpush.bf16.msra.mxu3 %v3795_v13  ;;  %v3822_v13 = vld [vmem:[#allocation14 + $0x260] sm:$0xff] }
 0xcc9   :  { %2775 = vmatpush.bf16.msrb.mxu2 %v3822_v13 }
 0xd2f   :  { %v2223_v20 = vpop.permute.xlu0 %2222 }
 0xd30   :  { %2225 = vst.msk [vmem:[#allocation8 + $0x1] sm:$0x7] %vm1731_vm3, %v2223_v20 }
 0xd31   :  { %2226 = vst.msk [vmem:[#allocation8 + $0x3] sm:$0x38] %vm1733_vm11, %v2223_v20 }
 0xd37   :  { %v2229_v21 = vld [vmem:[#allocation8 + $0x2] sm:$0x7]  ;;  %v2392_v4 = vpop.permute.xlu0 %2391 }
 0xd38   :  { %v2228_v22 = vld [vmem:[#allocation8 + $0x1] sm:$0x7]  ;;  %v2242_v23 = vld [vmem:[#allocation8 + $0x7] sm:$0x7] }
 0xd39   :  { %v2241_v24 = vld [vmem:[#allocation8 + $0x6] sm:$0x7]  ;;  %v3937_v25 = vpack.i.bf16 %v2229_v21, %v2242_v23  ;;  %v2227_v50 = vld [vmem:[#allocation8] sm:$0x7]  ;;  %v3794_v21 = vld [vmem:[#allocation14 + $0x17c] sm:$0xff] }
 0xd3a   :  { %v3932_v26 = vpack.i.bf16 %v2228_v22, %v2241_v24  ;;  %v2240_v46 = vld [vmem:[#allocation8 + $0x5] sm:$0x7]  ;;  %2603 = vmatpush.bf16.msra.mxu3 %v3794_v21  ;;  %v3793_v22 = vld [vmem:[#allocation14 + $0x174] sm:$0xff]  ;;  %v3807_v23 = vld [vmem:[#allocation14 + $0x1e4] sm:$0xff] }
 0xd3b   :  { %3938 = vrot.lane.b32.xlu2 %v3937_v25, %s4074_s10  ;;  %2611 = vmatpush.bf16.msrb.mxu1 %v3807_v23  ;;  %v3806_v24 = vld [vmem:[#allocation14 + $0x1dc] sm:$0xff]  ;;  %v3805_v25 = vld [vmem:[#allocation14 + $0x1d4] sm:$0xff] }
 0xd3c   :  { %3933 = vrot.lane.b32.xlu1 %v3932_v26, %s4081_s18  ;;  %v3804_v26 = vld [vmem:[#allocation14 + $0x1cc] sm:$0xff] }
 0xd3e   :  { %2604 = vmatpush.bf16.msra.mxu3 %v3793_v22 }
 0xd3f   :  { %2612 = vmatpush.bf16.msrb.mxu1 %v3806_v24 }
 0xd43   :  { %2613 = vmatpush.bf16.msrb.mxu1 %v3805_v25 }
 0xd47   :  { %2614 = vmatpush.bf16.msrb.mxu1 %v3804_v26 }
 0xd4b   :  { %2615 = vmatpush.bf16.msrb.mxu1 %v3803_v27 }
 0xd4f   :  { %2616 = vmatpush.bf16.msrb.mxu1 %v3802_v28 }
 0xd53   :  { %2617 = vmatpush.bf16.msrb.mxu1 %v3801_v30 }
 0xd95   :  { %v3939_v0 = vpop.permute.xlu2 %3938 }
 0xd96   :  { %v3940_v43 = vunpack.i.l.bf16 %v3939_v0  ;;  %v3941_v47 = vunpack.i.h.bf16 %v3939_v0 }
 0xdae   :  { %v3934_v42 = vpop.permute.xlu1 %3933 }
 0xdaf   :  { %v3936_v44 = vunpack.i.h.bf16 %v3934_v42  ;;  %v3935_v45 = vunpack.i.l.bf16 %v3934_v42 }
 0xdb1   :  { %v2251_v48 = vsel %vm107_vm9, %v2240_v46, %v3935_v45  ;;  %v2252_v49 = vsel %vm211_vm4, %v3935_v45, %v3940_v43  ;;  %v2239_v53 = vsel %vm211_vm4, %v3936_v44, %v3941_v47  ;;  %v2238_v54 = vsel %vm107_vm9, %v2227_v50, %v3936_v44 }
 0xdb2   :  { %v2255_v51 = vrot.slane %v2251_v48, 5  ;;  %v2256_v52 = vrot.slane %v2252_v49, 5  ;;  %v2433_v48 = vld [vmem:[#allocation14 + $0x1ec] sm:$0x1] }
 0xdb3   :  { %v2502_v50 = vunpack.c.l.bf16 %v2433_v48 }
 0xdb4   :  { %v2260_v55 = vsel %vm714_vm12, %v2239_v53, %v2256_v52  ;;  %v2259_v56 = vsel %vm714_vm12, %v2238_v54, %v2255_v51 }
 0xdb5   :  { %v2262_v57 = vpack.c.bf16 %v2260_v55, %v2260_v55  ;;  %v2261_v58 = vpack.c.bf16 %v2259_v56, %v2259_v56  ;;  %v2503_v51 = vperm.slane %v2502_v50, 0 }
 0xdb7   :  { %2366 = vmatmul.bf16.vlgmr.msra.gmra.mxu2 %v2261_v58  ;;  %3530 = vmatmul.msk.bf16.vlgmr.msra.gmra.mxu0 %vm1894_vm13, %v2262_v57 }
 0xe34   :  { %v2380_v61 = vpop.f32.mrf.mxu0 }
 0xe3a   :  { %v2367_v63 = vpop.f32.mrf.mxu2 }
 0xe3b   :  { %v2368_v1 = vadd.f32 %v2367_v63, %v2264_v62  ;;  %v3814_v62 = vld [vmem:[#allocation14 + $0x220] sm:$0xff]  ;;  %v3813_v63 = vld [vmem:[#allocation14 + $0x218] sm:$0xff] }
 0xe3c   :  { %v2382_v2 = vpop.f32.mrf.mxu0 }
 0xe3d   :  { %v2381_v3 = vadd.f32 %v2380_v61, %v2368_v1  ;;  %v3815_v61 = vld [vmem:[#allocation14 + $0x228] sm:$0xff]  ;;  %v3812_v1 = vld [vmem:[#allocation14 + $0x210] sm:$0xff] }
 0xe3e   :  { %2761 = vmatpush.bf16.msrb.mxu0 %v3815_v61  ;;  %v3811_v2 = vld [vmem:[#allocation14 + $0x208] sm:$0xff] }
 0xe3f   :  { %v2394_v5 = vadd.f32 %v2392_v4, %v2381_v3  ;;  %v3810_v3 = vld [vmem:[#allocation14 + $0x200] sm:$0xff] }
 0xe41   :  { %v2395_v6 = vmax.f32 %v2394_v5, 0.0 }
 0xe42   :  { %v2369_v7 = vpop.f32.mrf.mxu2  ;;  %2762 = vmatpush.bf16.msrb.mxu0 %v3814_v62 }
 0xe43   :  { %2397 = vrot.lane.b32.xlu1 %v2395_v6, %s4077_s14 }
 0xe46   :  { %2763 = vmatpush.bf16.msrb.mxu0 %v3813_v63 }
 0xe4a   :  { %2764 = vmatpush.bf16.msrb.mxu0 %v3812_v1 }
 0xe4e   :  { %2765 = vmatpush.bf16.msrb.mxu0 %v3811_v2 }
 0xe52   :  { %2766 = vmatpush.bf16.msrb.mxu0 %v3810_v3  ;;  %v3962_v3 = vld [vmem:[%s4615_s7] ss:$0 sm:$0xff] }
 0xe56   :  { %2767 = vmatpush.bf16.msrb.mxu0 %v3809_v11 }
 0xe5a   :  { %2768 = vmatpush.bf16.msrb.mxu0 %v3808_v12 }
 0xeb5   :  { %v2398_v14 = vpop.permute.xlu1 %2397 }
 0xeb6   :  { %2400 = vst.msk [vmem:[#allocation7 + $0x1] sm:$0x7] %vm1731_vm3, %v2398_v14 }
 0xeb7   :  { %2401 = vst.msk [vmem:[#allocation7 + $0x3] sm:$0x38] %vm1733_vm11, %v2398_v14  ;;  %v3821_v14 = vld [vmem:[#allocation14 + $0x258] sm:$0xff] }
 0xeb8   :  { %2776 = vmatpush.bf16.msrb.mxu2 %v3821_v14 }
 0xebd   :  { %v2468_v15 = vld [vmem:[#allocation7 + $0x2] sm:$0x7] }
 0xebe   :  { %v2467_v16 = vld [vmem:[#allocation7 + $0x1] sm:$0x7]  ;;  %v2481_v17 = vld [vmem:[#allocation7 + $0x7] sm:$0x7] }
 0xebf   :  { %v2480_v18 = vld [vmem:[#allocation7 + $0x6] sm:$0x7]  ;;  %v3947_v19 = vpack.i.bf16 %v2468_v15, %v2481_v17  ;;  %v2466_v36 = vld [vmem:[#allocation7] sm:$0x7]  ;;  %v3820_v15 = vld [vmem:[#allocation14 + $0x250] sm:$0xff] }
 0xec0   :  { %v3942_v20 = vpack.i.bf16 %v2467_v16, %v2480_v18  ;;  %v2479_v34 = vld [vmem:[#allocation7 + $0x5] sm:$0x7]  ;;  %v2787_v59 = vld [vmem:[#allocation7 + $0x1] sm:$0x7]  ;;  %2777 = vmatpush.bf16.msrb.mxu2 %v3820_v15  ;;  %v3819_v16 = vld [vmem:[#allocation14 + $0x248] sm:$0xff] }
 0xec1   :  { %3948 = vrot.lane.b32.xlu0 %v3947_v19, %s4074_s10  ;;  %v2788_v56 = vld [vmem:[#allocation7 + $0x6] sm:$0x7]  ;;  %v3816_v19 = vld [vmem:[#allocation14 + $0x230] sm:$0xff] }
 0xec2   :  { %3943 = vrot.lane.b32.xlu2 %v3942_v20, %s4081_s18  ;;  %v2790_v58 = vrot.slane %v2788_v56, 5  ;;  %v3818_v17 = vld [vmem:[#allocation14 + $0x240] sm:$0xff]  ;;  %v3817_v18 = vld [vmem:[#allocation14 + $0x238] sm:$0xff] }
 0xec4   :  { %v2792_v60 = vsel %vm714_vm12, %v2787_v59, %v2790_v58  ;;  %2778 = vmatpush.bf16.msrb.mxu2 %v3819_v16  ;;  %v2858_v16 = vld [vmem:[%s4609_s1] sm:$0x3] }
 0xec8   :  { %2779 = vmatpush.bf16.msrb.mxu2 %v3818_v17 }
 0xecc   :  { %2780 = vmatpush.bf16.msrb.mxu2 %v3817_v18 }
 0xed0   :  { %2781 = vmatpush.bf16.msrb.mxu2 %v3816_v19 }
 0xf1c   :  { %v3944_v31 = vpop.permute.xlu2 %3943 }
 0xf1d   :  { %v3946_v32 = vunpack.i.h.bf16 %v3944_v31  ;;  %v3945_v33 = vunpack.i.l.bf16 %v3944_v31 }
 0xf1f   :  { %v2490_v35 = vsel %vm107_vm9, %v2479_v34, %v3945_v33  ;;  %v2477_v29 = vsel %vm107_vm9, %v2466_v36, %v3946_v32 }
 0xf20   :  { %v2494_v37 = vrot.slane %v2490_v35, 5 }
 0xf22   :  { %v2498_v38 = vsel %vm714_vm12, %v2477_v29, %v2494_v37 }
 0xf23   :  { %v2500_v39 = vpack.c.bf16 %v2498_v38, %v2498_v38 }
 0xf25   :  { %2605 = vmatmul.bf16.vlgmr.msra.gmra.mxu3 %v2500_v39 }
 0xf33   :  { %v3949_v40 = vpop.permute.xlu0 %3948 }
 0xf34   :  { %v3951_v41 = vunpack.i.h.bf16 %v3949_v40  ;;  %v3950_v0 = vunpack.i.l.bf16 %v3949_v40  ;;  %v2465_v40 = vld [vmem:[#allocation14 + $0x268] sm:$0x1] }
 0xf36   :  { %v2491_v42 = vsel %vm211_vm4, %v3945_v33, %v3950_v0  ;;  %v2478_v44 = vsel %vm211_vm4, %v3946_v32, %v3951_v41  ;;  %v2666_v41 = vunpack.c.l.bf16 %v2465_v40 }
 0xf37   :  { %v2495_v43 = vrot.slane %v2491_v42, 5 }
 0xf38   :  { %v2667_v0 = vperm.slane %v2666_v41, 0 }
 0xf39   :  { %v2499_v45 = vsel %vm714_vm12, %v2478_v44, %v2495_v43 }
 0xf3a   :  { %v2501_v46 = vpack.c.bf16 %v2499_v45, %v2499_v45 }
 0xf3c   :  { %3591 = vmatmul.msk.bf16.vlgmr.msrb.gmra.mxu1 %vm1894_vm13, %v2501_v46 }
 0xfa8   :  { %v2606_v47 = vpop.f32.mrf.mxu3 }
 0xfa9   :  { %v2607_v52 = vadd.f32 %v2606_v47, %v2503_v51 }
 0xfb0   :  { %v2608_v49 = vpop.f32.mrf.mxu3 }
 0xfb9   :  { %v2619_v53 = vpop.f32.mrf.mxu1 }
 0xfba   :  { %v2620_v54 = vadd.f32 %v2619_v53, %v2607_v52 }
 0xfbc   :  { %v2623_v55 = vmax.f32 %v2620_v54, 0.0 }
 0xfbe   :  { %2625 = vrot.lane.b32.xlu1 %v2623_v55, %s4077_s14 }
 0xfc1   :  { %v2621_v57 = vpop.f32.mrf.mxu1 }
 0xfc6   :  { %2794 = vrot.lane.b32.xlu1 %v2792_v60, %s4078_s15 }
0x1030   :  { %v2626_v4 = vpop.permute.xlu1 %2625 }
0x1031   :  { %2628 = vst.msk [vmem:[#allocation8 + $0x1] sm:$0x7] %vm1731_vm3, %v2626_v4 }
0x1032   :  { %2629 = vst.msk [vmem:[#allocation8 + $0x3] sm:$0x38] %vm1733_vm11, %v2626_v4 }
0x1038   :  { %v2632_v5 = vld [vmem:[#allocation8 + $0x2] sm:$0x7]  ;;  %v2795_v45 = vpop.permute.xlu1 %2794 }
0x1039   :  { %v2631_v6 = vld [vmem:[#allocation8 + $0x1] sm:$0x7]  ;;  %v2645_v7 = vld [vmem:[#allocation8 + $0x7] sm:$0x7] }
0x103a   :  { %v2644_v8 = vld [vmem:[#allocation8 + $0x6] sm:$0x7]  ;;  %v3957_v9 = vpack.i.bf16 %v2632_v5, %v2645_v7  ;;  %v2630_v25 = vld [vmem:[#allocation8] sm:$0x7] }
0x103b   :  { %v3952_v10 = vpack.i.bf16 %v2631_v6, %v2644_v8  ;;  %v2643_v23 = vld [vmem:[#allocation8 + $0x5] sm:$0x7] }
0x103c   :  { %3958 = vrot.lane.b32.xlu0 %v3957_v9, %s4074_s10 }
0x103d   :  { %3953 = vrot.lane.b32.xlu2 %v3952_v10, %s4081_s18 }
0x1097   :  { %v3954_v20 = vpop.permute.xlu2 %3953 }
0x1098   :  { %v3956_v21 = vunpack.i.h.bf16 %v3954_v20  ;;  %v3955_v22 = vunpack.i.l.bf16 %v3954_v20 }
0x109a   :  { %v2654_v24 = vsel %vm107_vm9, %v2643_v23, %v3955_v22  ;;  %v2641_v27 = vsel %vm107_vm9, %v2630_v25, %v3956_v21 }
0x109b   :  { %v2658_v26 = vrot.slane %v2654_v24, 5 }
0x109d   :  { %v2662_v28 = vsel %vm714_vm12, %v2641_v27, %v2658_v26 }
0x109e   :  { %v2664_v30 = vpack.c.bf16 %v2662_v28, %v2662_v28 }
0x10a0   :  { %2769 = vmatmul.bf16.vlgmr.msrb.gmra.mxu0 %v2664_v30 }
0x10ae   :  { %v3959_v31 = vpop.permute.xlu0 %3958 }
0x10af   :  { %v3961_v32 = vunpack.i.h.bf16 %v3959_v31  ;;  %v3960_v33 = vunpack.i.l.bf16 %v3959_v31 }
0x10b1   :  { %v2655_v34 = vsel %vm211_vm4, %v3955_v22, %v3960_v33  ;;  %v2642_v36 = vsel %vm211_vm4, %v3956_v21, %v3961_v32  ;;  %vm2863_vm4 = vcmask 9216  }
0x10b2   :  { %v2659_v35 = vrot.slane %v2655_v34, 5 }
0x10b4   :  { %v2663_v37 = vsel %vm714_vm12, %v2642_v36, %v2659_v35  ;;  %vm2854_vm12 = vcmask 123904  }
0x10b5   :  { %v2665_v29 = vpack.c.bf16 %v2663_v37, %v2663_v37 }
0x10b7   :  { %3652 = vmatmul.msk.bf16.vlgmr.msrb.gmra.mxu2 %vm1894_vm13, %v2665_v29 }
0x111d   :  { %v2770_v38 = vpop.f32.mrf.mxu0 }
0x111e   :  { %v2771_v42 = vadd.f32 %v2770_v38, %v2667_v0 }
0x1125   :  { %v2772_v39 = vpop.f32.mrf.mxu0 }
0x113a   :  { %v2783_v43 = vpop.f32.mrf.mxu2 }
0x113b   :  { %v2784_v44 = vadd.f32 %v2783_v43, %v2771_v42 }
0x113d   :  { %v2797_v46 = vadd.f32 %v2795_v45, %v2784_v44 }
0x113f   :  { %v2798_v47 = vmax.f32 %v2797_v46, 0.0 }
0x1141   :  { %2800 = vrot.lane.b32.xlu2 %v2798_v47, %s4077_s14 }
0x1142   :  { %v2785_v48 = vpop.f32.mrf.mxu2 }
0x119b   :  { %v2801_v49 = vpop.permute.xlu2 %2800 }
0x119c   :  { %2803 = vst.msk [vmem:[#allocation6 + $0x1] sm:$0x7] %vm1731_vm3, %v2801_v49 }
0x119d   :  { %2804 = vst.msk [vmem:[#allocation6 + $0x3] sm:$0x38] %vm1733_vm11, %v2801_v49 }
0x11a3   :  { %v2805_v50 = vld [vmem:[#allocation6 + $0x1] sm:$0x7] }
0x11a4   :  { %v2822_v51 = vld [vmem:[#allocation6 + $0x6] sm:$0x7]  ;;  %v2806_v52 = vsel %vm1731_vm3, %v2805_v50, -inf }
0x11a5   :  { %v2823_v53 = vsel %vm1731_vm3, %v2822_v51, -inf  ;;  %v2807_v54 = vrot.slane %v2806_v52, 4 }
0x11a6   :  { %v2824_v55 = vrot.slane %v2823_v53, 4 }
0x11a7   :  { %v2808_v56 = vmax.f32 %v2806_v52, %v2807_v54 }
0x11a8   :  { %v2825_v57 = vmax.f32 %v2823_v53, %v2824_v55 }
0x11a9   :  { %v2809_v58 = vrot.slane %v2808_v56, 2 }
0x11aa   :  { %v2826_v59 = vrot.slane %v2825_v57, 2 }
0x11ab   :  { %v2810_v60 = vmax.f32 %v2808_v56, %v2809_v58 }
0x11ac   :  { %v2827_v61 = vmax.f32 %v2825_v57, %v2826_v59 }
0x11ad   :  { %v2811_v62 = vrot.slane %v2810_v60, 1 }
0x11ae   :  { %v2828_v63 = vrot.slane %v2827_v61, 1 }
0x11af   :  { %v2812_v1 = vmax.f32 %v2810_v60, %v2811_v62 }
0x11b0   :  { %v2829_v2 = vmax.f32 %v2827_v61, %v2828_v63 }
0x11b1   :  { %2814 = vrot.lane.b32.xlu1 %v2812_v1, %s4078_s15 }
0x11b2   :  { %2835 = vrot.lane.b32.xlu2 %v2829_v2, %s4080_s17  ;;  %2831 = vrot.lane.b32.xlu0 %v2829_v2, %s4078_s15 }
0x11b9   :  { %2846 = vrot.lane.b32.xlu1 %v3962_v3, %s4077_s14  ;;  %s4083_s14 = smov 110  }
0x11ba   :  { %2818 = vrot.lane.b32.xlu0 %v2812_v1, %s4080_s17  ;;  %2859 = vrot.lane.b32.xlu2 %v3962_v3, %s4078_s15 }
0x120c   :  { %v2836_v7 = vpop.permute.xlu2 %2835 }
0x1214   :  { %v2860_v17 = vpop.permute.xlu2 %2859 }
0x1215   :  { %v2862_v18 = vmul.f32 %v2860_v17, %v2858_v16 }
0x1217   :  { %v2864_v19 = vsel %vm2863_vm4, %v2862_v18, 0.0 }
0x1218   :  { %2865 = vadd.xlane.f32.xlu2 %v2864_v19 }
0x1223   :  { %v2815_v6 = vpop.permute.xlu1 %2814 }
0x1224   :  { %v2832_v4 = vpop.permute.xlu0 %2831  ;;  %v2817_v9 = vmax.f32 %v2812_v1, %v2815_v6 }
0x1225   :  { %v2834_v5 = vmax.f32 %v2829_v2, %v2832_v4 }
0x1227   :  { %v2838_v8 = vmax.f32 %v2834_v5, %v2836_v7 }
0x1229   :  { %v2840_v11 = vrot.slane %v2838_v8, 7 }
0x122b   :  { %v2847_v13 = vpop.permute.xlu1 %2846 }
0x122c   :  { %v2819_v10 = vpop.permute.xlu0 %2818 }
0x122d   :  { %v2821_v12 = vmax.f32 %v2817_v9, %v2819_v10 }
0x122f   :  { %v2842_v14 = vsel %vm710_vm10, %v2821_v12, %v2840_v11  ;;  %vm2874_vm10 = vcmask 1024  }
0x1230   :  { %v2849_v15 = vmul.f32 %v2847_v13, %v2842_v14 }
0x1232   :  { %2851 = vrot.lane.b32.xlu0 %v2849_v15, %s4078_s15 }
0x128b   :  { %v2866_v22 = vpop.xlane.xlu2 %2865 }
0x12a4   :  { %v2852_v20 = vpop.permute.xlu0 %2851 }
0x12a5   :  { %v2855_v21 = vsel %vm2854_vm12, %v2852_v20, 0.0 }
0x12a6   :  { %2856 = vadd.xlane.f32.xlu1 %v2855_v21 }
0x1319   :  { %v2857_v23 = vpop.xlane.xlu1 %2856 }
0x131a   :  { %v2867_v24 = vadd.f32 %v2866_v22, %v2857_v23 }
0x131c   :  { %v2869_v25 = vadd.f32 %v3962_v3, %v2867_v24 }
0x131e   :  { %2871 = vrot.lane.b32.xlu0 %v2869_v25, %s4083_s14 }
0x1390   :  { %v2872_v26 = vpop.permute.xlu0 %2871 }
0x1391   :  { %2875 = vst.msk [vmem:[%s4616_s8] sm:$0x3] %vm2874_vm10, %v2872_v26 }
0x1392   :  { %2880 = vsyncpa [#allocation10], 1 }
0x1393   :  { %2881 = vsyncpa [#allocation12], 1 }
0x1394   :  { %2882 = vsyncpa [#allocation15], 1 }

</bundles_post_ra>
